<compile_context>
chip_gen: v6e
topology: v6e:2x2x1
jax: 0.10.0
libtpu: 0.0.40
codegen_flags: <defaults>
</compile_context>

<pallas_src>
import functools

import jax
import jax.numpy as jnp
from jax.experimental import pallas as pl
from jax.experimental.pallas import tpu as pltpu

NUM_LAYERS = 13  # MERT: 12 transformer layers + input embedding layer


def _mert_head_kernel(*refs):
    """One (batch, T-tile) block; the 13-layer reduction is unrolled in-block.

    refs layout (inputs..., output):
      refs[0]        : (13,)        SMEM f32  Conv1d(13->1, k=1) weights, flattened
      refs[1 : 14]   : (tile_t, H)  VMEM      one T-tile per MERT layer (f32 or bf16)
      refs[14]       : (H, D)       VMEM bf16 Linear weight, pre-transposed (x @ W^T)
      refs[15]       : (1, D)       VMEM f32  folded bias (conv bias + linear bias)
      refs[16]       : (tile_t, D)  VMEM f32  output tile
    """
    wagg_ref = refs[0]
    x_refs = refs[1:1 + NUM_LAYERS]
    wred_ref, bred_ref, out_ref = refs[1 + NUM_LAYERS:]

    # Conv1d(13->1, kernel_size=1) == weighted sum over the 13 layers.
    # Statically unrolled, f32 value accumulator (single pass, no scratch RMW).
    acc = wagg_ref[0] * x_refs[0][...].astype(jnp.float32)
    for l in range(1, NUM_LAYERS):
        acc = acc + wagg_ref[l] * x_refs[l][...].astype(jnp.float32)

    # reduction_layer: (tile_t, H) @ (H, D) on the MXU, f32 accumulation.
    out = jnp.dot(acc.astype(wred_ref.dtype), wred_ref[...],
                  preferred_element_type=jnp.float32)
    out_ref[...] = (out + bred_ref[...]).astype(out_ref.dtype)


@functools.partial(jax.jit, static_argnames=("tile_t",))
def mert_t5_head(w_agg, xs, w_red_t, b_eff, *, tile_t=256):
    """Fused aggregator + reduction head.

    w_agg   : (13,)  f32   Conv1d(13->1, k=1) weight, flattened
    xs      : list of 13 arrays, each (cb, T, H) -- per-layer hidden states
    w_red_t : (H, D) bf16  Linear weight, pre-transposed (x @ W^T)
    b_eff   : (1, D) f32   folded bias (conv bias + linear bias)
    Returns (cb, T, D) f32.
    """
    assert len(xs) == NUM_LAYERS
    assert tile_t % 8 == 0
    cb, t, h = xs[0].shape
    d = w_red_t.shape[1]
    tile = min(tile_t, ((t + 7) // 8) * 8)
    grid = (cb, pl.cdiv(t, tile))  # partial last T tile handled by masked writeback

    x_spec = pl.BlockSpec((None, tile, h), lambda b, s: (b, s, 0))
    in_specs = ([pl.BlockSpec(memory_space=pltpu.MemorySpace.SMEM)]
                + [x_spec] * NUM_LAYERS
                + [pl.BlockSpec((h, d), lambda b, s: (0, 0)),   # resident weight
                   pl.BlockSpec((1, d), lambda b, s: (0, 0))])  # resident bias
    out_spec = pl.BlockSpec((None, tile, d), lambda b, s: (b, s, 0))

    x_item = xs[0].dtype.itemsize
    x_bytes = NUM_LAYERS * tile * h * x_item
    w_bytes = h * d * w_red_t.dtype.itemsize + d * 4
    o_bytes = tile * d * 4
    vmem_limit = int(min(2 * (x_bytes + w_bytes + o_bytes) + (16 << 20), 64 << 20))

    cost = pl.CostEstimate(
        flops=2 * cb * t * h * d + 2 * NUM_LAYERS * cb * t * h,
        transcendentals=0,
        bytes_accessed=(NUM_LAYERS * cb * t * h * x_item
                        + h * d * w_red_t.dtype.itemsize
                        + cb * t * d * 4),
    )

    return pl.pallas_call(
        _mert_head_kernel,
        out_shape=jax.ShapeDtypeStruct((cb, t, d), jnp.float32),
        grid_spec=pltpu.PrefetchScalarGridSpec(
            num_scalar_prefetch=0,
            grid=grid,
            in_specs=in_specs,
            out_specs=out_spec,
        ),
        compiler_params=pltpu.CompilerParams(
            dimension_semantics=("parallel", "parallel"),
            vmem_limit_bytes=vmem_limit),
        cost_estimate=cost,
    )(w_agg, *xs, w_red_t, b_eff)


def forward(hidden_states, conv_w, conv_b, lin_w, lin_b, T, H, *, tile_t=256):
    """Reproduces MertT5Model.forward's aggregation path.

    hidden_states: list of 13 arrays, each (B, T, H) (MERT output_hidden_states).
    Returns reduced_embeddings: (current_batch_size, T, d_model) f32.
    """
    nl = len(hidden_states)
    B = hidden_states[0].shape[0]
    # torch.stack(...).squeeze(): drops the batch dim iff B == 1 (assumes T > 1 and
    # H > 1, which the module's hardcoded .view(cb, 749, 768) implies).
    current_batch_size = 1 if B == 1 else B

    if current_batch_size == 1:
        # .view(1, 13, -1) on the stacked tensor is the identity rearrangement:
        # channel l is exactly hidden_states[l] -- pass-through, zero extra HBM passes.
        xs = [hs.reshape(1, T, H) for hs in hidden_states]
    else:
        # Bug-compatible with the PyTorch .view(cb, 13, -1) raw reinterpretation of
        # the (13, B, T, H) stack: channel l of batch b aliases
        # hidden_states[(13*b + l) // B][(13*b + l) % B].
        # TODO(synk): this interleaves batch and layer data exactly like the upstream
        # module does for B > 1 (likely an upstream bug, reproduced faithfully).
        xs = [
            jnp.stack([hidden_states[(nl * b + l) // B][(nl * b + l) % B]
                       for b in range(current_batch_size)])
            for l in range(nl)
        ]

    w_agg = conv_w.reshape(nl).astype(jnp.float32)        # Conv1d weight (1, 13, 1)
    w_red_t = lin_w.T.astype(jnp.bfloat16)                # (D, H) -> (H, D)
    # Fold the Conv1d bias into the output bias:
    #   (agg + b_agg) @ W^T + b_lin == agg @ W^T + (b_agg * sum_h W[:, h] + b_lin)
    b_eff = (conv_b.reshape(()).astype(jnp.float32)
             * jnp.sum(lin_w.astype(jnp.float32), axis=1)
             + lin_b.astype(jnp.float32)).reshape(1, -1)  # (1, D)

    return mert_t5_head(w_agg, xs, w_red_t, b_eff, tile_t=tile_t)
    # TODO(synk): the MERT backbone and the downstream T5ForConditionalGeneration
    # (encoder/decoder + LM loss / generate) are external pretrained models and are
    # not re-implemented here; reduced_embeddings is this module's contribution.


if __name__ == "__main__":
    # Small shapes consistent with the module's structure: 13 hidden-state layers,
    # batch=2, seq T=200 (stand-in for 749; exercises the partial last tile),
    # hidden H=256 (stand-in for 768), d_model D=128 (stand-in for 512, lane-dense).
    B, T, H, D = 2, 200, 256, 128
    TILE_T = 128

    key = jax.random.PRNGKey(0)
    k_hs, k_cw, k_cb, k_lw, k_lb = jax.random.split(key, 5)

    hs_all = jax.random.normal(k_hs, (NUM_LAYERS, B, T, H), dtype=jnp.float32)
    hidden_states = [hs_all[i] for i in range(NUM_LAYERS)]

    # Parameter init (shapes per nn.Conv1d(13, 1, 1) / nn.Linear(H, D)).
    conv_w = jax.random.normal(k_cw, (1, NUM_LAYERS, 1), dtype=jnp.float32) * 0.1
    conv_b = jax.random.normal(k_cb, (1,), dtype=jnp.float32) * 0.1
    lin_w = jax.random.normal(k_lw, (D, H), dtype=jnp.float32) * 0.05
    lin_b = jax.random.normal(k_lb, (D,), dtype=jnp.float32) * 0.05

    def references(hs_list):
        # Faithful stack/squeeze/.view semantics of the original module.
        stacked = jnp.stack(hs_list)                       # (13, B, T, H)
        squeezed = jnp.squeeze(stacked)                    # .squeeze()
        cb = 1 if squeezed.ndim == 3 else squeezed.shape[1]
        combined = squeezed.reshape(cb, NUM_LAYERS, -1)    # .view(cb, 13, -1)
        w = conv_w.reshape(NUM_LAYERS)
        agg_nb = jnp.einsum("c,bcl->bl", w, combined).reshape(cb, T, H)  # no conv bias
        # (a) full-f32 semantic reference of the original module math.
        ref_f32 = (agg_nb + conv_b[0]) @ lin_w.T + lin_b
        # (b) matched-precision reference: f32 aggregation, bf16 MXU matmul with f32
        #     accumulation, conv bias folded into the output bias (as the kernel does).
        b_eff = conv_b[0] * jnp.sum(lin_w, axis=1) + lin_b
        ref_match = jnp.einsum("bth,hd->btd", agg_nb.astype(jnp.bfloat16),
                               lin_w.T.astype(jnp.bfloat16),
                               preferred_element_type=jnp.float32) + b_eff
        return ref_f32, ref_match, cb

    # Exercise both the B>1 (bug-compatible interleave) and B==1 (squeeze) paths.
    for hs_case in (hidden_states, [hs[:1] for hs in hidden_states]):
        out = forward(hs_case, conv_w, conv_b, lin_w, lin_b, T, H, tile_t=TILE_T)
        out = jax.block_until_ready(out)
        ref_f32, ref_match, cb = references(hs_case)
        assert out.shape == (cb, T, D), (out.shape, (cb, T, D))
        err_m = float(jnp.max(jnp.abs(out - ref_match)))
        err_f = float(jnp.max(jnp.abs(out - ref_f32)))
        assert jnp.allclose(out, ref_match, atol=2e-2, rtol=2e-2), err_m
        assert jnp.allclose(out, ref_f32, atol=6e-2, rtol=6e-2), err_f

    print("KERNEL_OK")
</pallas_src>

<mosaic_0001>
module attributes {stable_mosaic.version = 11 : i64} {
  func.func @_mert_head_kernel(%arg0: i32, %arg1: i32, %arg2: memref<13xf32, #tpu.memory_space<smem>>, %arg3: memref<1x128x256xf32, #tpu.memory_space<vmem>>, %arg4: memref<1x128x256xf32, #tpu.memory_space<vmem>>, %arg5: memref<1x128x256xf32, #tpu.memory_space<vmem>>, %arg6: memref<1x128x256xf32, #tpu.memory_space<vmem>>, %arg7: memref<1x128x256xf32, #tpu.memory_space<vmem>>, %arg8: memref<1x128x256xf32, #tpu.memory_space<vmem>>, %arg9: memref<1x128x256xf32, #tpu.memory_space<vmem>>, %arg10: memref<1x128x256xf32, #tpu.memory_space<vmem>>, %arg11: memref<1x128x256xf32, #tpu.memory_space<vmem>>, %arg12: memref<1x128x256xf32, #tpu.memory_space<vmem>>, %arg13: memref<1x128x256xf32, #tpu.memory_space<vmem>>, %arg14: memref<1x128x256xf32, #tpu.memory_space<vmem>>, %arg15: memref<1x128x256xf32, #tpu.memory_space<vmem>>, %arg16: memref<256x128xbf16, #tpu.memory_space<vmem>>, %arg17: memref<1x128xf32, #tpu.memory_space<vmem>>, %arg18: memref<1x128x128xf32, #tpu.memory_space<vmem>>) attributes {dimension_semantics = [#tpu.dimension_semantics<parallel>, #tpu.dimension_semantics<parallel>], iteration_bounds = array<i64: 2, 2>, scalar_prefetch = 0 : i64, scratch_operands = 0 : i64, tpu.core_type = #tpu.core_type<tc>, window_params = [{transform_indices = @transform_0, window_bounds = array<i64: 13>}, {transform_indices = @transform_1, window_bounds = array<i64: 1, 128, 256>}, {transform_indices = @transform_2, window_bounds = array<i64: 1, 128, 256>}, {transform_indices = @transform_3, window_bounds = array<i64: 1, 128, 256>}, {transform_indices = @transform_4, window_bounds = array<i64: 1, 128, 256>}, {transform_indices = @transform_5, window_bounds = array<i64: 1, 128, 256>}, {transform_indices = @transform_6, window_bounds = array<i64: 1, 128, 256>}, {transform_indices = @transform_7, window_bounds = array<i64: 1, 128, 256>}, {transform_indices = @transform_8, window_bounds = array<i64: 1, 128, 256>}, {transform_indices = @transform_9, window_bounds = array<i64: 1, 128, 256>}, {transform_indices = @transform_10, window_bounds = array<i64: 1, 128, 256>}, {transform_indices = @transform_11, window_bounds = array<i64: 1, 128, 256>}, {transform_indices = @transform_12, window_bounds = array<i64: 1, 128, 256>}, {transform_indices = @transform_13, window_bounds = array<i64: 1, 128, 256>}, {pipeline_mode = #tpu.pipeline_mode<synchronous>, transform_indices = @transform_14, window_bounds = array<i64: 256, 128>}, {pipeline_mode = #tpu.pipeline_mode<synchronous>, transform_indices = @transform_15, window_bounds = array<i64: 1, 128>}, {transform_indices = @transform_16, window_bounds = array<i64: 1, 128, 128>}]} {
    %c0 = arith.constant 0 : index
    %0 = memref.load %arg2[%c0] : memref<13xf32, #tpu.memory_space<smem>>
    %c0_0 = arith.constant 0 : index
    %c0_1 = arith.constant 0 : index
    %c0_2 = arith.constant 0 : index
    %1 = vector.load %arg3[%c0_0, %c0_1, %c0_2] : memref<1x128x256xf32, #tpu.memory_space<vmem>>, vector<1x128x256xf32>
    %2 = vector.shape_cast %1 : vector<1x128x256xf32> to vector<128x256xf32>
    %3 = vector.broadcast %0 : f32 to vector<128x256xf32>
    %4 = arith.mulf %3, %2 : vector<128x256xf32>
    %c1 = arith.constant 1 : index
    %5 = memref.load %arg2[%c1] : memref<13xf32, #tpu.memory_space<smem>>
    %c0_3 = arith.constant 0 : index
    %c0_4 = arith.constant 0 : index
    %c0_5 = arith.constant 0 : index
    %6 = vector.load %arg4[%c0_3, %c0_4, %c0_5] : memref<1x128x256xf32, #tpu.memory_space<vmem>>, vector<1x128x256xf32>
    %7 = vector.shape_cast %6 : vector<1x128x256xf32> to vector<128x256xf32>
    %8 = vector.broadcast %5 : f32 to vector<128x256xf32>
    %9 = arith.mulf %8, %7 : vector<128x256xf32>
    %10 = arith.addf %4, %9 : vector<128x256xf32>
    %c2 = arith.constant 2 : index
    %11 = memref.load %arg2[%c2] : memref<13xf32, #tpu.memory_space<smem>>
    %c0_6 = arith.constant 0 : index
    %c0_7 = arith.constant 0 : index
    %c0_8 = arith.constant 0 : index
    %12 = vector.load %arg5[%c0_6, %c0_7, %c0_8] : memref<1x128x256xf32, #tpu.memory_space<vmem>>, vector<1x128x256xf32>
    %13 = vector.shape_cast %12 : vector<1x128x256xf32> to vector<128x256xf32>
    %14 = vector.broadcast %11 : f32 to vector<128x256xf32>
    %15 = arith.mulf %14, %13 : vector<128x256xf32>
    %16 = arith.addf %10, %15 : vector<128x256xf32>
    %c3 = arith.constant 3 : index
    %17 = memref.load %arg2[%c3] : memref<13xf32, #tpu.memory_space<smem>>
    %c0_9 = arith.constant 0 : index
    %c0_10 = arith.constant 0 : index
    %c0_11 = arith.constant 0 : index
    %18 = vector.load %arg6[%c0_9, %c0_10, %c0_11] : memref<1x128x256xf32, #tpu.memory_space<vmem>>, vector<1x128x256xf32>
    %19 = vector.shape_cast %18 : vector<1x128x256xf32> to vector<128x256xf32>
    %20 = vector.broadcast %17 : f32 to vector<128x256xf32>
    %21 = arith.mulf %20, %19 : vector<128x256xf32>
    %22 = arith.addf %16, %21 : vector<128x256xf32>
    %c4 = arith.constant 4 : index
    %23 = memref.load %arg2[%c4] : memref<13xf32, #tpu.memory_space<smem>>
    %c0_12 = arith.constant 0 : index
    %c0_13 = arith.constant 0 : index
    %c0_14 = arith.constant 0 : index
    %24 = vector.load %arg7[%c0_12, %c0_13, %c0_14] : memref<1x128x256xf32, #tpu.memory_space<vmem>>, vector<1x128x256xf32>
    %25 = vector.shape_cast %24 : vector<1x128x256xf32> to vector<128x256xf32>
    %26 = vector.broadcast %23 : f32 to vector<128x256xf32>
    %27 = arith.mulf %26, %25 : vector<128x256xf32>
    %28 = arith.addf %22, %27 : vector<128x256xf32>
    %c5 = arith.constant 5 : index
    %29 = memref.load %arg2[%c5] : memref<13xf32, #tpu.memory_space<smem>>
    %c0_15 = arith.constant 0 : index
    %c0_16 = arith.constant 0 : index
    %c0_17 = arith.constant 0 : index
    %30 = vector.load %arg8[%c0_15, %c0_16, %c0_17] : memref<1x128x256xf32, #tpu.memory_space<vmem>>, vector<1x128x256xf32>
    %31 = vector.shape_cast %30 : vector<1x128x256xf32> to vector<128x256xf32>
    %32 = vector.broadcast %29 : f32 to vector<128x256xf32>
    %33 = arith.mulf %32, %31 : vector<128x256xf32>
    %34 = arith.addf %28, %33 : vector<128x256xf32>
    %c6 = arith.constant 6 : index
    %35 = memref.load %arg2[%c6] : memref<13xf32, #tpu.memory_space<smem>>
    %c0_18 = arith.constant 0 : index
    %c0_19 = arith.constant 0 : index
    %c0_20 = arith.constant 0 : index
    %36 = vector.load %arg9[%c0_18, %c0_19, %c0_20] : memref<1x128x256xf32, #tpu.memory_space<vmem>>, vector<1x128x256xf32>
    %37 = vector.shape_cast %36 : vector<1x128x256xf32> to vector<128x256xf32>
    %38 = vector.broadcast %35 : f32 to vector<128x256xf32>
    %39 = arith.mulf %38, %37 : vector<128x256xf32>
    %40 = arith.addf %34, %39 : vector<128x256xf32>
    %c7 = arith.constant 7 : index
    %41 = memref.load %arg2[%c7] : memref<13xf32, #tpu.memory_space<smem>>
    %c0_21 = arith.constant 0 : index
    %c0_22 = arith.constant 0 : index
    %c0_23 = arith.constant 0 : index
    %42 = vector.load %arg10[%c0_21, %c0_22, %c0_23] : memref<1x128x256xf32, #tpu.memory_space<vmem>>, vector<1x128x256xf32>
    %43 = vector.shape_cast %42 : vector<1x128x256xf32> to vector<128x256xf32>
    %44 = vector.broadcast %41 : f32 to vector<128x256xf32>
    %45 = arith.mulf %44, %43 : vector<128x256xf32>
    %46 = arith.addf %40, %45 : vector<128x256xf32>
    %c8 = arith.constant 8 : index
    %47 = memref.load %arg2[%c8] : memref<13xf32, #tpu.memory_space<smem>>
    %c0_24 = arith.constant 0 : index
    %c0_25 = arith.constant 0 : index
    %c0_26 = arith.constant 0 : index
    %48 = vector.load %arg11[%c0_24, %c0_25, %c0_26] : memref<1x128x256xf32, #tpu.memory_space<vmem>>, vector<1x128x256xf32>
    %49 = vector.shape_cast %48 : vector<1x128x256xf32> to vector<128x256xf32>
    %50 = vector.broadcast %47 : f32 to vector<128x256xf32>
    %51 = arith.mulf %50, %49 : vector<128x256xf32>
    %52 = arith.addf %46, %51 : vector<128x256xf32>
    %c9 = arith.constant 9 : index
    %53 = memref.load %arg2[%c9] : memref<13xf32, #tpu.memory_space<smem>>
    %c0_27 = arith.constant 0 : index
    %c0_28 = arith.constant 0 : index
    %c0_29 = arith.constant 0 : index
    %54 = vector.load %arg12[%c0_27, %c0_28, %c0_29] : memref<1x128x256xf32, #tpu.memory_space<vmem>>, vector<1x128x256xf32>
    %55 = vector.shape_cast %54 : vector<1x128x256xf32> to vector<128x256xf32>
    %56 = vector.broadcast %53 : f32 to vector<128x256xf32>
    %57 = arith.mulf %56, %55 : vector<128x256xf32>
    %58 = arith.addf %52, %57 : vector<128x256xf32>
    %c10 = arith.constant 10 : index
    %59 = memref.load %arg2[%c10] : memref<13xf32, #tpu.memory_space<smem>>
    %c0_30 = arith.constant 0 : index
    %c0_31 = arith.constant 0 : index
    %c0_32 = arith.constant 0 : index
    %60 = vector.load %arg13[%c0_30, %c0_31, %c0_32] : memref<1x128x256xf32, #tpu.memory_space<vmem>>, vector<1x128x256xf32>
    %61 = vector.shape_cast %60 : vector<1x128x256xf32> to vector<128x256xf32>
    %62 = vector.broadcast %59 : f32 to vector<128x256xf32>
    %63 = arith.mulf %62, %61 : vector<128x256xf32>
    %64 = arith.addf %58, %63 : vector<128x256xf32>
    %c11 = arith.constant 11 : index
    %65 = memref.load %arg2[%c11] : memref<13xf32, #tpu.memory_space<smem>>
    %c0_33 = arith.constant 0 : index
    %c0_34 = arith.constant 0 : index
    %c0_35 = arith.constant 0 : index
    %66 = vector.load %arg14[%c0_33, %c0_34, %c0_35] : memref<1x128x256xf32, #tpu.memory_space<vmem>>, vector<1x128x256xf32>
    %67 = vector.shape_cast %66 : vector<1x128x256xf32> to vector<128x256xf32>
    %68 = vector.broadcast %65 : f32 to vector<128x256xf32>
    %69 = arith.mulf %68, %67 : vector<128x256xf32>
    %70 = arith.addf %64, %69 : vector<128x256xf32>
    %c12 = arith.constant 12 : index
    %71 = memref.load %arg2[%c12] : memref<13xf32, #tpu.memory_space<smem>>
    %c0_36 = arith.constant 0 : index
    %c0_37 = arith.constant 0 : index
    %c0_38 = arith.constant 0 : index
    %72 = vector.load %arg15[%c0_36, %c0_37, %c0_38] : memref<1x128x256xf32, #tpu.memory_space<vmem>>, vector<1x128x256xf32>
    %73 = vector.shape_cast %72 : vector<1x128x256xf32> to vector<128x256xf32>
    %74 = vector.broadcast %71 : f32 to vector<128x256xf32>
    %75 = arith.mulf %74, %73 : vector<128x256xf32>
    %76 = arith.addf %70, %75 : vector<128x256xf32>
    %77 = arith.truncf %76 : vector<128x256xf32> to vector<128x256xbf16>
    %c0_39 = arith.constant 0 : index
    %c0_40 = arith.constant 0 : index
    %78 = vector.load %arg16[%c0_39, %c0_40] : memref<256x128xbf16, #tpu.memory_space<vmem>>, vector<256x128xbf16>
    %cst = arith.constant dense<0.000000e+00> : vector<128x128xf32>
    %79 = tpu.matmul %77, %78, %cst {dimension_numbers = #tpu.dot_dimension_numbers<[1], [0], [0], [1], [0, 0, 1, 1], [], []>} : vector<128x256xbf16>, vector<256x128xbf16>, vector<128x128xf32> -> vector<128x128xf32>
    %c0_41 = arith.constant 0 : index
    %c0_42 = arith.constant 0 : index
    %80 = vector.load %arg17[%c0_41, %c0_42] : memref<1x128xf32, #tpu.memory_space<vmem>>, vector<1x128xf32>
    %81 = vector.broadcast %80 : vector<1x128xf32> to vector<128x128xf32>
    %82 = arith.addf %79, %81 : vector<128x128xf32>
    %c0_43 = arith.constant 0 : index
    %c0_44 = arith.constant 0 : index
    %c0_45 = arith.constant 0 : index
    %83 = vector.load %arg18[%c0_43, %c0_44, %c0_45] : memref<1x128x128xf32, #tpu.memory_space<vmem>>, vector<1x128x128xf32>
    %84 = vector.shape_cast %83 : vector<1x128x128xf32> to vector<128x128xf32>
    %85 = vector.shape_cast %82 : vector<128x128xf32> to vector<1x128x128xf32>
    tpu.vector_store %arg18[%c0_43, %c0_44, %c0_45], %85 {strides = array<i32>} : memref<1x128x128xf32, #tpu.memory_space<vmem>>, vector<1x128x128xf32>,
    return
  }
  func.func @transform_0(%arg0: i32, %arg1: i32) -> i32 {
    %c0_i32 = arith.constant 0 : i32
    %c0_i32_0 = arith.constant 0 : i32
    return %c0_i32 : i32
  }
  func.func @transform_1(%arg0: i32, %arg1: i32) -> (i32, i32, i32) {
    %c0_i32 = arith.constant 0 : i32
    %c0_i32_0 = arith.constant 0 : i32
    return %arg0, %arg1, %c0_i32 : i32, i32, i32
  }
  func.func @transform_2(%arg0: i32, %arg1: i32) -> (i32, i32, i32) {
    %c0_i32 = arith.constant 0 : i32
    %c0_i32_0 = arith.constant 0 : i32
    return %arg0, %arg1, %c0_i32 : i32, i32, i32
  }
  func.func @transform_3(%arg0: i32, %arg1: i32) -> (i32, i32, i32) {
    %c0_i32 = arith.constant 0 : i32
    %c0_i32_0 = arith.constant 0 : i32
    return %arg0, %arg1, %c0_i32 : i32, i32, i32
  }
  func.func @transform_4(%arg0: i32, %arg1: i32) -> (i32, i32, i32) {
    %c0_i32 = arith.constant 0 : i32
    %c0_i32_0 = arith.constant 0 : i32
    return %arg0, %arg1, %c0_i32 : i32, i32, i32
  }
  func.func @transform_5(%arg0: i32, %arg1: i32) -> (i32, i32, i32) {
    %c0_i32 = arith.constant 0 : i32
    %c0_i32_0 = arith.constant 0 : i32
    return %arg0, %arg1, %c0_i32 : i32, i32, i32
  }
  func.func @transform_6(%arg0: i32, %arg1: i32) -> (i32, i32, i32) {
    %c0_i32 = arith.constant 0 : i32
    %c0_i32_0 = arith.constant 0 : i32
    return %arg0, %arg1, %c0_i32 : i32, i32, i32
  }
  func.func @transform_7(%arg0: i32, %arg1: i32) -> (i32, i32, i32) {
    %c0_i32 = arith.constant 0 : i32
    %c0_i32_0 = arith.constant 0 : i32
    return %arg0, %arg1, %c0_i32 : i32, i32, i32
  }
  func.func @transform_8(%arg0: i32, %arg1: i32) -> (i32, i32, i32) {
    %c0_i32 = arith.constant 0 : i32
    %c0_i32_0 = arith.constant 0 : i32
    return %arg0, %arg1, %c0_i32 : i32, i32, i32
  }
  func.func @transform_9(%arg0: i32, %arg1: i32) -> (i32, i32, i32) {
    %c0_i32 = arith.constant 0 : i32
    %c0_i32_0 = arith.constant 0 : i32
    return %arg0, %arg1, %c0_i32 : i32, i32, i32
  }
  func.func @transform_10(%arg0: i32, %arg1: i32) -> (i32, i32, i32) {
    %c0_i32 = arith.constant 0 : i32
    %c0_i32_0 = arith.constant 0 : i32
    return %arg0, %arg1, %c0_i32 : i32, i32, i32
  }
  func.func @transform_11(%arg0: i32, %arg1: i32) -> (i32, i32, i32) {
    %c0_i32 = arith.constant 0 : i32
    %c0_i32_0 = arith.constant 0 : i32
    return %arg0, %arg1, %c0_i32 : i32, i32, i32
  }
  func.func @transform_12(%arg0: i32, %arg1: i32) -> (i32, i32, i32) {
    %c0_i32 = arith.constant 0 : i32
    %c0_i32_0 = arith.constant 0 : i32
    return %arg0, %arg1, %c0_i32 : i32, i32, i32
  }
  func.func @transform_13(%arg0: i32, %arg1: i32) -> (i32, i32, i32) {
    %c0_i32 = arith.constant 0 : i32
    %c0_i32_0 = arith.constant 0 : i32
    return %arg0, %arg1, %c0_i32 : i32, i32, i32
  }
  func.func @transform_14(%arg0: i32, %arg1: i32) -> (i32, i32) {
    %c0_i32 = arith.constant 0 : i32
    %c0_i32_0 = arith.constant 0 : i32
    %c0_i32_1 = arith.constant 0 : i32
    return %c0_i32, %c0_i32_0 : i32, i32
  }
  func.func @transform_15(%arg0: i32, %arg1: i32) -> (i32, i32) {
    %c0_i32 = arith.constant 0 : i32
    %c0_i32_0 = arith.constant 0 : i32
    %c0_i32_1 = arith.constant 0 : i32
    return %c0_i32, %c0_i32_0 : i32, i32
  }
  func.func @transform_16(%arg0: i32, %arg1: i32) -> (i32, i32, i32) {
    %c0_i32 = arith.constant 0 : i32
    %c0_i32_0 = arith.constant 0 : i32
    return %arg0, %arg1, %c0_i32 : i32, i32, i32
  }
}

</mosaic_0001>

<bundles_post_ra>
// kernel: mert_t5_head.1
= control target key start
LH: loop header
LB: loop body
LE: loop exit
PB: predicated region body
PF: predicated region fallthrough
CT: control target
= control target key end

     0   :  { %s6040_s0 = inlined_call_operand.hbm [shape: f32[13], index: 0, kind: input, shape index: {}]   ;;  %s6041_s1 = inlined_call_operand.hbm [shape: f32[2,200,256], index: 1, kind: input, shape index: {}]   ;;  %s6042_s2 = inlined_call_operand.hbm [shape: f32[2,200,256], index: 2, kind: input, shape index: {}]   ;;  %s6043_s3 = inlined_call_operand.hbm [shape: f32[2,200,256], index: 3, kind: input, shape index: {}]   ;;  %s6044_s4 = inlined_call_operand.hbm [shape: f32[2,200,256], index: 4, kind: input, shape index: {}]   ;;  %s6045_s5 = inlined_call_operand.hbm [shape: f32[2,200,256], index: 5, kind: input, shape index: {}]   ;;  %s6046_s6 = inlined_call_operand.hbm [shape: f32[2,200,256], index: 6, kind: input, shape index: {}]   ;;  %s6047_s7 = inlined_call_operand.hbm [shape: f32[2,200,256], index: 7, kind: input, shape index: {}]   ;;  %s6048_s8 = inlined_call_operand.hbm [shape: f32[2,200,256], index: 8, kind: input, shape index: {}]   ;;  %s6049_s9 = inlined_call_operand.hbm [shape: f32[2,200,256], index: 9, kind: input, shape index: {}]   ;;  %s6050_s10 = inlined_call_operand.hbm [shape: f32[2,200,256], index: 10, kind: input, shape index: {}]   ;;  %s6051_s11 = inlined_call_operand.hbm [shape: f32[2,200,256], index: 11, kind: input, shape index: {}]   ;;  %s6052_s12 = inlined_call_operand.hbm [shape: f32[2,200,256], index: 12, kind: input, shape index: {}]   ;;  %s6053_s13 = inlined_call_operand.hbm [shape: f32[2,200,256], index: 13, kind: input, shape index: {}]   ;;  %s6054_s14 = inlined_call_operand.hbm [shape: bf16[256,128], index: 14, kind: input, shape index: {}]   ;;  %s6055_s15 = inlined_call_operand.vmem [shape: f32[1,128], index: 15, kind: input, shape index: {}]   ;;  %s6056_s16 = inlined_call_operand.hbm [shape: f32[2,200,128], index: 16, kind: output, shape index: {}]  }
   0x1   :  { %6071 = sst [smem:[#allocation50_spill]] %s6040_s0 }
   0x2   :  { %6072 = sst [smem:[#allocation51_spill]] %s6041_s1 }
   0x3   :  { %6073 = sst [smem:[#allocation52_spill]] %s6042_s2 }
   0x4   :  { %6074 = sst [smem:[#allocation53_spill]] %s6043_s3 }
   0x5   :  { %6075 = sst [smem:[#allocation54_spill]] %s6044_s4 }
   0x6   :  { %6076 = sst [smem:[#allocation55_spill]] %s6045_s5 }
   0x7   :  { %6077 = sst [smem:[#allocation56_spill]] %s6046_s6 }
   0x8   :  { %6078 = sst [smem:[#allocation57_spill]] %s6047_s7 }
   0x9   :  { %6079 = sst [smem:[#allocation58_spill]] %s6048_s8 }
   0xa   :  { %6080 = sst [smem:[#allocation59_spill]] %s6053_s13 }
   0xb   :  { %6081 = sst [smem:[#allocation60_spill]] %s6054_s14 }
   0xc   :  { %6082 = sst [smem:[#allocation61_spill]] %s6055_s15 }
   0xd   :  { %6083 = sst [smem:[#allocation62_spill]] %s6056_s16 }
   0xe   :  { %21 = vsyncpa [#allocation5], 0 }
   0xf   :  { %22 = vsyncpa [#allocation3], 0 }
  0x10   :  { %24 = vsyncpa [#allocation3 + $0x1], 0 }
  0x11   :  { %25 = vsyncpa [#allocation8], 0 }
  0x12   :  { %27 = vsyncpa [#allocation8 + $0x1], 0 }
  0x13   :  { %28 = vsyncpa [#allocation11], 0 }
  0x14   :  { %30 = vsyncpa [#allocation11 + $0x1], 0 }
  0x15   :  { %31 = vsyncpa [#allocation14], 0 }
  0x16   :  { %33 = vsyncpa [#allocation14 + $0x1], 0 }
  0x17   :  { %34 = vsyncpa [#allocation17], 0 }
  0x18   :  { %36 = vsyncpa [#allocation17 + $0x1], 0 }
  0x19   :  { %37 = vsyncpa [#allocation20], 0 }
  0x1a   :  { %39 = vsyncpa [#allocation20 + $0x1], 0 }
  0x1b   :  { %40 = vsyncpa [#allocation23], 0 }
  0x1c   :  { %42 = vsyncpa [#allocation23 + $0x1], 0 }
  0x1d   :  { %43 = vsyncpa [#allocation26], 0 }
  0x1e   :  { %44 = vsyncpa [#allocation4], 0 }
  0x1f   :  { %46 = vsyncpa [#allocation4 + $0x1], 0  ;;  %s4301_s21 = smov 0   ;;  %s4303_s22 = smov 0  }
  0x20   :  { %s4305_s23 = smov 0   ;;  %s4307_s24 = smov 0  }
  0x21   :  { %s4309_s25 = smov 0   ;;  %s4311_s26 = smov 0  }
  0x22   :  { %s4313_s27 = smov 0   ;;  %s4315_s28 = smov 0  }
  0x23 LB: > { %6084 = sst [smem:[#allocation38_spill]] %s4140_s21  ;;  %s4342_s29 = sadd.s32 4294967295, %s4168_s28   ;;  %s4168_s28 = sphi %s4315_s28, %s52_s28   ;;  %s4164_s27 = sphi %s4313_s27, %s6141_s27   ;;  %s4160_s26 = sphi %s4311_s26, %s6140_s26   ;;  %s4156_s25 = sphi %s4309_s25, %s6139_s25   ;;  %s4152_s24 = sphi %s4307_s24, %s6138_s24   ;;  %s4148_s23 = sphi %s4305_s23, %s6137_s23   ;;  %s4144_s22 = sphi %s4303_s22, %s6136_s22   ;;  %s4140_s21 = sphi %s4301_s21, %s6132_s21  }
  0x24   : > { %6085 = sst [smem:[#allocation39_spill]] %s4144_s22  ;;  %s3218_s30 = sadd.s32 4294967294, %s4168_s28  }
  0x25   : > { %6086 = sst [smem:[#allocation40_spill]] %s4152_s24  ;;  %s61_s0 = sadd.s32 1, %s4160_s26 }
  0x26   : > { %6087 = sst [smem:[#allocation41_spill]] %s4156_s25  ;;  %s64_s17 = sadd.s32 1, %s4164_s27 }
  0x27   : > { %6088 = sst [smem:[#allocation42_spill]] %s4342_s29  ;;  %p62_p0 = scmp.ge.s32.totalorder %s61_s0, 2 }
  0x28   : > { %s94_s18 = sadd.s32 1, %s4148_s23  ;;  %p101_p1 = scmp.ne.s32.totalorder %s4148_s23, %s4144_s22 }
  0x29   : > { %p102_p2 = scmp.eq.s32.totalorder %s4168_s28, 0  ;;  %s6143_s0 = smov (%p62_p0, %s61_s0), 0 }
  0x2a   : > { %6089 = sst [smem:[#allocation43_spill]] %s6143_s0  ;;  %s6145_s17 = smov (!%p62_p0, %s64_s17), %s4164_s27 }
  0x2b   : > { %s90_s19 = ssub.s32 %s4160_s26, %s6143_s0  ;;  %p4356_p3 = por %p102_p2, %p101_p1 }
  0x2c   : > { %p66_p4 = scmp.ge.s32.totalorder %s6145_s17, 2  ;;  %p107_p5 = scmp.ne.s32.totalorder %s4144_s22, %s4140_s21 }
  0x2d   : > { %p6063_p6 = scmp.eq.s32.totalorder %s4342_s29, 0  ;;  %p511_p7 = scmp.eq.s32.totalorder %s4342_s29, 3 }
  0x2e   : > { %s6147_s17 = smov (%p66_p4, %s6145_s17), 0  ;;  %p517_p10 = scmp.eq.s32.totalorder %s3218_s30, 3 }
  0x2f   : > { %6091 = sst [smem:[#allocation44_spill]] %s6147_s17  ;;  %p4368_p8 = por %p6063_p6, %p107_p5 }
  0x30   : > { %p4372_p9 = por %p511_p7, %p101_p1  ;;  %s89_s25 = ssub.s32 %s4164_s27, %s6147_s17 }
  0x31   : > { %s6092_s16 = scalar_select %p4368_p8, 1, 0 }
  0x32   : > { %s6094_s0 = scalar_select %p4372_p9, 1, 0 }
  0x33   : > { %6093 = sst [smem:[#allocation45_spill]] %s6092_s16  ;;  %s91_s24 = sor.u32 %s90_s19, %s89_s25 }
  0x34   : > { %6095 = sst [smem:[#allocation46_spill]] %s6094_s0  ;;  %p3219_p11 = scmp.ge.s32.totalorder %s4168_s28, 1 }
  0x35   : > { %p92_p12 = scmp.eq.s32.totalorder %s91_s24, 0  ;;  %p4379_p13 = por %p517_p10, %p107_p5 }
  0x36   : > { %p524_p0 = scmp.lt.s32.totalorder %s4168_s28, 5  ;;  %s4170_s0 = smov [#allocation25]  }
  0x37   : > { %s6096_s21 = scalar_select %p4379_p13, 1, 0 }
  0x38   : > { %s4385_s15 = scalar_select %p92_p12, %s4148_s23, %s94_s18  }
  0x39   : > { %6097 = sst [smem:[#allocation47_spill]] %s6096_s21  ;;  %p4387_p2 = pnand %p3219_p11, %p524_p0 }
  0x3a   : > { %6098 = sst [smem:[#allocation48_spill]] %s4385_s15  ;;  %s545_s17 = sshll.u32 %s4170_s0, 4  ;;  %s546_s17 = int_to_ptr.vmem [resolvable:$true] %s545_s17 }
  0x3b   : > { %s6099_s22 = scalar_select %p4387_p2, 1, 0 }
  0x3c   : > { %p3537_p1 = pneg %p4387_p2  ;;  %s4171_s24 = smov [#allocation2]  }
  0x3d   : > { %6100 = sst [smem:[#allocation49_spill]] %s6099_s22  ;;  %s3687_s15 = scalar_lea.vmem %s546_s17, 2048 }
  0x3e   : > { %p4395_p4 = pnand %p3537_p1, %p6063_p6  ;;  %s6102_s19 = sld [smem:[#allocation50_spill]] }
  0x3f   : > { %p3688_p7 = scmp.ne.s32.totalorder %s546_s17, %s3687_s15  ;;  %p3695_p12 = scmp.lt.s32.totalorder %s546_s17, %s546_s17 }
  0x40   : > { %p3678_p5 = pneg %p4395_p4  ;;  %p3696_p0 = scmp.lt.s32.totalorder %s3687_s15, %s3687_s15 }
  0x42   : > { %p3690_p10 = pnand %p3688_p7, %p3678_p5  ;;  %p3697_p1 = por %p3696_p0, %p3695_p12 }
  0x44   : > { %3540 = dma.hbm_to_smem (!%p4395_p4), %s6102_s19, 16, %s4171_s24, [#allocation5]  }
  0x45   : > { %p3691_p11 = pneg %p3690_p10 }
  0x47   : > { %p3698_p6 = pnand %p3697_p1, %p3691_p11 }
  0x49   : > { %3701 = shalt.err (!%p3698_p6)
}
  0x4a   : > { %s4172_s0 = smov 64   ;;  %s4173_s21 = smov 4  }
  0x4b   : > { %s6103_s14 = sld [smem:[#allocation60_spill]]  ;;  %p3222_p13 = scmp.ge.s32.totalorder %s4168_s28, 4 }
  0x4d   : > { %558 = sbr.rel (%p3222_p13) target bundleno = 577 (0x241), region = 28 }
  0x51   : > { %3543 = dma.hbm_to_vmem [thread:$0]  (!%p4395_p4), %s6103_s14, 2048, %s546_s17, [#allocation26], %s4172_s0, %s4172_s0, %s4173_s21  }
  0x52   : > { %561 = sbr.rel (!%p4356_p3) target bundleno = 121 (0x79), region = 32  ;;  %s562_s15 = sand.u32 (%p4356_p3), 1, %s4148_s23  }
  0x53   : > { %s3224_s24 = sshll.u32 (%p4356_p3), %s4160_s26, 4  ;;  %s3223_s30 = sshll.u32 (%p4356_p3), %s562_s15, 8 }
  0x54   : > { %s568_s18 = ssub.s32 (%p4356_p3), 25, %s3224_s24  ;;  %s4419_s16 = scalar_lea.sflag (%p4356_p3), [#allocation3], %s562_s15 }
  0x55   : > { %p569_p6 = scmp.lt.s32.totalorder (%p4356_p3), %s568_s18, 16  ;;  %s566_s21 = scalar_lea.vmem (%p4356_p3), [#allocation6], %s3223_s30 }
  0x57   : > { %s6149_s18 = smov (!%p569_p6, %s568_s18), 16 }
  0x58   : > { %s4416_s19 = sshll.u32 %s6149_s18, 8 }
  0x59   : > { %s574_s25 = ssub.s32 4096, %s4416_s19 }
  0x5a   : > { %575 = vsyncadd %s4419_s16, %s574_s25  ;;  %p3227_p13 = scmp.ne.s32.totalorder %s4416_s19, 0  ;;  %s3396_s29 = sshll.u32 %s4160_s26, 5 }
  0x5b   : > { %s3501_s17 = smul.u32 50, %s4164_s27  ;;  %s583_s0 = sshll.u32 %s566_s21, 4  ;;  %s4425_s0 = int_to_ptr.vmem [resolvable:$true] %s583_s0 }
  0x5c   : > { %s6104_s1 = sld [smem:[#allocation51_spill]] }
  0x5d   : > { %s579_s24 = sadd.s32 %s3501_s17, %s3396_s29 }
  0x5e   : > { %s3229_s18 = sshll.u32 %s579_s24, 7 }
  0x62   : > { %s4430_s15 = scalar_lea.hbm %s6104_s1, %s3229_s18  ;;  %s3706_s21 = scalar_lea.hbm %s6104_s1, 12800 }
  0x63   : > { %s3702_s30 = scalar_lea.hbm %s4430_s15, %s4416_s19 }
  0x64   : > { %p3703_p4 = scmp.ne.s32.totalorder %s4430_s15, %s3702_s30  ;;  %p3708_p10 = scmp.lt.s32.totalorder %s3706_s21, %s3702_s30 }
  0x66   : > { %p3704_p5 = pnand %p3703_p4, %p3227_p13 }
  0x68   : > { %p3705_p7 = pneg %p3704_p5 }
  0x6a   : > { %p3710_p11 = pnand %p3708_p10, %p3705_p7 }
  0x6c   : > { %3713 = shalt.err (!%p3710_p11)
}
  0x6d   : > { %s3714_s14 = scalar_lea.vmem %s4425_s0, %s4416_s19  ;;  %s4174_s22 = smov [#allocation6]  }
  0x6e   : > { %p3715_p12 = scmp.ne.s32.totalorder %s4425_s0, %s3714_s14  ;;  %s3718_s29 = sshll.u32 %s4174_s22, 4  ;;  %s3719_s29 = int_to_ptr.vmem [resolvable:$false] %s3718_s29 }
  0x6f   : > { %s3720_s17 = scalar_lea.vmem %s3719_s29, 8192  ;;  %p3721_p6 = scmp.lt.s32.totalorder %s4425_s0, %s3719_s29 }
  0x70   : > { %p3716_p0 = pnand %p3715_p12, %p3227_p13  ;;  %p3722_p4 = scmp.lt.s32.totalorder %s3720_s17, %s3714_s14 }
  0x72   : > { %p3717_p1 = pneg %p3716_p0  ;;  %p3723_p5 = por %p3722_p4, %p3721_p6 }
  0x74   : > { %p3724_p9 = pnand %p3723_p5, %p3717_p1 }
  0x76   : > { %3727 = shalt.err (!%p3724_p9)
}
  0x77   : > { %s4175_s13 = smov 256   ;;  %s4176_s24 = smov 16  }
  0x78   : > { %589 = dma.hbm_to_vmem [thread:$0]  (%p3227_p13), %s4430_s15, %s4416_s19, %s4425_s0, %s4419_s16, %s4175_s13, %s4175_s13, %s4176_s24  }
  0x79 PF: > { %592 = sbr.rel (!%p4356_p3) target bundleno = 160 (0xa0), region = 36  ;;  %s593_s18 = sand.u32 (%p4356_p3), 1, %s4168_s28  }
  0x7a   : > { %s595_s30 = sand.u32 (%p4356_p3), 1, %s4148_s23   ;;  %s3233_s21 = sshll.u32 (%p4356_p3), %s4160_s26, 4 }
  0x7b   : > { %s3232_s25 = sshll.u32 (%p4356_p3), %s595_s30, 8  ;;  %s599_s14 = ssub.s32 (%p4356_p3), 25, %s3233_s21 }
  0x7c   : > { %p600_p9 = scmp.lt.s32.totalorder (%p4356_p3), %s599_s14, 16  ;;  %s4460_s17 = scalar_lea.sflag (%p4356_p3), [#allocation8], %s593_s18 }
  0x7d   : > { %s597_s19 = scalar_lea.vmem (%p4356_p3), [#allocation7], %s3232_s25 }
  0x7e   : > { %s6151_s14 = smov (!%p600_p9, %s599_s14), 16 }
  0x7f   : > { %s4457_s22 = sshll.u32 %s6151_s14, 8 }
  0x80   : > { %s605_s29 = ssub.s32 4096, %s4457_s22 }
  0x81   : > { %606 = vsyncadd %s4460_s17, %s605_s29  ;;  %p3236_p13 = scmp.ne.s32.totalorder %s4457_s22, 0  ;;  %s3398_s16 = sshll.u32 %s4160_s26, 5 }
  0x82   : > { %s3502_s0 = smul.u32 50, %s4164_s27  ;;  %s614_s15 = sshll.u32 %s597_s19, 4  ;;  %s4466_s15 = int_to_ptr.vmem [resolvable:$true] %s614_s15 }
  0x83   : > { %s6105_s2 = sld [smem:[#allocation52_spill]] }
  0x84   : > { %s610_s13 = sadd.s32 %s3502_s0, %s3398_s16 }
  0x85   : > { %s3238_s24 = sshll.u32 %s610_s13, 7 }
  0x89   : > { %s4471_s18 = scalar_lea.hbm %s6105_s2, %s3238_s24  ;;  %s3732_s19 = scalar_lea.hbm %s6105_s2, 12800 }
  0x8a   : > { %s3728_s25 = scalar_lea.hbm %s4471_s18, %s4457_s22 }
  0x8b   : > { %p3729_p7 = scmp.ne.s32.totalorder %s4471_s18, %s3728_s25  ;;  %p3734_p12 = scmp.lt.s32.totalorder %s3732_s19, %s3728_s25 }
  0x8d   : > { %p3730_p10 = pnand %p3729_p7, %p3236_p13 }
  0x8f   : > { %p3731_p11 = pneg %p3730_p10 }
  0x91   : > { %p3736_p0 = pnand %p3734_p12, %p3731_p11 }
  0x93   : > { %3739 = shalt.err (!%p3736_p0)
}
  0x94   : > { %s3740_s16 = scalar_lea.vmem %s4466_s15, %s4457_s22  ;;  %s4177_s0 = smov [#allocation7]  }
  0x95   : > { %p3741_p1 = scmp.ne.s32.totalorder %s4466_s15, %s3740_s16  ;;  %s3744_s13 = sshll.u32 %s4177_s0, 4  ;;  %s3745_s13 = int_to_ptr.vmem [resolvable:$false] %s3744_s13 }
  0x96   : > { %s3746_s24 = scalar_lea.vmem %s3745_s13, 8192  ;;  %p3747_p5 = scmp.lt.s32.totalorder %s4466_s15, %s3745_s13 }
  0x97   : > { %p3742_p6 = pnand %p3741_p1, %p3236_p13  ;;  %p3748_p9 = scmp.lt.s32.totalorder %s3746_s24, %s3740_s16 }
  0x99   : > { %p3743_p4 = pneg %p3742_p6  ;;  %p3749_p7 = por %p3748_p9, %p3747_p5 }
  0x9b   : > { %p3750_p10 = pnand %p3749_p7, %p3743_p4 }
  0x9d   : > { %3753 = shalt.err (!%p3750_p10)
}
  0x9e   : > { %s4178_s30 = smov 256   ;;  %s4179_s21 = smov 16  }
  0x9f   : > { %620 = dma.hbm_to_vmem [thread:$0]  (%p3236_p13), %s4471_s18, %s4457_s22, %s4466_s15, %s4460_s17, %s4178_s30, %s4178_s30, %s4179_s21  }
  0xa0 PF: > { %623 = sbr.rel (!%p4356_p3) target bundleno = 199 (0xc7), region = 40  ;;  %s624_s25 = sand.u32 (%p4356_p3), 1, %s4168_s28  }
  0xa1   : > { %s626_s14 = sand.u32 (%p4356_p3), 1, %s4148_s23   ;;  %s3242_s19 = sshll.u32 (%p4356_p3), %s4160_s26, 4 }
  0xa2   : > { %s3241_s29 = sshll.u32 (%p4356_p3), %s626_s14, 8  ;;  %s630_s16 = ssub.s32 (%p4356_p3), 25, %s3242_s19 }
  0xa3   : > { %p631_p11 = scmp.lt.s32.totalorder (%p4356_p3), %s630_s16, 16  ;;  %s4501_s24 = scalar_lea.sflag (%p4356_p3), [#allocation8], %s624_s25 }
  0xa4   : > { %s628_s22 = scalar_lea.vmem (%p4356_p3), [#allocation9], %s3241_s29 }
  0xa5   : > { %s6153_s16 = smov (!%p631_p11, %s630_s16), 16 }
  0xa6   : > { %s4498_s0 = sshll.u32 %s6153_s16, 8 }
  0xa7   : > { %s636_s13 = ssub.s32 4096, %s4498_s0 }
  0xa8   : > { %637 = vsyncadd %s4501_s24, %s636_s13  ;;  %p3245_p13 = scmp.ne.s32.totalorder %s4498_s0, 0  ;;  %s3400_s17 = sshll.u32 %s4160_s26, 5 }
  0xa9   : > { %s3503_s15 = smul.u32 50, %s4164_s27  ;;  %s645_s18 = sshll.u32 %s628_s22, 4  ;;  %s4507_s18 = int_to_ptr.vmem [resolvable:$true] %s645_s18 }
  0xaa   : > { %s6106_s3 = sld [smem:[#allocation53_spill]] }
  0xab   : > { %s641_s30 = sadd.s32 %s3503_s15, %s3400_s17 }
  0xac   : > { %s3247_s21 = sshll.u32 %s641_s30, 7 }
  0xb0   : > { %s4512_s25 = scalar_lea.hbm %s6106_s3, %s3247_s21  ;;  %s3758_s22 = scalar_lea.hbm %s6106_s3, 12800 }
  0xb1   : > { %s3754_s29 = scalar_lea.hbm %s4512_s25, %s4498_s0 }
  0xb2   : > { %p3755_p12 = scmp.ne.s32.totalorder %s4512_s25, %s3754_s29  ;;  %p3760_p6 = scmp.lt.s32.totalorder %s3758_s22, %s3754_s29 }
  0xb4   : > { %p3756_p0 = pnand %p3755_p12, %p3245_p13 }
  0xb6   : > { %p3757_p1 = pneg %p3756_p0 }
  0xb8   : > { %p3762_p4 = pnand %p3760_p6, %p3757_p1 }
  0xba   : > { %3765 = shalt.err (!%p3762_p4)
}
  0xbb   : > { %s3766_s17 = scalar_lea.vmem %s4507_s18, %s4498_s0  ;;  %s4180_s15 = smov [#allocation9]  }
  0xbc   : > { %p3767_p5 = scmp.ne.s32.totalorder %s4507_s18, %s3766_s17  ;;  %s3770_s30 = sshll.u32 %s4180_s15, 4  ;;  %s3771_s30 = int_to_ptr.vmem [resolvable:$false] %s3770_s30 }
  0xbd   : > { %s3772_s21 = scalar_lea.vmem %s3771_s30, 8192  ;;  %p3773_p10 = scmp.lt.s32.totalorder %s4507_s18, %s3771_s30 }
  0xbe   : > { %p3768_p9 = pnand %p3767_p5, %p3245_p13  ;;  %p3774_p11 = scmp.lt.s32.totalorder %s3772_s21, %s3766_s17 }
  0xc0   : > { %p3769_p7 = pneg %p3768_p9  ;;  %p3775_p12 = por %p3774_p11, %p3773_p10 }
  0xc2   : > { %p3776_p0 = pnand %p3775_p12, %p3769_p7 }
  0xc4   : > { %3779 = shalt.err (!%p3776_p0)
}
  0xc5   : > { %s4181_s14 = smov 256   ;;  %s4182_s19 = smov 16  }
  0xc6   : > { %651 = dma.hbm_to_vmem [thread:$0]  (%p3245_p13), %s4512_s25, %s4498_s0, %s4507_s18, %s4501_s24, %s4181_s14, %s4181_s14, %s4182_s19  }
  0xc7 PF: > { %654 = sbr.rel (!%p4356_p3) target bundleno = 238 (0xee), region = 44  ;;  %s655_s29 = sand.u32 (%p4356_p3), 1, %s4168_s28  }
  0xc8   : > { %s657_s16 = sand.u32 (%p4356_p3), 1, %s4148_s23   ;;  %s3251_s22 = sshll.u32 (%p4356_p3), %s4160_s26, 4 }
  0xc9   : > { %s3250_s13 = sshll.u32 (%p4356_p3), %s657_s16, 8  ;;  %s661_s17 = ssub.s32 (%p4356_p3), 25, %s3251_s22 }
  0xca   : > { %p662_p1 = scmp.lt.s32.totalorder (%p4356_p3), %s661_s17, 16  ;;  %s4542_s21 = scalar_lea.sflag (%p4356_p3), [#allocation11], %s655_s29 }
  0xcb   : > { %s659_s0 = scalar_lea.vmem (%p4356_p3), [#allocation10], %s3250_s13 }
  0xcc   : > { %s6155_s17 = smov (!%p662_p1, %s661_s17), 16 }
  0xcd   : > { %s4539_s15 = sshll.u32 %s6155_s17, 8 }
  0xce   : > { %s667_s30 = ssub.s32 4096, %s4539_s15 }
  0xcf   : > { %668 = vsyncadd %s4542_s21, %s667_s30  ;;  %p3254_p13 = scmp.ne.s32.totalorder %s4539_s15, 0  ;;  %s3402_s24 = sshll.u32 %s4160_s26, 5 }
  0xd0   : > { %s3504_s18 = smul.u32 50, %s4164_s27  ;;  %s676_s25 = sshll.u32 %s659_s0, 4  ;;  %s4548_s25 = int_to_ptr.vmem [resolvable:$true] %s676_s25 }
  0xd1   : > { %s6107_s4 = sld [smem:[#allocation54_spill]] }
  0xd2   : > { %s672_s14 = sadd.s32 %s3504_s18, %s3402_s24 }
  0xd3   : > { %s3256_s19 = sshll.u32 %s672_s14, 7 }
  0xd7   : > { %s4553_s29 = scalar_lea.hbm %s6107_s4, %s3256_s19  ;;  %s3784_s0 = scalar_lea.hbm %s6107_s4, 12800 }
  0xd8   : > { %s3780_s13 = scalar_lea.hbm %s4553_s29, %s4539_s15 }
  0xd9   : > { %p3781_p6 = scmp.ne.s32.totalorder %s4553_s29, %s3780_s13  ;;  %p3786_p9 = scmp.lt.s32.totalorder %s3784_s0, %s3780_s13 }
  0xdb   : > { %p3782_p4 = pnand %p3781_p6, %p3254_p13 }
  0xdd   : > { %p3783_p5 = pneg %p3782_p4 }
  0xdf   : > { %p3788_p7 = pnand %p3786_p9, %p3783_p5 }
  0xe1   : > { %3791 = shalt.err (!%p3788_p7)
}
  0xe2   : > { %s3792_s24 = scalar_lea.vmem %s4548_s25, %s4539_s15  ;;  %s4183_s18 = smov [#allocation10]  }
  0xe3   : > { %p3793_p10 = scmp.ne.s32.totalorder %s4548_s25, %s3792_s24  ;;  %s3796_s14 = sshll.u32 %s4183_s18, 4  ;;  %s3797_s14 = int_to_ptr.vmem [resolvable:$false] %s3796_s14 }
  0xe4   : > { %s3798_s19 = scalar_lea.vmem %s3797_s14, 8192  ;;  %p3799_p0 = scmp.lt.s32.totalorder %s4548_s25, %s3797_s14 }
  0xe5   : > { %p3794_p11 = pnand %p3793_p10, %p3254_p13  ;;  %p3800_p1 = scmp.lt.s32.totalorder %s3798_s19, %s3792_s24 }
  0xe7   : > { %p3795_p12 = pneg %p3794_p11  ;;  %p3801_p6 = por %p3800_p1, %p3799_p0 }
  0xe9   : > { %p3802_p4 = pnand %p3801_p6, %p3795_p12 }
  0xeb   : > { %3805 = shalt.err (!%p3802_p4)
}
  0xec   : > { %s4184_s16 = smov 256   ;;  %s4185_s22 = smov 16  }
  0xed   : > { %682 = dma.hbm_to_vmem [thread:$0]  (%p3254_p13), %s4553_s29, %s4539_s15, %s4548_s25, %s4542_s21, %s4184_s16, %s4184_s16, %s4185_s22  }
  0xee PF: > { %685 = sbr.rel (!%p4356_p3) target bundleno = 277 (0x115), region = 48  ;;  %s686_s13 = sand.u32 (%p4356_p3), 1, %s4168_s28  }
  0xef   : > { %s688_s17 = sand.u32 (%p4356_p3), 1, %s4148_s23   ;;  %s3260_s0 = sshll.u32 (%p4356_p3), %s4160_s26, 4 }
  0xf0   : > { %s3259_s30 = sshll.u32 (%p4356_p3), %s688_s17, 8  ;;  %s692_s24 = ssub.s32 (%p4356_p3), 25, %s3260_s0 }
  0xf1   : > { %p693_p5 = scmp.lt.s32.totalorder (%p4356_p3), %s692_s24, 16  ;;  %s4583_s19 = scalar_lea.sflag (%p4356_p3), [#allocation11], %s686_s13 }
  0xf2   : > { %s690_s15 = scalar_lea.vmem (%p4356_p3), [#allocation12], %s3259_s30 }
  0xf3   : > { %s6157_s24 = smov (!%p693_p5, %s692_s24), 16 }
  0xf4   : > { %s4580_s18 = sshll.u32 %s6157_s24, 8 }
  0xf5   : > { %s698_s14 = ssub.s32 4096, %s4580_s18 }
  0xf6   : > { %699 = vsyncadd %s4583_s19, %s698_s14  ;;  %p3263_p13 = scmp.ne.s32.totalorder %s4580_s18, 0  ;;  %s3404_s21 = sshll.u32 %s4160_s26, 5 }
  0xf7   : > { %s3505_s25 = smul.u32 50, %s4164_s27  ;;  %s707_s29 = sshll.u32 %s690_s15, 4  ;;  %s4589_s29 = int_to_ptr.vmem [resolvable:$true] %s707_s29 }
  0xf8   : > { %s6108_s5 = sld [smem:[#allocation55_spill]] }
  0xf9   : > { %s703_s16 = sadd.s32 %s3505_s25, %s3404_s21 }
  0xfa   : > { %s3265_s22 = sshll.u32 %s703_s16, 7 }
  0xfe   : > { %s4594_s13 = scalar_lea.hbm %s6108_s5, %s3265_s22  ;;  %s3810_s15 = scalar_lea.hbm %s6108_s5, 12800 }
  0xff   : > { %s3806_s30 = scalar_lea.hbm %s4594_s13, %s4580_s18 }
 0x100   : > { %p3807_p9 = scmp.ne.s32.totalorder %s4594_s13, %s3806_s30  ;;  %p3812_p11 = scmp.lt.s32.totalorder %s3810_s15, %s3806_s30 }
 0x102   : > { %p3808_p7 = pnand %p3807_p9, %p3263_p13 }
 0x104   : > { %p3809_p10 = pneg %p3808_p7 }
 0x106   : > { %p3814_p12 = pnand %p3812_p11, %p3809_p10 }
 0x108   : > { %3817 = shalt.err (!%p3814_p12)
}
 0x109   : > { %s3818_s21 = scalar_lea.vmem %s4589_s29, %s4580_s18  ;;  %s4186_s25 = smov [#allocation12]  }
 0x10a   : > { %p3819_p0 = scmp.ne.s32.totalorder %s4589_s29, %s3818_s21  ;;  %s3822_s16 = sshll.u32 %s4186_s25, 4  ;;  %s3823_s16 = int_to_ptr.vmem [resolvable:$false] %s3822_s16 }
 0x10b   : > { %s3824_s22 = scalar_lea.vmem %s3823_s16, 8192  ;;  %p3825_p4 = scmp.lt.s32.totalorder %s4589_s29, %s3823_s16 }
 0x10c   : > { %p3820_p1 = pnand %p3819_p0, %p3263_p13  ;;  %p3826_p5 = scmp.lt.s32.totalorder %s3824_s22, %s3818_s21 }
 0x10e   : > { %p3821_p6 = pneg %p3820_p1  ;;  %p3827_p9 = por %p3826_p5, %p3825_p4 }
 0x110   : > { %p3828_p7 = pnand %p3827_p9, %p3821_p6 }
 0x112   : > { %3831 = shalt.err (!%p3828_p7)
}
 0x113   : > { %s4187_s17 = smov 256   ;;  %s4188_s0 = smov 16  }
 0x114   : > { %713 = dma.hbm_to_vmem [thread:$0]  (%p3263_p13), %s4594_s13, %s4580_s18, %s4589_s29, %s4583_s19, %s4187_s17, %s4187_s17, %s4188_s0  }
 0x115 PF: > { %716 = sbr.rel (!%p4356_p3) target bundleno = 316 (0x13c), region = 52  ;;  %s717_s30 = sand.u32 (%p4356_p3), 1, %s4168_s28  }
 0x116   : > { %s719_s24 = sand.u32 (%p4356_p3), 1, %s4148_s23   ;;  %s3269_s15 = sshll.u32 (%p4356_p3), %s4160_s26, 4 }
 0x117   : > { %s3268_s14 = sshll.u32 (%p4356_p3), %s719_s24, 8  ;;  %s723_s21 = ssub.s32 (%p4356_p3), 25, %s3269_s15 }
 0x118   : > { %p724_p10 = scmp.lt.s32.totalorder (%p4356_p3), %s723_s21, 16  ;;  %s4624_s22 = scalar_lea.sflag (%p4356_p3), [#allocation14], %s717_s30 }
 0x119   : > { %s721_s18 = scalar_lea.vmem (%p4356_p3), [#allocation13], %s3268_s14 }
 0x11a   : > { %s6159_s21 = smov (!%p724_p10, %s723_s21), 16 }
 0x11b   : > { %s4621_s25 = sshll.u32 %s6159_s21, 8 }
 0x11c   : > { %s729_s16 = ssub.s32 4096, %s4621_s25 }
 0x11d   : > { %730 = vsyncadd %s4624_s22, %s729_s16  ;;  %p3272_p13 = scmp.ne.s32.totalorder %s4621_s25, 0  ;;  %s3406_s19 = sshll.u32 %s4160_s26, 5 }
 0x11e   : > { %s3506_s29 = smul.u32 50, %s4164_s27  ;;  %s738_s13 = sshll.u32 %s721_s18, 4  ;;  %s4630_s13 = int_to_ptr.vmem [resolvable:$true] %s738_s13 }
 0x11f   : > { %s6109_s6 = sld [smem:[#allocation56_spill]] }
 0x120   : > { %s734_s17 = sadd.s32 %s3506_s29, %s3406_s19 }
 0x121   : > { %s3274_s0 = sshll.u32 %s734_s17, 7 }
 0x125   : > { %s4635_s30 = scalar_lea.hbm %s6109_s6, %s3274_s0  ;;  %s3836_s18 = scalar_lea.hbm %s6109_s6, 12800 }
 0x126   : > { %s3832_s14 = scalar_lea.hbm %s4635_s30, %s4621_s25 }
 0x127   : > { %p3833_p11 = scmp.ne.s32.totalorder %s4635_s30, %s3832_s14  ;;  %p3838_p1 = scmp.lt.s32.totalorder %s3836_s18, %s3832_s14 }
 0x129   : > { %p3834_p12 = pnand %p3833_p11, %p3272_p13 }
 0x12b   : > { %p3835_p0 = pneg %p3834_p12 }
 0x12d   : > { %p3840_p6 = pnand %p3838_p1, %p3835_p0 }
 0x12f   : > { %3843 = shalt.err (!%p3840_p6)
}
 0x130   : > { %s3844_s19 = scalar_lea.vmem %s4630_s13, %s4621_s25  ;;  %s4189_s29 = smov [#allocation13]  }
 0x131   : > { %p3845_p4 = scmp.ne.s32.totalorder %s4630_s13, %s3844_s19  ;;  %s3848_s17 = sshll.u32 %s4189_s29, 4  ;;  %s3849_s17 = int_to_ptr.vmem [resolvable:$false] %s3848_s17 }
 0x132   : > { %s3850_s0 = scalar_lea.vmem %s3849_s17, 8192  ;;  %p3851_p7 = scmp.lt.s32.totalorder %s4630_s13, %s3849_s17 }
 0x133   : > { %p3846_p5 = pnand %p3845_p4, %p3272_p13  ;;  %p3852_p10 = scmp.lt.s32.totalorder %s3850_s0, %s3844_s19 }
 0x135   : > { %p3847_p9 = pneg %p3846_p5  ;;  %p3853_p11 = por %p3852_p10, %p3851_p7 }
 0x137   : > { %p3854_p12 = pnand %p3853_p11, %p3847_p9 }
 0x139   : > { %3857 = shalt.err (!%p3854_p12)
}
 0x13a   : > { %s4190_s24 = smov 256   ;;  %s4191_s15 = smov 16  }
 0x13b   : > { %744 = dma.hbm_to_vmem [thread:$0]  (%p3272_p13), %s4635_s30, %s4621_s25, %s4630_s13, %s4624_s22, %s4190_s24, %s4190_s24, %s4191_s15  }
 0x13c PF: > { %747 = sbr.rel (!%p4356_p3) target bundleno = 355 (0x163), region = 56  ;;  %s748_s14 = sand.u32 (%p4356_p3), 1, %s4168_s28  }
 0x13d   : > { %s750_s21 = sand.u32 (%p4356_p3), 1, %s4148_s23   ;;  %s3278_s18 = sshll.u32 (%p4356_p3), %s4160_s26, 4 }
 0x13e   : > { %s3277_s16 = sshll.u32 (%p4356_p3), %s750_s21, 8  ;;  %s754_s19 = ssub.s32 (%p4356_p3), 25, %s3278_s18 }
 0x13f   : > { %p755_p0 = scmp.lt.s32.totalorder (%p4356_p3), %s754_s19, 16  ;;  %s4665_s0 = scalar_lea.sflag (%p4356_p3), [#allocation14], %s748_s14 }
 0x140   : > { %s752_s25 = scalar_lea.vmem (%p4356_p3), [#allocation15], %s3277_s16 }
 0x141   : > { %s6161_s19 = smov (!%p755_p0, %s754_s19), 16 }
 0x142   : > { %s4662_s29 = sshll.u32 %s6161_s19, 8 }
 0x143   : > { %s760_s17 = ssub.s32 4096, %s4662_s29 }
 0x144   : > { %761 = vsyncadd %s4665_s0, %s760_s17  ;;  %p3281_p13 = scmp.ne.s32.totalorder %s4662_s29, 0  ;;  %s3408_s22 = sshll.u32 %s4160_s26, 5 }
 0x145   : > { %s3507_s13 = smul.u32 50, %s4164_s27  ;;  %s769_s30 = sshll.u32 %s752_s25, 4  ;;  %s4671_s30 = int_to_ptr.vmem [resolvable:$true] %s769_s30 }
 0x146   : > { %s6110_s7 = sld [smem:[#allocation57_spill]] }
 0x147   : > { %s765_s24 = sadd.s32 %s3507_s13, %s3408_s22 }
 0x148   : > { %s3283_s15 = sshll.u32 %s765_s24, 7 }
 0x14c   : > { %s4676_s14 = scalar_lea.hbm %s6110_s7, %s3283_s15  ;;  %s3862_s25 = scalar_lea.hbm %s6110_s7, 12800 }
 0x14d   : > { %s3858_s16 = scalar_lea.hbm %s4676_s14, %s4662_s29 }
 0x14e   : > { %p3859_p1 = scmp.ne.s32.totalorder %s4676_s14, %s3858_s16  ;;  %p3864_p5 = scmp.lt.s32.totalorder %s3862_s25, %s3858_s16 }
 0x150   : > { %p3860_p6 = pnand %p3859_p1, %p3281_p13 }
 0x152   : > { %p3861_p4 = pneg %p3860_p6 }
 0x154   : > { %p3866_p9 = pnand %p3864_p5, %p3861_p4 }
 0x156   : > { %3869 = shalt.err (!%p3866_p9)
}
 0x157   : > { %s3870_s22 = scalar_lea.vmem %s4671_s30, %s4662_s29  ;;  %s4192_s13 = smov [#allocation15]  }
 0x158   : > { %p3871_p7 = scmp.ne.s32.totalorder %s4671_s30, %s3870_s22  ;;  %s3874_s24 = sshll.u32 %s4192_s13, 4  ;;  %s3875_s24 = int_to_ptr.vmem [resolvable:$false] %s3874_s24 }
 0x159   : > { %s3876_s15 = scalar_lea.vmem %s3875_s24, 8192  ;;  %p3877_p12 = scmp.lt.s32.totalorder %s4671_s30, %s3875_s24 }
 0x15a   : > { %p3872_p10 = pnand %p3871_p7, %p3281_p13  ;;  %p3878_p0 = scmp.lt.s32.totalorder %s3876_s15, %s3870_s22 }
 0x15c   : > { %p3873_p11 = pneg %p3872_p10  ;;  %p3879_p1 = por %p3878_p0, %p3877_p12 }
 0x15e   : > { %p3880_p6 = pnand %p3879_p1, %p3873_p11 }
 0x160   : > { %3883 = shalt.err (!%p3880_p6)
}
 0x161   : > { %s4193_s21 = smov 256   ;;  %s4194_s18 = smov 16  }
 0x162   : > { %775 = dma.hbm_to_vmem [thread:$0]  (%p3281_p13), %s4676_s14, %s4662_s29, %s4671_s30, %s4665_s0, %s4193_s21, %s4193_s21, %s4194_s18  }
 0x163 PF: > { %778 = sbr.rel (!%p4356_p3) target bundleno = 394 (0x18a), region = 60  ;;  %s779_s16 = sand.u32 (%p4356_p3), 1, %s4168_s28  }
 0x164   : > { %s781_s19 = sand.u32 (%p4356_p3), 1, %s4148_s23   ;;  %s3287_s25 = sshll.u32 (%p4356_p3), %s4160_s26, 4 }
 0x165   : > { %s3286_s17 = sshll.u32 (%p4356_p3), %s781_s19, 8  ;;  %s785_s22 = ssub.s32 (%p4356_p3), 25, %s3287_s25 }
 0x166   : > { %p786_p4 = scmp.lt.s32.totalorder (%p4356_p3), %s785_s22, 16  ;;  %s4706_s15 = scalar_lea.sflag (%p4356_p3), [#allocation17], %s779_s16 }
 0x167   : > { %s783_s29 = scalar_lea.vmem (%p4356_p3), [#allocation16], %s3286_s17 }
 0x168   : > { %s6163_s22 = smov (!%p786_p4, %s785_s22), 16 }
 0x169   : > { %s4703_s13 = sshll.u32 %s6163_s22, 8 }
 0x16a   : > { %s791_s24 = ssub.s32 4096, %s4703_s13 }
 0x16b   : > { %792 = vsyncadd %s4706_s15, %s791_s24  ;;  %p3290_p13 = scmp.ne.s32.totalorder %s4703_s13, 0  ;;  %s3410_s0 = sshll.u32 %s4160_s26, 5 }
 0x16c   : > { %s3508_s30 = smul.u32 50, %s4164_s27  ;;  %s800_s14 = sshll.u32 %s783_s29, 4  ;;  %s4712_s14 = int_to_ptr.vmem [resolvable:$true] %s800_s14 }
 0x16d   : > { %s6111_s8 = sld [smem:[#allocation58_spill]] }
 0x16e   : > { %s796_s21 = sadd.s32 %s3508_s30, %s3410_s0 }
 0x16f   : > { %s3292_s18 = sshll.u32 %s796_s21, 7 }
 0x173   : > { %s4717_s16 = scalar_lea.hbm %s6111_s8, %s3292_s18  ;;  %s3888_s29 = scalar_lea.hbm %s6111_s8, 12800 }
 0x174   : > { %s3884_s17 = scalar_lea.hbm %s4717_s16, %s4703_s13 }
 0x175   : > { %p3885_p5 = scmp.ne.s32.totalorder %s4717_s16, %s3884_s17  ;;  %p3890_p10 = scmp.lt.s32.totalorder %s3888_s29, %s3884_s17 }
 0x177   : > { %p3886_p9 = pnand %p3885_p5, %p3290_p13 }
 0x179   : > { %p3887_p7 = pneg %p3886_p9 }
 0x17b   : > { %p3892_p11 = pnand %p3890_p10, %p3887_p7 }
 0x17d   : > { %3895 = shalt.err (!%p3892_p11)
}
 0x17e   : > { %s3896_s0 = scalar_lea.vmem %s4712_s14, %s4703_s13  ;;  %s4195_s30 = smov [#allocation16]  }
 0x17f   : > { %p3897_p12 = scmp.ne.s32.totalorder %s4712_s14, %s3896_s0  ;;  %s3900_s21 = sshll.u32 %s4195_s30, 4  ;;  %s3901_s21 = int_to_ptr.vmem [resolvable:$false] %s3900_s21 }
 0x180   : > { %s3902_s18 = scalar_lea.vmem %s3901_s21, 8192  ;;  %p3903_p6 = scmp.lt.s32.totalorder %s4712_s14, %s3901_s21 }
 0x181   : > { %p3898_p0 = pnand %p3897_p12, %p3290_p13  ;;  %p3904_p4 = scmp.lt.s32.totalorder %s3902_s18, %s3896_s0 }
 0x183   : > { %p3899_p1 = pneg %p3898_p0  ;;  %p3905_p5 = por %p3904_p4, %p3903_p6 }
 0x185   : > { %p3906_p9 = pnand %p3905_p5, %p3899_p1 }
 0x187   : > { %3909 = shalt.err (!%p3906_p9)
}
 0x188   : > { %s4196_s19 = smov 256   ;;  %s4197_s25 = smov 16  }
 0x189   : > { %806 = dma.hbm_to_vmem [thread:$0]  (%p3290_p13), %s4717_s16, %s4703_s13, %s4712_s14, %s4706_s15, %s4196_s19, %s4196_s19, %s4197_s25  }
 0x18a PF: > { %809 = sbr.rel (!%p4356_p3) target bundleno = 430 (0x1ae), region = 64  ;;  %s810_s17 = sand.u32 (%p4356_p3), 1, %s4168_s28  }
 0x18b   : > { %s812_s22 = sand.u32 (%p4356_p3), 1, %s4148_s23   ;;  %s3296_s29 = sshll.u32 (%p4356_p3), %s4160_s26, 4 }
 0x18c   : > { %s3295_s24 = sshll.u32 (%p4356_p3), %s812_s22, 8  ;;  %s816_s0 = ssub.s32 (%p4356_p3), 25, %s3296_s29 }
 0x18d   : > { %p817_p7 = scmp.lt.s32.totalorder (%p4356_p3), %s816_s0, 16  ;;  %s4747_s18 = scalar_lea.sflag (%p4356_p3), [#allocation17], %s810_s17 }
 0x18e   : > { %s814_s13 = scalar_lea.vmem (%p4356_p3), [#allocation18], %s3295_s24 }
 0x18f   : > { %s6165_s0 = smov (!%p817_p7, %s816_s0), 16 }
 0x190   : > { %s4744_s30 = sshll.u32 %s6165_s0, 8 }
 0x191   : > { %s822_s21 = ssub.s32 4096, %s4744_s30 }
 0x192   : > { %823 = vsyncadd %s4747_s18, %s822_s21  ;;  %p3299_p13 = scmp.ne.s32.totalorder %s4744_s30, 0  ;;  %s3412_s15 = sshll.u32 %s4160_s26, 5 }
 0x193   : > { %s3509_s14 = smul.u32 50, %s4164_s27  ;;  %s831_s16 = sshll.u32 %s814_s13, 4  ;;  %s4753_s16 = int_to_ptr.vmem [resolvable:$true] %s831_s16 }
 0x194   : > { %s3914_s13 = scalar_lea.hbm %s6049_s9, 12800 }
 0x195   : > { %s827_s19 = sadd.s32 %s3509_s14, %s3412_s15 }
 0x196   : > { %s3301_s25 = sshll.u32 %s827_s19, 7 }
 0x197   : > { %s4758_s17 = scalar_lea.hbm %s6049_s9, %s3301_s25 }
 0x198   : > { %s3910_s24 = scalar_lea.hbm %s4758_s17, %s4744_s30 }
 0x199   : > { %p3911_p10 = scmp.ne.s32.totalorder %s4758_s17, %s3910_s24  ;;  %p3916_p0 = scmp.lt.s32.totalorder %s3914_s13, %s3910_s24 }
 0x19b   : > { %p3912_p11 = pnand %p3911_p10, %p3299_p13 }
 0x19d   : > { %p3913_p12 = pneg %p3912_p11 }
 0x19f   : > { %p3918_p1 = pnand %p3916_p0, %p3913_p12 }
 0x1a1   : > { %3921 = shalt.err (!%p3918_p1)
}
 0x1a2   : > { %s3922_s15 = scalar_lea.vmem %s4753_s16, %s4744_s30  ;;  %s4198_s14 = smov [#allocation18]  }
 0x1a3   : > { %p3923_p6 = scmp.ne.s32.totalorder %s4753_s16, %s3922_s15  ;;  %s3926_s19 = sshll.u32 %s4198_s14, 4  ;;  %s3927_s19 = int_to_ptr.vmem [resolvable:$false] %s3926_s19 }
 0x1a4   : > { %s3928_s25 = scalar_lea.vmem %s3927_s19, 8192  ;;  %p3929_p9 = scmp.lt.s32.totalorder %s4753_s16, %s3927_s19 }
 0x1a5   : > { %p3924_p4 = pnand %p3923_p6, %p3299_p13  ;;  %p3930_p7 = scmp.lt.s32.totalorder %s3928_s25, %s3922_s15 }
 0x1a7   : > { %p3925_p5 = pneg %p3924_p4  ;;  %p3931_p10 = por %p3930_p7, %p3929_p9 }
 0x1a9   : > { %p3932_p11 = pnand %p3931_p10, %p3925_p5 }
 0x1ab   : > { %3935 = shalt.err (!%p3932_p11)
}
 0x1ac   : > { %s4199_s22 = smov 256   ;;  %s4200_s29 = smov 16  }
 0x1ad   : > { %837 = dma.hbm_to_vmem [thread:$0]  (%p3299_p13), %s4758_s17, %s4744_s30, %s4753_s16, %s4747_s18, %s4199_s22, %s4199_s22, %s4200_s29  }
 0x1ae PF: > { %840 = sbr.rel (!%p4356_p3) target bundleno = 466 (0x1d2), region = 68  ;;  %s841_s24 = sand.u32 (%p4356_p3), 1, %s4168_s28  }
 0x1af   : > { %s843_s0 = sand.u32 (%p4356_p3), 1, %s4148_s23   ;;  %s3305_s13 = sshll.u32 (%p4356_p3), %s4160_s26, 4 }
 0x1b0   : > { %s3304_s21 = sshll.u32 (%p4356_p3), %s843_s0, 8  ;;  %s847_s15 = ssub.s32 (%p4356_p3), 25, %s3305_s13 }
 0x1b1   : > { %p848_p12 = scmp.lt.s32.totalorder (%p4356_p3), %s847_s15, 16  ;;  %s4788_s25 = scalar_lea.sflag (%p4356_p3), [#allocation20], %s841_s24 }
 0x1b2   : > { %s845_s30 = scalar_lea.vmem (%p4356_p3), [#allocation19], %s3304_s21 }
 0x1b3   : > { %s6167_s15 = smov (!%p848_p12, %s847_s15), 16 }
 0x1b4   : > { %s4785_s14 = sshll.u32 %s6167_s15, 8 }
 0x1b5   : > { %s853_s19 = ssub.s32 4096, %s4785_s14 }
 0x1b6   : > { %854 = vsyncadd %s4788_s25, %s853_s19  ;;  %p3308_p13 = scmp.ne.s32.totalorder %s4785_s14, 0  ;;  %s3414_s18 = sshll.u32 %s4160_s26, 5 }
 0x1b7   : > { %s3510_s16 = smul.u32 50, %s4164_s27  ;;  %s862_s17 = sshll.u32 %s845_s30, 4  ;;  %s4794_s17 = int_to_ptr.vmem [resolvable:$true] %s862_s17 }
 0x1b8   : > { %s3940_s30 = scalar_lea.hbm %s6050_s10, 12800 }
 0x1b9   : > { %s858_s22 = sadd.s32 %s3510_s16, %s3414_s18 }
 0x1ba   : > { %s3310_s29 = sshll.u32 %s858_s22, 7 }
 0x1bb   : > { %s4799_s24 = scalar_lea.hbm %s6050_s10, %s3310_s29 }
 0x1bc   : > { %s3936_s21 = scalar_lea.hbm %s4799_s24, %s4785_s14 }
 0x1bd   : > { %p3937_p0 = scmp.ne.s32.totalorder %s4799_s24, %s3936_s21  ;;  %p3942_p4 = scmp.lt.s32.totalorder %s3940_s30, %s3936_s21 }
 0x1bf   : > { %p3938_p1 = pnand %p3937_p0, %p3308_p13 }
 0x1c1   : > { %p3939_p6 = pneg %p3938_p1 }
 0x1c3   : > { %p3944_p5 = pnand %p3942_p4, %p3939_p6 }
 0x1c5   : > { %3947 = shalt.err (!%p3944_p5)
}
 0x1c6   : > { %s3948_s18 = scalar_lea.vmem %s4794_s17, %s4785_s14  ;;  %s4201_s16 = smov [#allocation19]  }
 0x1c7   : > { %p3949_p9 = scmp.ne.s32.totalorder %s4794_s17, %s3948_s18  ;;  %s3952_s22 = sshll.u32 %s4201_s16, 4  ;;  %s3953_s22 = int_to_ptr.vmem [resolvable:$false] %s3952_s22 }
 0x1c8   : > { %s3954_s29 = scalar_lea.vmem %s3953_s22, 8192  ;;  %p3955_p11 = scmp.lt.s32.totalorder %s4794_s17, %s3953_s22 }
 0x1c9   : > { %p3950_p7 = pnand %p3949_p9, %p3308_p13  ;;  %p3956_p12 = scmp.lt.s32.totalorder %s3954_s29, %s3948_s18 }
 0x1cb   : > { %p3951_p10 = pneg %p3950_p7  ;;  %p3957_p0 = por %p3956_p12, %p3955_p11 }
 0x1cd   : > { %p3958_p1 = pnand %p3957_p0, %p3951_p10 }
 0x1cf   : > { %3961 = shalt.err (!%p3958_p1)
}
 0x1d0   : > { %s4202_s0 = smov 256   ;;  %s4203_s13 = smov 16  }
 0x1d1   : > { %868 = dma.hbm_to_vmem [thread:$0]  (%p3308_p13), %s4799_s24, %s4785_s14, %s4794_s17, %s4788_s25, %s4202_s0, %s4202_s0, %s4203_s13  }
 0x1d2 PF: > { %871 = sbr.rel (!%p4356_p3) target bundleno = 502 (0x1f6), region = 72  ;;  %s872_s21 = sand.u32 (%p4356_p3), 1, %s4168_s28  }
 0x1d3   : > { %s874_s15 = sand.u32 (%p4356_p3), 1, %s4148_s23   ;;  %s3314_s30 = sshll.u32 (%p4356_p3), %s4160_s26, 4 }
 0x1d4   : > { %s3313_s19 = sshll.u32 (%p4356_p3), %s874_s15, 8  ;;  %s878_s18 = ssub.s32 (%p4356_p3), 25, %s3314_s30 }
 0x1d5   : > { %p879_p6 = scmp.lt.s32.totalorder (%p4356_p3), %s878_s18, 16  ;;  %s4829_s29 = scalar_lea.sflag (%p4356_p3), [#allocation20], %s872_s21 }
 0x1d6   : > { %s876_s14 = scalar_lea.vmem (%p4356_p3), [#allocation21], %s3313_s19 }
 0x1d7   : > { %s6169_s18 = smov (!%p879_p6, %s878_s18), 16 }
 0x1d8   : > { %s4826_s16 = sshll.u32 %s6169_s18, 8 }
 0x1d9   : > { %s884_s22 = ssub.s32 4096, %s4826_s16 }
 0x1da   : > { %885 = vsyncadd %s4829_s29, %s884_s22  ;;  %p3317_p13 = scmp.ne.s32.totalorder %s4826_s16, 0  ;;  %s3416_s25 = sshll.u32 %s4160_s26, 5 }
 0x1db   : > { %s3511_s17 = smul.u32 50, %s4164_s27  ;;  %s893_s24 = sshll.u32 %s876_s14, 4  ;;  %s4835_s24 = int_to_ptr.vmem [resolvable:$true] %s893_s24 }
 0x1dc   : > { %s3966_s14 = scalar_lea.hbm %s6051_s11, 12800 }
 0x1dd   : > { %s889_s0 = sadd.s32 %s3511_s17, %s3416_s25 }
 0x1de   : > { %s3319_s13 = sshll.u32 %s889_s0, 7 }
 0x1df   : > { %s4840_s21 = scalar_lea.hbm %s6051_s11, %s3319_s13 }
 0x1e0   : > { %s3962_s19 = scalar_lea.hbm %s4840_s21, %s4826_s16 }
 0x1e1   : > { %p3963_p4 = scmp.ne.s32.totalorder %s4840_s21, %s3962_s19  ;;  %p3968_p7 = scmp.lt.s32.totalorder %s3966_s14, %s3962_s19 }
 0x1e3   : > { %p3964_p5 = pnand %p3963_p4, %p3317_p13 }
 0x1e5   : > { %p3965_p9 = pneg %p3964_p5 }
 0x1e7   : > { %p3970_p10 = pnand %p3968_p7, %p3965_p9 }
 0x1e9   : > { %3973 = shalt.err (!%p3970_p10)
}
 0x1ea   : > { %s3974_s25 = scalar_lea.vmem %s4835_s24, %s4826_s16  ;;  %s4204_s17 = smov [#allocation21]  }
 0x1eb   : > { %p3975_p11 = scmp.ne.s32.totalorder %s4835_s24, %s3974_s25  ;;  %s3978_s0 = sshll.u32 %s4204_s17, 4  ;;  %s3979_s0 = int_to_ptr.vmem [resolvable:$false] %s3978_s0 }
 0x1ec   : > { %s3980_s13 = scalar_lea.vmem %s3979_s0, 8192  ;;  %p3981_p1 = scmp.lt.s32.totalorder %s4835_s24, %s3979_s0 }
 0x1ed   : > { %p3976_p12 = pnand %p3975_p11, %p3317_p13  ;;  %p3982_p6 = scmp.lt.s32.totalorder %s3980_s13, %s3974_s25 }
 0x1ef   : > { %p3977_p0 = pneg %p3976_p12  ;;  %p3983_p4 = por %p3982_p6, %p3981_p1 }
 0x1f1   : > { %p3984_p5 = pnand %p3983_p4, %p3977_p0 }
 0x1f3   : > { %3987 = shalt.err (!%p3984_p5)
}
 0x1f4   : > { %s4205_s15 = smov 256   ;;  %s4206_s30 = smov 16  }
 0x1f5   : > { %899 = dma.hbm_to_vmem [thread:$0]  (%p3317_p13), %s4840_s21, %s4826_s16, %s4835_s24, %s4829_s29, %s4205_s15, %s4205_s15, %s4206_s30  }
 0x1f6 PF: > { %902 = sbr.rel (!%p4356_p3) target bundleno = 538 (0x21a), region = 76  ;;  %s903_s19 = sand.u32 (%p4356_p3), 1, %s4168_s28  }
 0x1f7   : > { %s905_s18 = sand.u32 (%p4356_p3), 1, %s4148_s23   ;;  %s3323_s14 = sshll.u32 (%p4356_p3), %s4160_s26, 4 }
 0x1f8   : > { %s3322_s22 = sshll.u32 (%p4356_p3), %s905_s18, 8  ;;  %s909_s25 = ssub.s32 (%p4356_p3), 25, %s3323_s14 }
 0x1f9   : > { %p910_p9 = scmp.lt.s32.totalorder (%p4356_p3), %s909_s25, 16  ;;  %s4870_s13 = scalar_lea.sflag (%p4356_p3), [#allocation23], %s903_s19 }
 0x1fa   : > { %s907_s16 = scalar_lea.vmem (%p4356_p3), [#allocation22], %s3322_s22 }
 0x1fb   : > { %s6171_s25 = smov (!%p910_p9, %s909_s25), 16 }
 0x1fc   : > { %s4867_s17 = sshll.u32 %s6171_s25, 8 }
 0x1fd   : > { %s915_s0 = ssub.s32 4096, %s4867_s17 }
 0x1fe   : > { %916 = vsyncadd %s4870_s13, %s915_s0  ;;  %p3326_p13 = scmp.ne.s32.totalorder %s4867_s17, 0  ;;  %s3418_s29 = sshll.u32 %s4160_s26, 5 }
 0x1ff   : > { %s3512_s24 = smul.u32 50, %s4164_s27  ;;  %s924_s21 = sshll.u32 %s907_s16, 4  ;;  %s4876_s21 = int_to_ptr.vmem [resolvable:$true] %s924_s21 }
 0x200   : > { %s3992_s16 = scalar_lea.hbm %s6052_s12, 12800 }
 0x201   : > { %s920_s15 = sadd.s32 %s3512_s24, %s3418_s29 }
 0x202   : > { %s3328_s30 = sshll.u32 %s920_s15, 7 }
 0x203   : > { %s4881_s19 = scalar_lea.hbm %s6052_s12, %s3328_s30 }
 0x204   : > { %s3988_s22 = scalar_lea.hbm %s4881_s19, %s4867_s17 }
 0x205   : > { %p3989_p7 = scmp.ne.s32.totalorder %s4881_s19, %s3988_s22  ;;  %p3994_p12 = scmp.lt.s32.totalorder %s3992_s16, %s3988_s22 }
 0x207   : > { %p3990_p10 = pnand %p3989_p7, %p3326_p13 }
 0x209   : > { %p3991_p11 = pneg %p3990_p10 }
 0x20b   : > { %p3996_p0 = pnand %p3994_p12, %p3991_p11 }
 0x20d   : > { %3999 = shalt.err (!%p3996_p0)
}
 0x20e   : > { %s4000_s29 = scalar_lea.vmem %s4876_s21, %s4867_s17  ;;  %s4207_s24 = smov [#allocation22]  }
 0x20f   : > { %p4001_p1 = scmp.ne.s32.totalorder %s4876_s21, %s4000_s29  ;;  %s4004_s15 = sshll.u32 %s4207_s24, 4  ;;  %s4005_s15 = int_to_ptr.vmem [resolvable:$false] %s4004_s15 }
 0x210   : > { %s4006_s30 = scalar_lea.vmem %s4005_s15, 8192  ;;  %p4007_p5 = scmp.lt.s32.totalorder %s4876_s21, %s4005_s15 }
 0x211   : > { %p4002_p6 = pnand %p4001_p1, %p3326_p13  ;;  %p4008_p9 = scmp.lt.s32.totalorder %s4006_s30, %s4000_s29 }
 0x213   : > { %p4003_p4 = pneg %p4002_p6  ;;  %p4009_p7 = por %p4008_p9, %p4007_p5 }
 0x215   : > { %p4010_p10 = pnand %p4009_p7, %p4003_p4 }
 0x217   : > { %4013 = shalt.err (!%p4010_p10)
}
 0x218   : > { %s4208_s18 = smov 256   ;;  %s4209_s14 = smov 16  }
 0x219   : > { %930 = dma.hbm_to_vmem [thread:$0]  (%p3326_p13), %s4881_s19, %s4867_s17, %s4876_s21, %s4870_s13, %s4208_s18, %s4208_s18, %s4209_s14  }
 0x21a PF: > { %933 = sbr.rel (!%p4356_p3) target bundleno = 577 (0x241), region = 80  ;;  %s934_s22 = sand.u32 (%p4356_p3), 1, %s4168_s28  }
 0x21b   : > { %s936_s25 = sand.u32 (%p4356_p3), 1, %s4148_s23   ;;  %s3332_s16 = sshll.u32 (%p4356_p3), %s4160_s26, 4 }
 0x21c   : > { %s3331_s0 = sshll.u32 (%p4356_p3), %s936_s25, 8  ;;  %s940_s29 = ssub.s32 (%p4356_p3), 25, %s3332_s16 }
 0x21d   : > { %p941_p11 = scmp.lt.s32.totalorder (%p4356_p3), %s940_s29, 16  ;;  %s4911_s30 = scalar_lea.sflag (%p4356_p3), [#allocation23], %s934_s22 }
 0x21e   : > { %s938_s17 = scalar_lea.vmem (%p4356_p3), [#allocation24], %s3331_s0 }
 0x21f   : > { %s6173_s29 = smov (!%p941_p11, %s940_s29), 16 }
 0x220   : > { %s4908_s24 = sshll.u32 %s6173_s29, 8 }
 0x221   : > { %s946_s15 = ssub.s32 4096, %s4908_s24 }
 0x222   : > { %947 = vsyncadd %s4911_s30, %s946_s15  ;;  %p3335_p3 = scmp.ne.s32.totalorder %s4908_s24, 0  ;;  %s3420_s20 = sshll.u32 %s4160_s26, 5 }
 0x223   : > { %s3513_s13 = smul.u32 50, %s4164_s27  ;;  %s955_s21 = sshll.u32 %s938_s17, 4  ;;  %s4917_s21 = int_to_ptr.vmem [resolvable:$true] %s955_s21 }
 0x224   : > { %s6112_s22 = sld [smem:[#allocation59_spill]] }
 0x225   : > { %s951_s19 = sadd.s32 %s3513_s13, %s3420_s20 }
 0x226   : > { %s3337_s18 = sshll.u32 %s951_s19, 7 }
 0x22a   : > { %s6113_s16 = smov %s6112_s22  ;;  %s4922_s29 = scalar_lea.hbm %s6112_s22, %s3337_s18 }
 0x22b   : > { %s4014_s0 = scalar_lea.hbm %s4922_s29, %s4908_s24  ;;  %s4018_s17 = scalar_lea.hbm %s6113_s16, 12800 }
 0x22c   : > { %p4015_p13 = scmp.ne.s32.totalorder %s4922_s29, %s4014_s0  ;;  %p4020_p1 = scmp.lt.s32.totalorder %s4018_s17, %s4014_s0 }
 0x22e   : > { %p4016_p12 = pnand %p4015_p13, %p3335_p3 }
 0x230   : > { %p4017_p0 = pneg %p4016_p12 }
 0x232   : > { %p4022_p6 = pnand %p4020_p1, %p4017_p0 }
 0x234   : > { %4025 = shalt.err (!%p4022_p6)
}
 0x235   : > { %s4026_s20 = scalar_lea.vmem %s4917_s21, %s4908_s24  ;;  %s4210_s13 = smov [#allocation24]  }
 0x236   : > { %p4027_p4 = scmp.ne.s32.totalorder %s4917_s21, %s4026_s20  ;;  %s4030_s19 = sshll.u32 %s4210_s13, 4  ;;  %s4031_s19 = int_to_ptr.vmem [resolvable:$false] %s4030_s19 }
 0x237   : > { %s4032_s18 = scalar_lea.vmem %s4031_s19, 8192  ;;  %p4033_p7 = scmp.lt.s32.totalorder %s4917_s21, %s4031_s19 }
 0x238   : > { %p4028_p5 = pnand %p4027_p4, %p3335_p3  ;;  %p4034_p10 = scmp.lt.s32.totalorder %s4032_s18, %s4026_s20 }
 0x23a   : > { %p4029_p9 = pneg %p4028_p5  ;;  %p4035_p11 = por %p4034_p10, %p4033_p7 }
 0x23c   : > { %p4036_p13 = pnand %p4035_p11, %p4029_p9 }
 0x23e   : > { %4039 = shalt.err (!%p4036_p13)
}
 0x23f   : > { %s4211_s1 = smov 256   ;;  %s4212_s14 = smov 16  }
 0x240   : > { %961 = dma.hbm_to_vmem [thread:$0]  (%p3335_p3), %s4922_s29, %s4908_s24, %s4917_s21, %s4911_s30, %s4211_s1, %s4211_s1, %s4212_s14  }
 0x241 PF: > { %967 = sbr.rel (%p4387_p2) target bundleno = 1081 (0x439), region = 84  ;;  %s6115_s22 = sld [smem:[#allocation42_spill]] (!%p4387_p2) }
 0x247   : > { %p6116_p12 = scmp.eq.s32.totalorder %s6115_s22, 0 }
 0x249   : > { %4099 = dma.done.wait (%p6116_p12), [#allocation5], 16   ;;  %p6117_p0 = pmov %p6116_p12 }
 0x24a   : > { %s6118_s0 = sld [smem:[#allocation39_spill]] }
 0x24b   : > { %4101 = vsyncadd (%p6117_p0), [#allocation5], 4294967280 }
 0x250   : > { %s4951_s17 = sand.u32 1, %s6118_s0  }
 0x251   : > { %s4954_s20 = sshll.u32 %s4951_s17, 8  ;;  %s974_s24 = scalar_lea.sflag [#allocation3], %s4951_s17 }
 0x252   : > { %s4958_s30 = scalar_lea.vmem [#allocation6], %s4954_s20 }
 0x253   : > { %4103 = dma.done.wait (%p4368_p8), %s974_s24, 4096  }
 0x254   : > { %4105 = vsyncadd (%p4368_p8), %s974_s24, 4294963200  ;;  %s4965_s21 = sand.u32 1, %s6115_s22   ;;  %s4969_s13 = scalar_lea.vmem [#allocation7], %s4954_s20 }
 0x255   : > { %s983_s29 = scalar_lea.sflag [#allocation8], %s4965_s21 }
 0x256   : > { %4107 = dma.done.wait (%p4368_p8), %s983_s29, 8192  }
 0x257   : > { %4109 = vsyncadd (%p4368_p8), %s983_s29, 4294959104  ;;  %s4976_s19 = scalar_lea.vmem [#allocation9], %s4954_s20  ;;  %s1001_s18 = scalar_lea.sflag [#allocation11], %s4965_s21 }
 0x258   : > { %s4980_s1 = scalar_lea.vmem [#allocation10], %s4954_s20 }
 0x259   : > { %4111 = dma.done.wait (%p4368_p8), %s1001_s18, 8192  }
 0x25a   : > { %4113 = vsyncadd (%p4368_p8), %s1001_s18, 4294959104  ;;  %s4987_s14 = scalar_lea.vmem [#allocation12], %s4954_s20  ;;  %s1019_s25 = scalar_lea.sflag [#allocation14], %s4965_s21 }
 0x25b   : > { %s4991_s0 = scalar_lea.vmem [#allocation13], %s4954_s20 }
 0x25c   : > { %4115 = dma.done.wait (%p4368_p8), %s1019_s25, 8192  }
 0x25d   : > { %4117 = vsyncadd (%p4368_p8), %s1019_s25, 4294959104  ;;  %s4998_s24 = scalar_lea.vmem [#allocation15], %s4954_s20  ;;  %s1037_s29 = scalar_lea.sflag [#allocation17], %s4965_s21 }
 0x25e   : > { %s5002_s18 = scalar_lea.vmem [#allocation16], %s4954_s20 }
 0x25f   : > { %4119 = dma.done.wait (%p4368_p8), %s1037_s29, 8192  }
 0x260   : > { %4121 = vsyncadd (%p4368_p8), %s1037_s29, 4294959104  ;;  %s5009_s2 = scalar_lea.vmem [#allocation18], %s4954_s20  ;;  %s1055_s25 = scalar_lea.sflag [#allocation20], %s4965_s21 }
 0x261   : > { %s5013_s3 = scalar_lea.vmem [#allocation19], %s4954_s20 }
 0x262   : > { %4123 = dma.done.wait (%p4368_p8), %s1055_s25, 8192  }
 0x263   : > { %4125 = vsyncadd (%p4368_p8), %s1055_s25, 4294959104  ;;  %s5020_s4 = scalar_lea.vmem [#allocation21], %s4954_s20  ;;  %s1073_s29 = scalar_lea.sflag [#allocation23], %s4965_s21 }
 0x264   : > { %s5024_s5 = scalar_lea.vmem [#allocation22], %s4954_s20 }
 0x265   : > { %4127 = dma.done.wait (%p4368_p8), %s1073_s29, 8192  }
 0x266   : > { %4129 = vsyncadd (%p4368_p8), %s1073_s29, 4294959104  ;;  %s5031_s6 = scalar_lea.vmem [#allocation24], %s4954_s20  ;;  %p6120_p2 = pmov %p6117_p0 }
 0x267   : > { %p6121_p3 = pmov %p6117_p0 }
 0x268   : > { %4131 = dma.done.wait (%p6120_p2), [#allocation26], 2048  }
 0x269   : > { %4133 = vsyncadd (%p6121_p3), [#allocation26], 4294965248 }
 0x26a   : > { %1094 = sfence }
 0x26b   : > { %v3649_v0 = vld [vmem:[#allocation25 + $0x78] sm:$0xff]   ;;  %v3651_v2 = vld [vmem:[#allocation25 + $0x70] sm:$0xff]   ;;  %v3653_v4 = vld [vmem:[#allocation25 + $0x68] sm:$0xff]   ;;  %s1283_s22 = sld [smem:[#allocation2]] }
 0x26c   : > { %v3650_v1 = vld [vmem:[#allocation25 + $0x38] sm:$0xff]   ;;  %3421 = vmatprep.subr.bf16.mxu0 %v3649_v0  ;;  %3485 = vmatprep.subr.bf16.mxu1 %v3649_v0  ;;  %v3652_v3 = vld [vmem:[#allocation25 + $0x30] sm:$0xff]   ;;  %v3654_v5 = vld [vmem:[#allocation25 + $0x28] sm:$0xff]   ;;  %s3357_s15 = sld [smem:[#allocation2 + $0x1]] }
 0x26d   : > { %3422 = vmatpush3.bf16.msra.mxu0 %v3650_v1  ;;  %3493 = vmatpush3.bf16.msra.mxu1 %v3650_v1  ;;  %v3655_v6 = vld [vmem:[#allocation25 + $0x60] sm:$0xff]   ;;  %v3657_v8 = vld [vmem:[#allocation25 + $0x58] sm:$0xff]   ;;  %v3659_v10 = vld [vmem:[#allocation25 + $0x50] sm:$0xff]   ;;  %s5037_s20 = sld [smem:[#allocation2 + $0x2]] }
 0x26e   : > { %3423 = vmatprep.subr.bf16.mxu0 %v3651_v2  ;;  %3486 = vmatprep.subr.bf16.mxu1 %v3651_v2  ;;  %v3656_v7 = vld [vmem:[#allocation25 + $0x20] sm:$0xff]   ;;  %v3658_v9 = vld [vmem:[#allocation25 + $0x18] sm:$0xff]   ;;  %v3660_v11 = vld [vmem:[#allocation25 + $0x10] sm:$0xff]   ;;  %s5039_s21 = sld [smem:[#allocation2 + $0x3]] }
 0x26f   : > { %v3661_v12 = vld [vmem:[#allocation25 + $0x48] sm:$0xff]   ;;  %v1287_v14 = vld [vmem:[%s4958_s30 + $0x18] sm:$0xff]  ;;  %s5043_s25 = sld [smem:[#allocation2 + $0x4]]  ;;  %v3663_v26 = vld [vmem:[#allocation25 + $0x40] sm:$0xff]  }
 0x270   : > { %v1285_v13 = vld [vmem:[%s4958_s30 + $0x8] sm:$0xff]  ;;  %v1353_v16 = vld [vmem:[%s4969_s13 + $0x18] sm:$0xff]  ;;  %s5047_s29 = sld [smem:[#allocation2 + $0x5]]  ;;  %v3664_v42 = vld [vmem:[#allocation25] sm:$0xff]  }
 0x271   : > { %3424 = vmatpush3.bf16.msra.mxu0 %v3652_v3  ;;  %3494 = vmatpush3.bf16.msra.mxu1 %v3652_v3  ;;  %v1351_v15 = vld [vmem:[%s4969_s13 + $0x8] sm:$0xff]  ;;  %v5049_v17 = vstv %s1283_s22  ;;  %v1451_v19 = vld [vmem:[%s4976_s19 + $0x18] sm:$0xff]  ;;  %s5053_s7 = sld [smem:[#allocation2 + $0x6]] }
 0x272   : > { %3425 = vmatprep.subr.bf16.mxu0 %v3653_v4  ;;  %3487 = vmatprep.subr.bf16.mxu1 %v3653_v4  ;;  %v1449_v18 = vld [vmem:[%s4976_s19 + $0x8] sm:$0xff]  ;;  %v1318_v21 = vmul.f32 %v5049_v17, %v1285_v13  ;;  %v1320_v22 = vmul.f32 %v5049_v17, %v1287_v14  ;;  %v5057_v23 = vstv %s3357_s15  ;;  %v1549_v25 = vld [vmem:[%s4980_s1 + $0x18] sm:$0xff]  ;;  %s5061_s22 = sld [smem:[#allocation2 + $0x7]] }
 0x273   : > { %v3662_v20 = vld [vmem:[#allocation25 + $0x8] sm:$0xff]   ;;  %v1384_v27 = vmul.f32 %v5057_v23, %v1351_v15  ;;  %v1386_v28 = vmul.f32 %v5057_v23, %v1353_v16  ;;  %v5066_v29 = vstv %s5037_s20  ;;  %s5068_s8 = sld [smem:[#allocation2 + $0x8]]  ;;  %v1647_v34 = vld [vmem:[%s4987_s14 + $0x18] sm:$0xff] }
 0x274   : > { %v1547_v24 = vld [vmem:[%s4980_s1 + $0x8] sm:$0xff]  ;;  %v1482_v30 = vmul.f32 %v5066_v29, %v1449_v18  ;;  %v1484_v31 = vmul.f32 %v5066_v29, %v1451_v19  ;;  %v5073_v32 = vstv %s5039_s21  ;;  %s5077_s15 = sld [smem:[#allocation2 + $0x9]]  ;;  %v1303_v41 = vld [vmem:[%s4958_s30 + $0x98] sm:$0xff] }
 0x275   : > { %3426 = vmatpush3.bf16.msra.mxu0 %v3654_v5  ;;  %3495 = vmatpush3.bf16.msra.mxu1 %v3654_v5  ;;  %v1645_v33 = vld [vmem:[%s4987_s14 + $0x8] sm:$0xff]  ;;  %v1416_v35 = vadd.f32 %v1384_v27, %v1318_v21  ;;  %v1418_v36 = vadd.f32 %v1386_v28, %v1320_v22  ;;  %v1580_v37 = vmul.f32 %v5073_v32, %v1547_v24  ;;  %s5082_s20 = sld [smem:[#allocation2 + $0xa]]  ;;  %v5087_v43 = vstv %s5043_s25  ;;  %v1745_v44 = vld [vmem:[%s4991_s0 + $0x18] sm:$0xff] }
 0x276   : > { %3427 = vmatprep.subr.bf16.mxu0 %v3655_v6  ;;  %3488 = vmatprep.subr.bf16.mxu1 %v3655_v6  ;;  %v1582_v38 = vmul.f32 %v5073_v32, %v1549_v25  ;;  %v1743_v39 = vld [vmem:[%s4991_s0 + $0x8] sm:$0xff]  ;;  %v5091_v45 = vstv %s5047_s29  ;;  %s5093_s21 = sld [smem:[#allocation2 + $0xb]]  ;;  %v1678_v48 = vmul.f32 %v5087_v43, %v1645_v33  ;;  %v1680_v52 = vmul.f32 %v5087_v43, %v1647_v34  ;;  %v1843_v54 = vld [vmem:[%s4998_s24 + $0x18] sm:$0xff] }
 0x277   : > { %v1301_v40 = vld [vmem:[%s4958_s30 + $0x88] sm:$0xff]  ;;  %v1514_v46 = vadd.f32 %v1482_v30, %v1416_v35  ;;  %v1516_v47 = vadd.f32 %v1484_v31, %v1418_v36  ;;  %v5098_v50 = vstv %s5053_s7  ;;  %s5100_s25 = sld [smem:[#allocation2 + $0xc]]  ;;  %v1776_v53 = vmul.f32 %v5091_v45, %v1743_v39  ;;  %v1941_v61 = vld [vmem:[%s5002_s18 + $0x18] sm:$0xff]  ;;  %s2790_s7 = scalar_lea.sflag [#allocation4], %s4951_s17 }
 0x278   : > { %v1841_v49 = vld [vmem:[%s4998_s24 + $0x8] sm:$0xff]  ;;  %v1334_v56 = vmul.f32 %v5049_v17, %v1301_v40  ;;  %v1336_v57 = vmul.f32 %v5049_v17, %v1303_v41  ;;  %v1778_v60 = vmul.f32 %v5091_v45, %v1745_v44  ;;  %v5112_v62 = vstv %s5061_s22  ;;  %v2039_v0 = vld [vmem:[%s5009_s2 + $0x18] sm:$0xff] }
 0x279   : > { %3428 = vmatpush3.bf16.msra.mxu0 %v3656_v7  ;;  %3496 = vmatpush3.bf16.msra.mxu1 %v3656_v7  ;;  %v1367_v51 = vld [vmem:[%s4969_s13 + $0x88] sm:$0xff]  ;;  %v1612_v58 = vadd.f32 %v1580_v37, %v1514_v46  ;;  %v1614_v59 = vadd.f32 %v1582_v38, %v1516_v47  ;;  %v1874_v1 = vmul.f32 %v5098_v50, %v1841_v49  ;;  %v5118_v2 = vstv %s5068_s8  ;;  %v2137_v4 = vld [vmem:[%s5013_s3 + $0x18] sm:$0xff]  ;;  %s6123_s8 = sld [smem:[#allocation46_spill]] }
 0x27a   : > { %3429 = vmatprep.subr.bf16.mxu0 %v3657_v8  ;;  %3489 = vmatprep.subr.bf16.mxu1 %v3657_v8  ;;  %v1939_v55 = vld [vmem:[%s5002_s18 + $0x8] sm:$0xff]  ;;  %v5123_v5 = vstv %s5077_s15  ;;  %v1400_v6 = vmul.f32 %v5057_v23, %v1367_v51  ;;  %v1369_v13 = vld [vmem:[%s4969_s13 + $0x98] sm:$0xff]  ;;  %v1974_v14 = vmul.f32 %v5112_v62, %v1941_v61  ;;  %v2072_v22 = vmul.f32 %v5118_v2, %v2039_v0 }
 0x27b   : > { %v2037_v63 = vld [vmem:[%s5009_s2 + $0x8] sm:$0xff]  ;;  %v1710_v7 = vadd.f32 %v1678_v48, %v1612_v58  ;;  %v1712_v8 = vadd.f32 %v1680_v52, %v1614_v59  ;;  %v5134_v16 = vstv %s5082_s20  ;;  %v2170_v27 = vmul.f32 %v5123_v5, %v2137_v4  ;;  %v1565_v34 = vld [vmem:[%s4980_s1 + $0x98] sm:$0xff] }
 0x27c   : > { %v2135_v3 = vld [vmem:[%s5013_s3 + $0x8] sm:$0xff]  ;;  %v2070_v15 = vmul.f32 %v5118_v2, %v2037_v63  ;;  %v5138_v19 = vstv %s5093_s21  ;;  %v1402_v31 = vmul.f32 %v5057_v23, %v1369_v13  ;;  %v1663_v40 = vld [vmem:[%s4987_s14 + $0x98] sm:$0xff]  ;;  %v1432_v44 = vadd.f32 %v1400_v6, %v1334_v56 }
 0x27d   : > { %3430 = vmatpush3.bf16.msra.mxu0 %v3658_v9  ;;  %3497 = vmatpush3.bf16.msra.mxu1 %v3658_v9  ;;  %v1876_v9 = vmul.f32 %v5098_v50, %v1843_v54  ;;  %v2331_v18 = vld [vmem:[%s5024_s5 + $0x8] sm:$0xff]  ;;  %v1810_v21 = vadd.f32 %v1778_v60, %v1712_v8  ;;  %v2168_v24 = vmul.f32 %v5123_v5, %v2135_v3  ;;  %v5152_v38 = vstv %s5100_s25  ;;  %v2333_v41 = vld [vmem:[%s5024_s5 + $0x18] sm:$0xff] }
 0x27e   : > { %3431 = vmatprep.subr.bf16.mxu0 %v3659_v10  ;;  %3490 = vmatprep.subr.bf16.mxu1 %v3659_v10  ;;  %v1972_v10 = vmul.f32 %v5112_v62, %v1939_v55  ;;  %v1465_v25 = vld [vmem:[%s4976_s19 + $0x88] sm:$0xff]  ;;  %v2364_v37 = vmul.f32 %v5138_v19, %v2331_v18  ;;  %v1434_v46 = vadd.f32 %v1402_v31, %v1336_v57  ;;  %v1761_v55 = vld [vmem:[%s4991_s0 + $0x98] sm:$0xff] }
 0x27f   : > { %v1563_v33 = vld [vmem:[%s4980_s1 + $0x88] sm:$0xff]  ;;  %v1908_v36 = vadd.f32 %v1876_v9, %v1810_v21  ;;  %v1498_v47 = vmul.f32 %v5066_v29, %v1465_v25  ;;  %v2431_v58 = vld [vmem:[%s5031_s6 + $0x18] sm:$0xff]  ;;  %v1696_v60 = vmul.f32 %v5087_v43, %v1663_v40  ;;  %p6124_p8 = scmp.ne.s32.totalorder %s6123_s8, 0 }
 0x280   : > { %v1661_v39 = vld [vmem:[%s4987_s14 + $0x88] sm:$0xff]  ;;  %v1596_v52 = vmul.f32 %v5073_v32, %v1563_v33  ;;  %v1859_v4 = vld [vmem:[%s4998_s24 + $0x98] sm:$0xff] }
 0x281   : > { %3432 = vmatpush3.bf16.msra.mxu0 %v3660_v11  ;;  %3498 = vmatpush3.bf16.msra.mxu1 %v3660_v11  ;;  %v2233_v11 = vld [vmem:[%s5020_s4 + $0x8] sm:$0xff]  ;;  %v2006_v51 = vadd.f32 %v1974_v14, %v1908_v36  ;;  %v1530_v59 = vadd.f32 %v1498_v47, %v1432_v44  ;;  %v1694_v57 = vmul.f32 %v5087_v43, %v1661_v39  ;;  %v2153_v33 = vld [vmem:[%s5013_s3 + $0x98] sm:$0xff]  ;;  %v1284_v47 = vld [vmem:[%s4958_s30] sm:$0xff] }
 0x282   : > { %3433 = vmatprep.subr.bf16.mxu0 %v3661_v12  ;;  %3491 = vmatprep.subr.bf16.mxu1 %v3661_v12  ;;  %v2235_v12 = vld [vmem:[%s5020_s4 + $0x18] sm:$0xff]  ;;  %v2266_v28 = vmul.f32 %v5134_v16, %v2233_v11  ;;  %v1759_v54 = vld [vmem:[%s4991_s0 + $0x88] sm:$0xff] }
 0x283   : > { %v2268_v30 = vmul.f32 %v5134_v16, %v2235_v12  ;;  %v1857_v61 = vld [vmem:[%s4998_s24 + $0x88] sm:$0xff]  ;;  %v2104_v0 = vadd.f32 %v2072_v22, %v2006_v51  ;;  %v1792_v9 = vmul.f32 %v5091_v45, %v1759_v54  ;;  %v1957_v11 = vld [vmem:[%s5002_s18 + $0x98] sm:$0xff] }
 0x284   : > { %v1955_v6 = vld [vmem:[%s5002_s18 + $0x88] sm:$0xff]  ;;  %v1890_v18 = vmul.f32 %v5098_v50, %v1857_v61  ;;  %v2251_v39 = vld [vmem:[%s5020_s4 + $0x98] sm:$0xff] }
 0x285   : > { %3434 = vmatpush3.bf16.msra.mxu0 %v3662_v20  ;;  %3499 = vmatpush3.bf16.msra.mxu1 %v3662_v20  ;;  %v1808_v20 = vadd.f32 %v1776_v53, %v1710_v7  ;;  %v1598_v53 = vmul.f32 %v5073_v32, %v1565_v34  ;;  %v1628_v7 = vadd.f32 %v1596_v52, %v1530_v59  ;;  %v2053_v12 = vld [vmem:[%s5009_s2 + $0x88] sm:$0xff]  ;;  %v1350_v52 = vld [vmem:[%s4969_s13] sm:$0xff] }
 0x286   : > { %3435 = vmatprep.subr.bf16.mxu0 %v3663_v26  ;;  %3492 = vmatprep.subr.bf16.mxu1 %v3663_v26  ;;  %v1467_v26 = vld [vmem:[%s4976_s19 + $0x98] sm:$0xff]  ;;  %v2202_v14 = vadd.f32 %v2170_v27, %v2104_v0  ;;  %v2151_v21 = vld [vmem:[%s5013_s3 + $0x88] sm:$0xff]  ;;  %v1988_v31 = vmul.f32 %v5112_v62, %v1955_v6  ;;  %v2086_v36 = vmul.f32 %v5118_v2, %v2053_v12 }
 0x287   : > { %v1906_v35 = vadd.f32 %v1874_v1, %v1808_v20  ;;  %v1500_v48 = vmul.f32 %v5066_v29, %v1467_v26  ;;  %v2366_v1 = vmul.f32 %v5138_v19, %v2333_v41  ;;  %v2055_v20 = vld [vmem:[%s5009_s2 + $0x98] sm:$0xff]  ;;  %v1726_v22 = vadd.f32 %v1694_v57, %v1628_v7  ;;  %v2249_v34 = vld [vmem:[%s5020_s4 + $0x88] sm:$0xff]  ;;  %v1450_v57 = vld [vmem:[%s4976_s19 + $0x10] sm:$0xff] }
 0x288   : > { %v1892_v26 = vmul.f32 %v5098_v50, %v1859_v4  ;;  %v2300_v27 = vadd.f32 %v2268_v30, %v2202_v14  ;;  %v2347_v40 = vld [vmem:[%s5024_s5 + $0x88] sm:$0xff]  ;;  %v2088_v44 = vmul.f32 %v5118_v2, %v2055_v20  ;;  %v2282_v51 = vmul.f32 %v5134_v16, %v2249_v34 }
 0x289   : > { %3436 = vmatpush3.bf16.msra.mxu0 %v3664_v42  ;;  %3500 = vmatpush3.bf16.msra.mxu1 %v3664_v42  ;;  %v2429_v42 = vld [vmem:[%s5031_s6 + $0x8] sm:$0xff]  ;;  %v2004_v49 = vadd.f32 %v1972_v10, %v1906_v35  ;;  %v1532_v56 = vadd.f32 %v1500_v48, %v1434_v46  ;;  %v1794_v10 = vmul.f32 %v5091_v45, %v1761_v55 }
 0x28a   : > { %v2462_v3 = vmul.f32 %v5152_v38, %v2429_v42  ;;  %v1990_v35 = vmul.f32 %v5112_v62, %v1957_v11  ;;  %v1824_v41 = vadd.f32 %v1792_v9, %v1726_v22  ;;  %v2184_v46 = vmul.f32 %v5123_v5, %v2151_v21  ;;  %v1548_v9 = vld [vmem:[%s4980_s1 + $0x10] sm:$0xff]  ;;  %v2447_v21 = vld [vmem:[%s5031_s6 + $0x98] sm:$0xff] }
 0x28b   : > { %v2102_v63 = vadd.f32 %v2070_v15, %v2004_v49  ;;  %v1630_v8 = vadd.f32 %v1598_v53, %v1532_v56  ;;  %v2464_v15 = vmul.f32 %v5152_v38, %v2431_v58  ;;  %v2398_v48 = vadd.f32 %v2366_v1, %v2300_v27  ;;  %v1352_v53 = vld [vmem:[%s4969_s13 + $0x10] sm:$0xff]  ;;  %v1448_v56 = vld [vmem:[%s4976_s19] sm:$0xff] }
 0x28c   : > { %v2186_v49 = vmul.f32 %v5123_v5, %v2153_v33  ;;  %v1922_v54 = vadd.f32 %v1890_v18, %v1824_v41  ;;  %v2284_v58 = vmul.f32 %v5134_v16, %v2251_v39  ;;  %v2380_v59 = vmul.f32 %v5138_v19, %v2347_v40  ;;  %v1646_v11 = vld [vmem:[%s4987_s14 + $0x10] sm:$0xff]  ;;  %v1840_v41 = vld [vmem:[%s4998_s24] sm:$0xff] }
 0x28d   : > { %v2200_v13 = vadd.f32 %v2168_v24, %v2102_v63  ;;  %v1728_v25 = vadd.f32 %v1696_v60, %v1630_v8  ;;  %v2496_v61 = vadd.f32 %v2464_v15, %v2398_v48  ;;  %v2349_v63 = vld [vmem:[%s5024_s5 + $0x98] sm:$0xff]  ;;  %v1317_v0 = vmul.f32 %v5049_v17, %v1284_v47  ;;  %v1938_v48 = vld [vmem:[%s5002_s18] sm:$0xff] }
 0x28e   : > { %v2020_v4 = vadd.f32 %v1988_v31, %v1922_v54  ;;  %v1383_v7 = vmul.f32 %v5057_v23, %v1350_v52  ;;  %v1385_v8 = vmul.f32 %v5057_v23, %v1352_v53  ;;  %v1483_v14 = vmul.f32 %v5066_v29, %v1450_v57  ;;  %v1744_v31 = vld [vmem:[%s4991_s0 + $0x10] sm:$0xff] }
 0x28f   : > { %v2298_v24 = vadd.f32 %v2266_v28, %v2200_v13  ;;  %v1826_v42 = vadd.f32 %v1794_v10, %v1728_v25  ;;  %v1286_v28 = vld [vmem:[%s4958_s30 + $0x10] sm:$0xff]  ;;  %v1644_v10 = vld [vmem:[%s4987_s14] sm:$0xff]  ;;  %v1481_v13 = vmul.f32 %v5066_v29, %v1448_v56  ;;  %v2382_v33 = vmul.f32 %v5138_v19, %v2349_v63 }
 0x290   : > { %v1319_v1 = vmul.f32 %v5049_v17, %v1286_v28  ;;  %v2118_v18 = vadd.f32 %v2086_v36, %v2020_v4  ;;  %v1415_v22 = vadd.f32 %v1383_v7, %v1317_v0  ;;  %v1581_v34 = vmul.f32 %v5073_v32, %v1548_v9  ;;  %v1940_v54 = vld [vmem:[%s5002_s18 + $0x10] sm:$0xff]  ;;  %v1300_v4 = vld [vmem:[%s4958_s30 + $0x80] sm:$0xff] }
 0x291   : > { %v2396_v30 = vadd.f32 %v2364_v37, %v2298_v24  ;;  %v1924_v55 = vadd.f32 %v1892_v26, %v1826_v42  ;;  %v1546_v37 = vld [vmem:[%s4980_s1] sm:$0xff]  ;;  %v1677_v24 = vmul.f32 %v5087_v43, %v1644_v10  ;;  %v1679_v27 = vmul.f32 %v5087_v43, %v1646_v11  ;;  %v1842_v42 = vld [vmem:[%s4998_s24 + $0x10] sm:$0xff] }
 0x292   : > { %v1579_v15 = vmul.f32 %v5073_v32, %v1546_v37  ;;  %v1417_v25 = vadd.f32 %v1385_v8, %v1319_v1  ;;  %v1742_v26 = vld [vmem:[%s4991_s0] sm:$0xff]  ;;  %v1513_v39 = vadd.f32 %v1481_v13, %v1415_v22  ;;  %v2480_v47 = vmul.f32 %v5152_v38, %v2447_v21  ;;  %v2038_v56 = vld [vmem:[%s5009_s2 + $0x10] sm:$0xff] }
 0x293   : > { %v2494_v60 = vadd.f32 %v2462_v3, %v2396_v30  ;;  %v2022_v6 = vadd.f32 %v1990_v35, %v1924_v55  ;;  %v2445_v3 = vld [vmem:[%s5031_s6 + $0x88] sm:$0xff]  ;;  %v2216_v35 = vadd.f32 %v2184_v46, %v2118_v18  ;;  %v1775_v28 = vmul.f32 %v5091_v45, %v1742_v26  ;;  %v2036_v55 = vld [vmem:[%s5009_s2] sm:$0xff]  ;;  %v1466_v18 = vld [vmem:[%s4976_s19 + $0x90] sm:$0xff] }
 0x294   : > { %v1515_v40 = vadd.f32 %v1483_v14, %v1417_v25  ;;  %v1777_v30 = vmul.f32 %v5091_v45, %v1744_v31  ;;  %v1611_v52 = vadd.f32 %v1579_v15, %v1513_v39  ;;  %v1873_v57 = vmul.f32 %v5098_v50, %v1840_v41  ;;  %v2232_v1 = vld [vmem:[%s5020_s4] sm:$0xff]  ;;  %v1368_v14 = vld [vmem:[%s4969_s13 + $0x90] sm:$0xff] }
 0x295   : > { %v2526_v12 = vpack.c.bf16 %v2496_v61, %v2494_v60  ;;  %v2120_v20 = vadd.f32 %v2088_v44, %v2022_v6  ;;  %v2478_v44 = vmul.f32 %v5152_v38, %v2445_v3  ;;  %v2314_v46 = vadd.f32 %v2282_v51, %v2216_v35  ;;  %v2134_v60 = vld [vmem:[%s5013_s3] sm:$0xff]  ;;  %v2234_v22 = vld [vmem:[%s5020_s4 + $0x10] sm:$0xff] }
 0x296   : > { %v1613_v53 = vadd.f32 %v1581_v34, %v1515_v40  ;;  %v1875_v37 = vmul.f32 %v5098_v50, %v1842_v42  ;;  %v1709_v0 = vadd.f32 %v1677_v24, %v1611_v52  ;;  %v1971_v6 = vmul.f32 %v5112_v62, %v1938_v48  ;;  %v1366_v10 = vld [vmem:[%s4969_s13 + $0x80] sm:$0xff]  ;;  %v2332_v39 = vld [vmem:[%s5024_s5 + $0x10] sm:$0xff] }
 0x297   : > { %2708 = vmatprep.mubr.bf16.mxu0 %v2526_v12  ;;  %v2218_v36 = vadd.f32 %v2186_v49, %v2120_v20  ;;  %v2412_v61 = vadd.f32 %v2380_v59, %v2314_v46  ;;  %v1973_v7 = vmul.f32 %v5112_v62, %v1940_v54  ;;  %v2069_v8 = vmul.f32 %v5118_v2, %v2036_v55  ;;  %v1302_v59 = vld [vmem:[%s4958_s30 + $0x90] sm:$0xff]  ;;  %v1464_v15 = vld [vmem:[%s4976_s19 + $0x80] sm:$0xff] }
 0x298   : > { %v1711_v51 = vadd.f32 %v1679_v27, %v1613_v53  ;;  %v2071_v9 = vmul.f32 %v5118_v2, %v2038_v56  ;;  %v1807_v3 = vadd.f32 %v1775_v28, %v1709_v0  ;;  %v2167_v20 = vmul.f32 %v5123_v5, %v2134_v60  ;;  %v2330_v26 = vld [vmem:[%s5024_s5] sm:$0xff]  ;;  %v1662_v52 = vld [vmem:[%s4987_s14 + $0x90] sm:$0xff] }
 0x299   : > { %v2316_v49 = vadd.f32 %v2284_v58, %v2218_v36  ;;  %v2136_v58 = vld [vmem:[%s5013_s3 + $0x10] sm:$0xff]  ;;  %v2510_v11 = vadd.f32 %v2478_v44, %v2412_v61  ;;  %v2265_v25 = vmul.f32 %v5134_v16, %v2232_v1  ;;  %v1333_v31 = vmul.f32 %v5049_v17, %v1300_v4  ;;  %v1562_v35 = vld [vmem:[%s4980_s1 + $0x80] sm:$0xff] }
 0x29a   : > { %v1809_v13 = vadd.f32 %v1777_v30, %v1711_v51  ;;  %v2169_v21 = vmul.f32 %v5123_v5, %v2136_v58  ;;  %v1905_v34 = vadd.f32 %v1873_v57, %v1807_v3  ;;  %v1335_v27 = vmul.f32 %v5049_v17, %v1302_v59  ;;  %v1564_v36 = vld [vmem:[%s4980_s1 + $0x90] sm:$0xff]  ;;  %v2428_v40 = vld [vmem:[%s5031_s6] sm:$0xff] }
 0x29b   : > { %v2414_v63 = vadd.f32 %v2382_v33, %v2316_v49  ;;  %v1399_v41 = vmul.f32 %v5057_v23, %v1366_v10  ;;  %v1401_v42 = vmul.f32 %v5057_v23, %v1368_v14  ;;  %v1497_v44 = vmul.f32 %v5066_v29, %v1464_v15  ;;  %v1660_v49 = vld [vmem:[%s4987_s14 + $0x80] sm:$0xff]  ;;  %v2430_v53 = vld [vmem:[%s5031_s6 + $0x10] sm:$0xff] }
 0x29c   : > { %v1907_v24 = vadd.f32 %v1875_v37, %v1809_v13  ;;  %v2003_v28 = vadd.f32 %v1971_v6, %v1905_v34  ;;  %v2267_v48 = vmul.f32 %v5134_v16, %v2234_v22  ;;  %v2363_v46 = vmul.f32 %v5138_v19, %v2330_v26  ;;  %v1758_v37 = vld [vmem:[%s4991_s0 + $0x80] sm:$0xff]  ;;  %v1760_v51 = vld [vmem:[%s4991_s0 + $0x90] sm:$0xff] }
 0x29d   : > { %v2512_v12 = vadd.f32 %v2480_v47, %v2414_v63  ;;  %v1499_v47 = vmul.f32 %v5066_v29, %v1466_v18  ;;  %v1431_v54 = vadd.f32 %v1399_v41, %v1333_v31  ;;  %v1433_v55 = vadd.f32 %v1401_v42, %v1335_v27  ;;  %v1856_v58 = vld [vmem:[%s4998_s24 + $0x80] sm:$0xff]  ;;  %v1858_v59 = vld [vmem:[%s4998_s24 + $0x90] sm:$0xff]  ;;  %v1289_v41 = vld [vmem:[%s4958_s30 + $0x28] sm:$0xff] }
 0x29e   : > { %v2005_v30 = vadd.f32 %v1973_v7, %v1907_v24  ;;  %v1595_v56 = vmul.f32 %v5073_v32, %v1562_v35  ;;  %v1597_v57 = vmul.f32 %v5073_v32, %v1564_v36  ;;  %v2101_v60 = vadd.f32 %v2069_v8, %v2003_v28  ;;  %v1954_v10 = vld [vmem:[%s5002_s18 + $0x80] sm:$0xff]  ;;  %v1956_v3 = vld [vmem:[%s5002_s18 + $0x90] sm:$0xff] }
 0x29f   : > { %v2534_v33 = vpack.c.bf16 %v2512_v12, %v2510_v11  ;;  %v2365_v63 = vmul.f32 %v5138_v19, %v2332_v39  ;;  %v2461_v0 = vmul.f32 %v5152_v38, %v2428_v40  ;;  %v1529_v1 = vadd.f32 %v1497_v44, %v1431_v54  ;;  %v2052_v13 = vld [vmem:[%s5009_s2 + $0x80] sm:$0xff]  ;;  %v2054_v26 = vld [vmem:[%s5009_s2 + $0x90] sm:$0xff] }
 0x2a0   : > { %v2103_v61 = vadd.f32 %v2071_v9, %v2005_v30  ;;  %v1531_v4 = vadd.f32 %v1499_v47, %v1433_v55  ;;  %v1693_v6 = vmul.f32 %v5087_v43, %v1660_v49  ;;  %v1695_v7 = vmul.f32 %v5087_v43, %v1662_v52  ;;  %v2150_v31 = vld [vmem:[%s5013_s3 + $0x80] sm:$0xff]  ;;  %v2152_v24 = vld [vmem:[%s5013_s3 + $0x90] sm:$0xff]  ;;  %v1355_v30 = vld [vmem:[%s4969_s13 + $0x28] sm:$0xff] }
 0x2a1   : > { %2740 = vmatprep.mubr.bf16.mxu1 %v2534_v33  ;;  %v2199_v8 = vadd.f32 %v2167_v20, %v2101_v60  ;;  %v2463_v11 = vmul.f32 %v5152_v38, %v2430_v53  ;;  %v1791_v12 = vmul.f32 %v5091_v45, %v1758_v37  ;;  %v1627_v14 = vadd.f32 %v1595_v56, %v1529_v1  ;;  %v2248_v27 = vld [vmem:[%s5020_s4 + $0x80] sm:$0xff]  ;;  %v1453_v55 = vld [vmem:[%s4976_s19 + $0x28] sm:$0xff]  ;;  %v1455_v56 = vld [vmem:[%s4976_s19 + $0x38] sm:$0xff] }
 0x2a2   : > { %v2201_v9 = vadd.f32 %v2169_v21, %v2103_v61  ;;  %v1629_v15 = vadd.f32 %v1597_v57, %v1531_v4  ;;  %v1793_v18 = vmul.f32 %v5091_v45, %v1760_v51  ;;  %v1889_v22 = vmul.f32 %v5098_v50, %v1856_v58  ;;  %v2250_v60 = vld [vmem:[%s5020_s4 + $0x90] sm:$0xff] }
 0x2a3   : > { %v2297_v20 = vadd.f32 %v2265_v25, %v2199_v8  ;;  %v1891_v33 = vmul.f32 %v5098_v50, %v1858_v59  ;;  %v1987_v34 = vmul.f32 %v5112_v62, %v1954_v10  ;;  %v1725_v35 = vadd.f32 %v1693_v6, %v1627_v14  ;;  %v1291_v25 = vld [vmem:[%s4958_s30 + $0x38] sm:$0xff]  ;;  %v2346_v10 = vld [vmem:[%s5024_s5 + $0x80] sm:$0xff] }
 0x2a4   : > { %v2299_v21 = vadd.f32 %v2267_v48, %v2201_v9  ;;  %v1727_v36 = vadd.f32 %v1695_v7, %v1629_v15  ;;  %v1989_v39 = vmul.f32 %v5112_v62, %v1956_v3  ;;  %v2085_v40 = vmul.f32 %v5118_v2, %v2052_v13  ;;  %v1357_v48 = vld [vmem:[%s4969_s13 + $0x38] sm:$0xff]  ;;  %v1649_v7 = vld [vmem:[%s4987_s14 + $0x28] sm:$0xff]  ;;  %v2348_v13 = vld [vmem:[%s5024_s5 + $0x90] sm:$0xff] }
 0x2a5   : > { %v2395_v42 = vadd.f32 %v2363_v46, %v2297_v20  ;;  %v2087_v47 = vmul.f32 %v5118_v2, %v2054_v26  ;;  %v2183_v28 = vmul.f32 %v5123_v5, %v2150_v31  ;;  %v1823_v49 = vadd.f32 %v1791_v12, %v1725_v35  ;;  %v1551_v46 = vld [vmem:[%s4980_s1 + $0x28] sm:$0xff]  ;;  %v1553_v6 = vld [vmem:[%s4980_s1 + $0x38] sm:$0xff]  ;;  %v2444_v31 = vld [vmem:[%s5031_s6 + $0x80] sm:$0xff] }
 0x2a6   : > { %v2397_v44 = vadd.f32 %v2365_v63, %v2299_v21  ;;  %v1825_v52 = vadd.f32 %v1793_v18, %v1727_v36  ;;  %v2185_v53 = vmul.f32 %v5123_v5, %v2152_v24  ;;  %v2281_v54 = vmul.f32 %v5134_v16, %v2248_v27  ;;  %v1651_v59 = vld [vmem:[%s4987_s14 + $0x38] sm:$0xff]  ;;  %v1747_v18 = vld [vmem:[%s4991_s0 + $0x28] sm:$0xff]  ;;  %v2446_v27 = vld [vmem:[%s5031_s6 + $0x90] sm:$0xff] }
 0x2a7   : > { %v2493_v57 = vadd.f32 %v2461_v0, %v2395_v42  ;;  %v1322_v61 = vmul.f32 %v5049_v17, %v1289_v41  ;;  %v1324_v63 = vmul.f32 %v5049_v17, %v1291_v25  ;;  %v1921_v51 = vadd.f32 %v1889_v22, %v1823_v49  ;;  %v1749_v22 = vld [vmem:[%s4991_s0 + $0x38] sm:$0xff] }
 0x2a8   : > { %v2495_v37 = vadd.f32 %v2463_v11, %v2397_v44  ;;  %v1923_v58 = vadd.f32 %v1891_v33, %v1825_v52  ;;  %v1388_v1 = vmul.f32 %v5057_v23, %v1355_v30  ;;  %v1390_v4 = vmul.f32 %v5057_v23, %v1357_v48  ;;  %v1847_v41 = vld [vmem:[%s4998_s24 + $0x38] sm:$0xff]  ;;  %v1943_v48 = vld [vmem:[%s5002_s18 + $0x28] sm:$0xff] }
 0x2a9   : > { %v1486_v8 = vmul.f32 %v5066_v29, %v1453_v55  ;;  %v1488_v9 = vmul.f32 %v5066_v29, %v1455_v56  ;;  %v1584_v11 = vmul.f32 %v5073_v32, %v1551_v46  ;;  %v2019_v12 = vadd.f32 %v1987_v34, %v1921_v51  ;;  %v1945_v55 = vld [vmem:[%s5002_s18 + $0x38] sm:$0xff]  ;;  %v2041_v56 = vld [vmem:[%s5009_s2 + $0x28] sm:$0xff] }
 0x2aa   : > { %v2525_v0 = vpack.c.bf16 %v2495_v37, %v2493_v57  ;;  %v2021_v3 = vadd.f32 %v1989_v39, %v1923_v58  ;;  %v1420_v14 = vadd.f32 %v1388_v1, %v1322_v61  ;;  %v1422_v15 = vadd.f32 %v1390_v4, %v1324_v63  ;;  %v1845_v39 = vld [vmem:[%s4998_s24 + $0x28] sm:$0xff]  ;;  %v2043_v46 = vld [vmem:[%s5009_s2 + $0x38] sm:$0xff] }
 0x2ab   : > { %v2283_v26 = vmul.f32 %v5134_v16, %v2250_v60  ;;  %v1586_v20 = vmul.f32 %v5073_v32, %v1553_v6  ;;  %v1682_v21 = vmul.f32 %v5087_v43, %v1649_v7  ;;  %v1684_v33 = vmul.f32 %v5087_v43, %v1651_v59  ;;  %v2139_v63 = vld [vmem:[%s5013_s3 + $0x28] sm:$0xff]  ;;  %v2141_v1 = vld [vmem:[%s5013_s3 + $0x38] sm:$0xff] }
 0x2ac   : > { %2709 = vmatmul.mubr.bf16.vlgmr.msra.gmra.mxu0 %v2525_v0  ;;  %v2117_v34 = vadd.f32 %v2085_v40, %v2019_v12  ;;  %v2119_v24 = vadd.f32 %v2087_v47, %v2021_v3  ;;  %v1518_v35 = vadd.f32 %v1486_v8, %v1420_v14  ;;  %v1520_v36 = vadd.f32 %v1488_v9, %v1422_v15  ;;  %v2237_v4 = vld [vmem:[%s5020_s4 + $0x28] sm:$0xff]  ;;  %v1307_v8 = vld [vmem:[%s4958_s30 + $0xb8] sm:$0xff] }
 0x2ad   : > { %v2379_v25 = vmul.f32 %v5138_v19, %v2346_v10  ;;  %v2381_v42 = vmul.f32 %v5138_v19, %v2348_v13  ;;  %v1780_v44 = vmul.f32 %v5091_v45, %v1747_v18  ;;  %v1782_v30 = vmul.f32 %v5091_v45, %v1749_v22  ;;  %v1305_v6 = vld [vmem:[%s4958_s30 + $0xa8] sm:$0xff]  ;;  %v1373_v13 = vld [vmem:[%s4969_s13 + $0xb8] sm:$0xff] }
 0x2ae   : > { %v2215_v40 = vadd.f32 %v2183_v28, %v2117_v34  ;;  %v2217_v47 = vadd.f32 %v2185_v53, %v2119_v24  ;;  %v1616_v49 = vadd.f32 %v1584_v11, %v1518_v35  ;;  %v1618_v52 = vadd.f32 %v1586_v20, %v1520_v36  ;;  %v1371_v3 = vld [vmem:[%s4969_s13 + $0xa8] sm:$0xff]  ;;  %v2239_v35 = vld [vmem:[%s5020_s4 + $0x38] sm:$0xff] }
 0x2af   : > { %v2477_v57 = vmul.f32 %v5152_v38, %v2444_v31  ;;  %v2479_v37 = vmul.f32 %v5152_v38, %v2446_v27  ;;  %v1878_v60 = vmul.f32 %v5098_v50, %v1845_v39  ;;  %v1880_v61 = vmul.f32 %v5098_v50, %v1847_v41  ;;  %v1469_v14 = vld [vmem:[%s4976_s19 + $0xa8] sm:$0xff]  ;;  %v1471_v31 = vld [vmem:[%s4976_s19 + $0xb8] sm:$0xff] }
 0x2b0   : > { %v2313_v28 = vadd.f32 %v2281_v54, %v2215_v40  ;;  %v2315_v53 = vadd.f32 %v2283_v26, %v2217_v47  ;;  %v1714_v51 = vadd.f32 %v1682_v21, %v1616_v49  ;;  %v1716_v58 = vadd.f32 %v1684_v33, %v1618_v52  ;;  %v1567_v24 = vld [vmem:[%s4980_s1 + $0xa8] sm:$0xff]  ;;  %v1569_v27 = vld [vmem:[%s4980_s1 + $0xb8] sm:$0xff] }
 0x2b1   : > { %v1976_v7 = vmul.f32 %v5112_v62, %v1943_v48  ;;  %v1978_v59 = vmul.f32 %v5112_v62, %v1945_v55  ;;  %v2074_v0 = vmul.f32 %v5118_v2, %v2041_v56  ;;  %v2076_v10 = vmul.f32 %v5118_v2, %v2043_v46  ;;  %v2335_v36 = vld [vmem:[%s5024_s5 + $0x28] sm:$0xff]  ;;  %v1667_v49 = vld [vmem:[%s4987_s14 + $0xb8] sm:$0xff] }
 0x2b2   : > { %v2411_v54 = vadd.f32 %v2379_v25, %v2313_v28  ;;  %v2413_v9 = vadd.f32 %v2381_v42, %v2315_v53  ;;  %v1812_v11 = vadd.f32 %v1780_v44, %v1714_v51  ;;  %v1814_v12 = vadd.f32 %v1782_v30, %v1716_v58  ;;  %v1665_v47 = vld [vmem:[%s4987_s14 + $0xa8] sm:$0xff]  ;;  %v2337_v52 = vld [vmem:[%s5024_s5 + $0x38] sm:$0xff] }
 0x2b3   : > { %v2172_v15 = vmul.f32 %v5123_v5, %v2139_v63  ;;  %v2174_v18 = vmul.f32 %v5123_v5, %v2141_v1  ;;  %v2270_v22 = vmul.f32 %v5134_v16, %v2237_v4  ;;  %v1338_v26 = vmul.f32 %v5049_v17, %v1305_v6  ;;  %v2433_v55 = vld [vmem:[%s5031_s6 + $0x28] sm:$0xff]  ;;  %v1765_v51 = vld [vmem:[%s4991_s0 + $0xb8] sm:$0xff] }
 0x2b4   : > { %v2509_v20 = vadd.f32 %v2477_v57, %v2411_v54  ;;  %v2511_v21 = vadd.f32 %v2479_v37, %v2413_v9  ;;  %v1910_v33 = vadd.f32 %v1878_v60, %v1812_v11  ;;  %v1912_v34 = vadd.f32 %v1880_v61, %v1814_v12  ;;  %v1763_v53 = vld [vmem:[%s4991_s0 + $0xa8] sm:$0xff]  ;;  %v2435_v58 = vld [vmem:[%s5031_s6 + $0x38] sm:$0xff] }
 0x2b5   : > { %v1340_v39 = vmul.f32 %v5049_v17, %v1307_v8  ;;  %v1404_v41 = vmul.f32 %v5057_v23, %v1371_v3  ;;  %v1406_v25 = vmul.f32 %v5057_v23, %v1373_v13  ;;  %v1502_v42 = vmul.f32 %v5066_v29, %v1469_v14  ;;  %v1863_v9 = vld [vmem:[%s4998_s24 + $0xb8] sm:$0xff]  ;;  %v1959_v11 = vld [vmem:[%s5002_s18 + $0xa8] sm:$0xff] }
 0x2b6   : > { %v2533_v44 = vpack.c.bf16 %v2511_v21, %v2509_v20  ;;  %v2008_v30 = vadd.f32 %v1976_v7, %v1910_v33  ;;  %v2010_v48 = vadd.f32 %v1978_v59, %v1912_v34  ;;  %v1504_v40 = vmul.f32 %v5066_v29, %v1471_v31  ;;  %v1861_v59 = vld [vmem:[%s4998_s24 + $0xa8] sm:$0xff]  ;;  %v2059_v33 = vld [vmem:[%s5009_s2 + $0xb8] sm:$0xff] }
 0x2b7   : > { %v1436_v56 = vadd.f32 %v1404_v41, %v1338_v26  ;;  %v1438_v46 = vadd.f32 %v1406_v25, %v1340_v39  ;;  %v1600_v57 = vmul.f32 %v5073_v32, %v1567_v24  ;;  %v1602_v37 = vmul.f32 %v5073_v32, %v1569_v27  ;;  %v1961_v26 = vld [vmem:[%s5002_s18 + $0xb8] sm:$0xff]  ;;  %v2057_v31 = vld [vmem:[%s5009_s2 + $0xa8] sm:$0xff] }
 0x2b8   : > { %2741 = vmatmul.mubr.bf16.vlgmr.msra.gmra.mxu1 %v2533_v44  ;;  %v2106_v60 = vadd.f32 %v2074_v0, %v2008_v30  ;;  %v2108_v61 = vadd.f32 %v2076_v10, %v2010_v48  ;;  %v2272_v63 = vmul.f32 %v5134_v16, %v2239_v35  ;;  %v2368_v28 = vmul.f32 %v5138_v19, %v2335_v36  ;;  %v2155_v34 = vld [vmem:[%s5013_s3 + $0xa8] sm:$0xff]  ;;  %v2157_v39 = vld [vmem:[%s5013_s3 + $0xb8] sm:$0xff]  ;;  %v1288_v30 = vld [vmem:[%s4958_s30 + $0x20] sm:$0xff] }
 0x2b9   : > { %v1534_v1 = vadd.f32 %v1502_v42, %v1436_v56  ;;  %v1536_v4 = vadd.f32 %v1504_v40, %v1438_v46  ;;  %v1698_v6 = vmul.f32 %v5087_v43, %v1665_v47  ;;  %v1700_v7 = vmul.f32 %v5087_v43, %v1667_v49  ;;  %v1290_v48 = vld [vmem:[%s4958_s30 + $0x30] sm:$0xff]  ;;  %v1452_v46 = vld [vmem:[%s4976_s19 + $0x20] sm:$0xff] }
 0x2ba   : > { %v2204_v0 = vadd.f32 %v2172_v15, %v2106_v60  ;;  %v2206_v10 = vadd.f32 %v2174_v18, %v2108_v61  ;;  %v2370_v8 = vmul.f32 %v5138_v19, %v2337_v52  ;;  %v2466_v54 = vmul.f32 %v5152_v38, %v2433_v55  ;;  %v1354_v55 = vld [vmem:[%s4969_s13 + $0x20] sm:$0xff]  ;;  %v1356_v56 = vld [vmem:[%s4969_s13 + $0x30] sm:$0xff]  ;;  %v2255_v61 = vld [vmem:[%s5020_s4 + $0xb8] sm:$0xff] }
 0x2bb   : > { %v1632_v12 = vadd.f32 %v1600_v57, %v1534_v1  ;;  %v1634_v3 = vadd.f32 %v1602_v37, %v1536_v4  ;;  %v1796_v13 = vmul.f32 %v5091_v45, %v1763_v53  ;;  %v1798_v14 = vmul.f32 %v5091_v45, %v1765_v51  ;;  %v1550_v4 = vld [vmem:[%s4980_s1 + $0x20] sm:$0xff] }
 0x2bc   : > { %v2302_v15 = vadd.f32 %v2270_v22, %v2204_v0  ;;  %v2304_v18 = vadd.f32 %v2272_v63, %v2206_v10  ;;  %v2468_v20 = vmul.f32 %v5152_v38, %v2435_v58  ;;  %v1894_v21 = vmul.f32 %v5098_v50, %v1861_v59  ;;  %v2253_v22 = vld [vmem:[%s5020_s4 + $0xa8] sm:$0xff]  ;;  %v2353_v0 = vld [vmem:[%s5024_s5 + $0xb8] sm:$0xff] }
 0x2bd   : > { %v1730_v24 = vadd.f32 %v1698_v6, %v1632_v12  ;;  %v1732_v27 = vadd.f32 %v1700_v7, %v1634_v3  ;;  %v1896_v35 = vmul.f32 %v5098_v50, %v1863_v9  ;;  %v1992_v36 = vmul.f32 %v5112_v62, %v1959_v11  ;;  %v1552_v6 = vld [vmem:[%s4980_s1 + $0x30] sm:$0xff]  ;;  %v2351_v59 = vld [vmem:[%s5024_s5 + $0xa8] sm:$0xff] }
 0x2be   : > { %v2400_v41 = vadd.f32 %v2368_v28, %v2302_v15  ;;  %v2402_v25 = vadd.f32 %v2370_v8, %v2304_v18  ;;  %v1994_v42 = vmul.f32 %v5112_v62, %v1961_v26  ;;  %v2090_v44 = vmul.f32 %v5118_v2, %v2057_v31  ;;  %v1454_v28 = vld [vmem:[%s4976_s19 + $0x30] sm:$0xff]  ;;  %v2449_v26 = vld [vmem:[%s5031_s6 + $0xa8] sm:$0xff]  ;;  %v2451_v31 = vld [vmem:[%s5031_s6 + $0xb8] sm:$0xff] }
 0x2bf   : > { %v1828_v40 = vadd.f32 %v1796_v13, %v1730_v24  ;;  %v1830_v47 = vadd.f32 %v1798_v14, %v1732_v27  ;;  %v2092_v49 = vmul.f32 %v5118_v2, %v2059_v33  ;;  %v2188_v52 = vmul.f32 %v5123_v5, %v2155_v34  ;;  %v1648_v13 = vld [vmem:[%s4987_s14 + $0x20] sm:$0xff]  ;;  %v1650_v14 = vld [vmem:[%s4987_s14 + $0x30] sm:$0xff] }
 0x2c0   : > { %v2498_v57 = vadd.f32 %v2466_v54, %v2400_v41  ;;  %v2500_v37 = vadd.f32 %v2468_v20, %v2402_v25  ;;  %v2190_v60 = vmul.f32 %v5123_v5, %v2157_v39  ;;  %v2286_v63 = vmul.f32 %v5134_v16, %v2253_v22 }
 0x2c1   : > { %v1926_v53 = vadd.f32 %v1894_v21, %v1828_v40  ;;  %v1928_v51 = vadd.f32 %v1896_v35, %v1830_v47  ;;  %v1321_v58 = vmul.f32 %v5049_v17, %v1288_v30  ;;  %v1323_v1 = vmul.f32 %v5049_v17, %v1290_v48  ;;  %v1746_v35 = vld [vmem:[%s4991_s0 + $0x20] sm:$0xff]  ;;  %v1846_v30 = vld [vmem:[%s4998_s24 + $0x30] sm:$0xff] }
 0x2c2   : > { %v2528_v7 = vpack.c.bf16 %v2500_v37, %v2498_v57  ;;  %v1387_v10 = vmul.f32 %v5057_v23, %v1354_v55  ;;  %v1389_v8 = vmul.f32 %v5057_v23, %v1356_v56  ;;  %v1485_v54 = vmul.f32 %v5066_v29, %v1452_v46  ;;  %v1944_v55 = vld [vmem:[%s5002_s18 + $0x30] sm:$0xff] }
 0x2c3   : > { %v2024_v9 = vadd.f32 %v1992_v36, %v1926_v53  ;;  %v2026_v11 = vadd.f32 %v1994_v42, %v1928_v51  ;;  %v2288_v12 = vmul.f32 %v5134_v16, %v2255_v61  ;;  %v1487_v3 = vmul.f32 %v5066_v29, %v1454_v28  ;;  %v1748_v36 = vld [vmem:[%s4991_s0 + $0x30] sm:$0xff]  ;;  %v1844_v42 = vld [vmem:[%s4998_s24 + $0x20] sm:$0xff] }
 0x2c4   : > { %2716 = vmatprep.mubr.bf16.mxu0 %v2528_v7  ;;  %v1419_v15 = vadd.f32 %v1387_v10, %v1321_v58  ;;  %v1421_v18 = vadd.f32 %v1389_v8, %v1323_v1  ;;  %v1583_v20 = vmul.f32 %v5073_v32, %v1550_v4  ;;  %v1585_v21 = vmul.f32 %v5073_v32, %v1552_v6  ;;  %v2040_v61 = vld [vmem:[%s5009_s2 + $0x20] sm:$0xff]  ;;  %v2042_v28 = vld [vmem:[%s5009_s2 + $0x30] sm:$0xff] }
 0x2c5   : > { %v2122_v33 = vadd.f32 %v2090_v44, %v2024_v9  ;;  %v2124_v34 = vadd.f32 %v2092_v49, %v2026_v11  ;;  %v2384_v24 = vmul.f32 %v5138_v19, %v2351_v59  ;;  %v2386_v27 = vmul.f32 %v5138_v19, %v2353_v0  ;;  %v1942_v49 = vld [vmem:[%s5002_s18 + $0x20] sm:$0xff]  ;;  %v2140_v1 = vld [vmem:[%s5013_s3 + $0x30] sm:$0xff] }
 0x2c6   : > { %v1517_v39 = vadd.f32 %v1485_v54, %v1419_v15  ;;  %v1519_v22 = vadd.f32 %v1487_v3, %v1421_v18  ;;  %v1681_v41 = vmul.f32 %v5087_v43, %v1648_v13  ;;  %v1683_v25 = vmul.f32 %v5087_v43, %v1650_v14  ;;  %v2138_v58 = vld [vmem:[%s5013_s3 + $0x20] sm:$0xff]  ;;  %v1306_v11 = vld [vmem:[%s4958_s30 + $0xb0] sm:$0xff] }
 0x2c7   : > { %v2220_v44 = vadd.f32 %v2188_v52, %v2122_v33  ;;  %v2222_v48 = vadd.f32 %v2190_v60, %v2124_v34  ;;  %v2482_v40 = vmul.f32 %v5152_v38, %v2449_v26  ;;  %v2484_v47 = vmul.f32 %v5152_v38, %v2451_v31  ;;  %v2236_v0 = vld [vmem:[%s5020_s4 + $0x20] sm:$0xff]  ;;  %v1372_v31 = vld [vmem:[%s4969_s13 + $0xb0] sm:$0xff] }
 0x2c8   : > { %v1615_v56 = vadd.f32 %v1583_v20, %v1517_v39  ;;  %v1617_v46 = vadd.f32 %v1585_v21, %v1519_v22  ;;  %v1779_v57 = vmul.f32 %v5091_v45, %v1746_v35  ;;  %v1781_v37 = vmul.f32 %v5091_v45, %v1748_v36  ;;  %v1468_v15 = vld [vmem:[%s4976_s19 + $0xa0] sm:$0xff]  ;;  %v1470_v18 = vld [vmem:[%s4976_s19 + $0xb0] sm:$0xff] }
 0x2c9   : > { %v2318_v52 = vadd.f32 %v2286_v63, %v2220_v44  ;;  %v2320_v60 = vadd.f32 %v2288_v12, %v2222_v48  ;;  %v1877_v53 = vmul.f32 %v5098_v50, %v1844_v42  ;;  %v1879_v51 = vmul.f32 %v5098_v50, %v1846_v30  ;;  %v1304_v63 = vld [vmem:[%s4958_s30 + $0xa0] sm:$0xff]  ;;  %v2238_v36 = vld [vmem:[%s5020_s4 + $0x30] sm:$0xff] }
 0x2ca   : > { %v1713_v4 = vadd.f32 %v1681_v41, %v1615_v56  ;;  %v1715_v6 = vadd.f32 %v1683_v25, %v1617_v46  ;;  %v1975_v7 = vmul.f32 %v5112_v62, %v1942_v49  ;;  %v1977_v59 = vmul.f32 %v5112_v62, %v1944_v55  ;;  %v1370_v12 = vld [vmem:[%s4969_s13 + $0xa0] sm:$0xff]  ;;  %v1568_v25 = vld [vmem:[%s4980_s1 + $0xb0] sm:$0xff] }
 0x2cb   : > { %v2416_v10 = vadd.f32 %v2384_v24, %v2318_v52  ;;  %v2418_v8 = vadd.f32 %v2386_v27, %v2320_v60  ;;  %v2073_v54 = vmul.f32 %v5118_v2, %v2040_v61  ;;  %v2075_v9 = vmul.f32 %v5118_v2, %v2042_v28  ;;  %v1566_v24 = vld [vmem:[%s4980_s1 + $0xa0] sm:$0xff]  ;;  %v2336_v55 = vld [vmem:[%s5024_s5 + $0x30] sm:$0xff] }
 0x2cc   : > { %v1811_v3 = vadd.f32 %v1779_v57, %v1713_v4  ;;  %v1813_v13 = vadd.f32 %v1781_v37, %v1715_v6  ;;  %v2171_v14 = vmul.f32 %v5123_v5, %v2138_v58  ;;  %v2173_v26 = vmul.f32 %v5123_v5, %v2140_v1  ;;  %v2334_v39 = vld [vmem:[%s5024_s5 + $0x20] sm:$0xff]  ;;  %v1666_v37 = vld [vmem:[%s4987_s14 + $0xb0] sm:$0xff] }
 0x2cd   : > { %v2514_v20 = vadd.f32 %v2482_v40, %v2416_v10  ;;  %v2516_v21 = vadd.f32 %v2484_v47, %v2418_v8  ;;  %v2269_v33 = vmul.f32 %v5134_v16, %v2236_v0  ;;  %v1337_v34 = vmul.f32 %v5049_v17, %v1304_v63  ;;  %v1664_v40 = vld [vmem:[%s4987_s14 + $0xa0] sm:$0xff]  ;;  %v2434_v1 = vld [vmem:[%s5031_s6 + $0x30] sm:$0xff] }
 0x2ce   : > { %v1909_v27 = vadd.f32 %v1877_v53, %v1811_v3  ;;  %v1911_v35 = vadd.f32 %v1879_v51, %v1813_v13  ;;  %v1339_v22 = vmul.f32 %v5049_v17, %v1306_v11  ;;  %v1403_v41 = vmul.f32 %v5057_v23, %v1370_v12  ;;  %v2432_v56 = vld [vmem:[%s5031_s6 + $0x20] sm:$0xff]  ;;  %v1862_v11 = vld [vmem:[%s4998_s24 + $0xb0] sm:$0xff] }
 0x2cf   : > { %v2536_v42 = vpack.c.bf16 %v2516_v21, %v2514_v20  ;;  %v1405_v30 = vmul.f32 %v5057_v23, %v1372_v31  ;;  %v1501_v44 = vmul.f32 %v5066_v29, %v1468_v15  ;;  %v1503_v48 = vmul.f32 %v5066_v29, %v1470_v18  ;;  %v1762_v53 = vld [vmem:[%s4991_s0 + $0xa0] sm:$0xff]  ;;  %v1960_v31 = vld [vmem:[%s5002_s18 + $0xb0] sm:$0xff] }
 0x2d0   : > { %v2007_v47 = vadd.f32 %v1975_v7, %v1909_v27  ;;  %v2009_v49 = vadd.f32 %v1977_v59, %v1911_v35  ;;  %v1435_v46 = vadd.f32 %v1403_v41, %v1337_v34  ;;  %v1599_v57 = vmul.f32 %v5073_v32, %v1566_v24  ;;  %v1764_v7 = vld [vmem:[%s4991_s0 + $0xb0] sm:$0xff]  ;;  %v1860_v59 = vld [vmem:[%s4998_s24 + $0xa0] sm:$0xff] }
 0x2d1   : > { %2748 = vmatprep.mubr.bf16.mxu1 %v2536_v42  ;;  %v2271_v61 = vmul.f32 %v5134_v16, %v2238_v36  ;;  %v2367_v28 = vmul.f32 %v5138_v19, %v2334_v39  ;;  %v1437_v52 = vadd.f32 %v1405_v30, %v1339_v22  ;;  %v1601_v60 = vmul.f32 %v5073_v32, %v1568_v25  ;;  %v1958_v13 = vld [vmem:[%s5002_s18 + $0xa0] sm:$0xff]  ;;  %v2058_v24 = vld [vmem:[%s5009_s2 + $0xb0] sm:$0xff] }
 0x2d2   : > { %v2105_v51 = vadd.f32 %v2073_v54, %v2007_v47  ;;  %v2107_v58 = vadd.f32 %v2075_v9, %v2009_v49  ;;  %v1533_v4 = vadd.f32 %v1501_v44, %v1435_v46  ;;  %v1697_v6 = vmul.f32 %v5087_v43, %v1664_v40  ;;  %v2056_v15 = vld [vmem:[%s5009_s2 + $0xa0] sm:$0xff]  ;;  %v2156_v39 = vld [vmem:[%s5013_s3 + $0xb0] sm:$0xff]  ;;  %v1295_v49 = vld [vmem:[%s4958_s30 + $0x58] sm:$0xff] }
 0x2d3   : > { %v2369_v0 = vmul.f32 %v5138_v19, %v2336_v55  ;;  %v2465_v63 = vmul.f32 %v5152_v38, %v2432_v56  ;;  %v1535_v10 = vadd.f32 %v1503_v48, %v1437_v52  ;;  %v1699_v8 = vmul.f32 %v5087_v43, %v1666_v37  ;;  %v2154_v36 = vld [vmem:[%s5013_s3 + $0xa0] sm:$0xff]  ;;  %v1359_v55 = vld [vmem:[%s4969_s13 + $0x48] sm:$0xff]  ;;  %v1361_v56 = vld [vmem:[%s4969_s13 + $0x58] sm:$0xff] }
 0x2d4   : > { %v2203_v54 = vadd.f32 %v2171_v14, %v2105_v51  ;;  %v2205_v9 = vadd.f32 %v2173_v26, %v2107_v58  ;;  %v1631_v12 = vadd.f32 %v1599_v57, %v1533_v4  ;;  %v1795_v3 = vmul.f32 %v5091_v45, %v1762_v53  ;;  %v2252_v22 = vld [vmem:[%s5020_s4 + $0xa0] sm:$0xff]  ;;  %v1457_v52 = vld [vmem:[%s4976_s19 + $0x48] sm:$0xff] }
 0x2d5   : > { %v2467_v18 = vmul.f32 %v5152_v38, %v2434_v1  ;;  %v1633_v20 = vadd.f32 %v1601_v60, %v1535_v10  ;;  %v1797_v21 = vmul.f32 %v5091_v45, %v1764_v7  ;;  %v1893_v34 = vmul.f32 %v5098_v50, %v1860_v59  ;;  %v1555_v1 = vld [vmem:[%s4980_s1 + $0x48] sm:$0xff]  ;;  %v1557_v10 = vld [vmem:[%s4980_s1 + $0x58] sm:$0xff] }
 0x2d6   : > { %v2301_v14 = vadd.f32 %v2269_v33, %v2203_v54  ;;  %v2303_v26 = vadd.f32 %v2271_v61, %v2205_v9  ;;  %v1729_v27 = vadd.f32 %v1697_v6, %v1631_v12  ;;  %v1895_v35 = vmul.f32 %v5098_v50, %v1862_v11  ;;  %v1293_v33 = vld [vmem:[%s4958_s30 + $0x48] sm:$0xff]  ;;  %v2254_v6 = vld [vmem:[%s5020_s4 + $0xb0] sm:$0xff]  ;;  %v1655_v12 = vld [vmem:[%s4987_s14 + $0x58] sm:$0xff] }
 0x2d7   : > { %v1731_v41 = vadd.f32 %v1699_v8, %v1633_v20  ;;  %v1991_v25 = vmul.f32 %v5112_v62, %v1958_v13  ;;  %v1993_v42 = vmul.f32 %v5112_v62, %v1960_v31  ;;  %v2089_v30 = vmul.f32 %v5118_v2, %v2056_v15  ;;  %v1653_v8 = vld [vmem:[%s4987_s14 + $0x48] sm:$0xff]  ;;  %v2350_v13 = vld [vmem:[%s5024_s5 + $0xa0] sm:$0xff]  ;;  %v2352_v31 = vld [vmem:[%s5024_s5 + $0xb0] sm:$0xff] }
 0x2d8   : > { %v2399_v44 = vadd.f32 %v2367_v28, %v2301_v14  ;;  %v2401_v48 = vadd.f32 %v2369_v0, %v2303_v26  ;;  %v1827_v40 = vadd.f32 %v1795_v3, %v1729_v27  ;;  %v2091_v47 = vmul.f32 %v5118_v2, %v2058_v24  ;;  %v1459_v28 = vld [vmem:[%s4976_s19 + $0x58] sm:$0xff] }
 0x2d9   : > { %v1829_v46 = vadd.f32 %v1797_v21, %v1731_v41  ;;  %v2187_v57 = vmul.f32 %v5123_v5, %v2154_v36  ;;  %v2189_v37 = vmul.f32 %v5123_v5, %v2156_v39  ;;  %v2285_v61 = vmul.f32 %v5134_v16, %v2252_v22  ;;  %v1751_v21 = vld [vmem:[%s4991_s0 + $0x48] sm:$0xff]  ;;  %v1753_v27 = vld [vmem:[%s4991_s0 + $0x58] sm:$0xff]  ;;  %v2448_v36 = vld [vmem:[%s5031_s6 + $0xa0] sm:$0xff] }
 0x2da   : > { %v2497_v60 = vadd.f32 %v2465_v63, %v2399_v44  ;;  %v2499_v53 = vadd.f32 %v2467_v18, %v2401_v48  ;;  %v1925_v51 = vadd.f32 %v1893_v34, %v1827_v40  ;;  %v1326_v58 = vmul.f32 %v5049_v17, %v1293_v33  ;;  %v2450_v39 = vld [vmem:[%s5031_s6 + $0xb0] sm:$0xff]  ;;  %v1851_v40 = vld [vmem:[%s4998_s24 + $0x58] sm:$0xff] }
 0x2db   : > { %v1927_v4 = vadd.f32 %v1895_v35, %v1829_v46  ;;  %v1328_v7 = vmul.f32 %v5049_v17, %v1295_v49  ;;  %v1392_v59 = vmul.f32 %v5057_v23, %v1359_v55  ;;  %v1394_v0 = vmul.f32 %v5057_v23, %v1361_v56  ;;  %v1947_v46 = vld [vmem:[%s5002_s18 + $0x48] sm:$0xff] }
 0x2dc   : > { %v2527_v63 = vpack.c.bf16 %v2499_v53, %v2497_v60  ;;  %v2023_v11 = vadd.f32 %v1991_v25, %v1925_v51  ;;  %v1490_v54 = vmul.f32 %v5066_v29, %v1457_v52  ;;  %v1492_v9 = vmul.f32 %v5066_v29, %v1459_v28  ;;  %v1949_v52 = vld [vmem:[%s5002_s18 + $0x58] sm:$0xff]  ;;  %v2045_v28 = vld [vmem:[%s5009_s2 + $0x48] sm:$0xff] }
 0x2dd   : > { %v2025_v3 = vadd.f32 %v1993_v42, %v1927_v4  ;;  %v1424_v15 = vadd.f32 %v1392_v59, %v1326_v58  ;;  %v1426_v18 = vadd.f32 %v1394_v0, %v1328_v7  ;;  %v1588_v20 = vmul.f32 %v5073_v32, %v1555_v1  ;;  %v1849_v42 = vld [vmem:[%s4998_s24 + $0x48] sm:$0xff]  ;;  %v2145_v59 = vld [vmem:[%s5013_s3 + $0x58] sm:$0xff] }
 0x2de   : > { %2717 = vmatmul.mubr.bf16.gmra.mxu0 %v2527_v63  ;;  %v2121_v34 = vadd.f32 %v2089_v30, %v2023_v11  ;;  %v2287_v24 = vmul.f32 %v5134_v16, %v2254_v6  ;;  %v1590_v14 = vmul.f32 %v5073_v32, %v1557_v10  ;;  %v1686_v26 = vmul.f32 %v5087_v43, %v1653_v8  ;;  %v2143_v7 = vld [vmem:[%s5013_s3 + $0x48] sm:$0xff] }
 0x2df   : > { %v2123_v35 = vadd.f32 %v2091_v47, %v2025_v3  ;;  %v1522_v22 = vadd.f32 %v1490_v54, %v1424_v15  ;;  %v1524_v41 = vadd.f32 %v1492_v9, %v1426_v18  ;;  %v1688_v25 = vmul.f32 %v5087_v43, %v1655_v12  ;;  %v1309_v11 = vld [vmem:[%s4958_s30 + $0xc8] sm:$0xff]  ;;  %v1311_v54 = vld [vmem:[%s4958_s30 + $0xd8] sm:$0xff] }
 0x2e0   : > { %v2219_v30 = vadd.f32 %v2187_v57, %v2121_v34  ;;  %v2383_v33 = vmul.f32 %v5138_v19, %v2350_v13  ;;  %v2385_v44 = vmul.f32 %v5138_v19, %v2352_v31  ;;  %v1784_v48 = vmul.f32 %v5091_v45, %v1751_v21  ;;  %v1375_v31 = vld [vmem:[%s4969_s13 + $0xc8] sm:$0xff]  ;;  %v1377_v15 = vld [vmem:[%s4969_s13 + $0xd8] sm:$0xff] }
 0x2e1   : > { %v2221_v47 = vadd.f32 %v2189_v37, %v2123_v35  ;;  %v1620_v49 = vadd.f32 %v1588_v20, %v1522_v22  ;;  %v1622_v55 = vadd.f32 %v1590_v14, %v1524_v41  ;;  %v1786_v56 = vmul.f32 %v5091_v45, %v1753_v27  ;;  %v2047_v37 = vld [vmem:[%s5009_s2 + $0x58] sm:$0xff]  ;;  %v1473_v18 = vld [vmem:[%s4976_s19 + $0xc8] sm:$0xff] }
 0x2e2   : > { %v2317_v57 = vadd.f32 %v2285_v61, %v2219_v30  ;;  %v2481_v60 = vmul.f32 %v5152_v38, %v2448_v36  ;;  %v2483_v53 = vmul.f32 %v5152_v38, %v2450_v39  ;;  %v1882_v51 = vmul.f32 %v5098_v50, %v1849_v42  ;;  %v2241_v61 = vld [vmem:[%s5020_s4 + $0x48] sm:$0xff]  ;;  %v1475_v14 = vld [vmem:[%s4976_s19 + $0xd8] sm:$0xff] }
 0x2e3   : > { %v2319_v58 = vadd.f32 %v2287_v24, %v2221_v47  ;;  %v1718_v1 = vadd.f32 %v1686_v26, %v1620_v49  ;;  %v1720_v4 = vadd.f32 %v1688_v25, %v1622_v55  ;;  %v1884_v6 = vmul.f32 %v5098_v50, %v1851_v40  ;;  %v1571_v39 = vld [vmem:[%s4980_s1 + $0xc8] sm:$0xff]  ;;  %v1573_v22 = vld [vmem:[%s4980_s1 + $0xd8] sm:$0xff] }
 0x2e4   : > { %v2415_v0 = vadd.f32 %v2383_v33, %v2317_v57  ;;  %v1980_v10 = vmul.f32 %v5112_v62, %v1947_v46  ;;  %v1982_v8 = vmul.f32 %v5112_v62, %v1949_v52  ;;  %v2078_v63 = vmul.f32 %v5118_v2, %v2045_v28  ;;  %v2243_v41 = vld [vmem:[%s5020_s4 + $0x58] sm:$0xff]  ;;  %v2339_v25 = vld [vmem:[%s5024_s5 + $0x48] sm:$0xff] }
 0x2e5   : > { %v2417_v9 = vadd.f32 %v2385_v44, %v2319_v58  ;;  %v1816_v12 = vadd.f32 %v1784_v48, %v1718_v1  ;;  %v1818_v3 = vadd.f32 %v1786_v56, %v1720_v4  ;;  %v2080_v13 = vmul.f32 %v5118_v2, %v2047_v37  ;;  %v1669_v55 = vld [vmem:[%s4987_s14 + $0xc8] sm:$0xff]  ;;  %v1671_v56 = vld [vmem:[%s4987_s14 + $0xd8] sm:$0xff] }
 0x2e6   : > { %v2513_v20 = vadd.f32 %v2481_v60, %v2415_v0  ;;  %v2176_v21 = vmul.f32 %v5123_v5, %v2143_v7  ;;  %v2178_v34 = vmul.f32 %v5123_v5, %v2145_v59  ;;  %v2274_v24 = vmul.f32 %v5134_v16, %v2241_v61  ;;  %v2341_v46 = vld [vmem:[%s5024_s5 + $0x58] sm:$0xff]  ;;  %v2437_v52 = vld [vmem:[%s5031_s6 + $0x48] sm:$0xff] }
 0x2e7   : > { %v2515_v26 = vadd.f32 %v2483_v53, %v2417_v9  ;;  %v1914_v27 = vadd.f32 %v1882_v51, %v1816_v12  ;;  %v1916_v35 = vadd.f32 %v1884_v6, %v1818_v3  ;;  %v1342_v36 = vmul.f32 %v5049_v17, %v1309_v11  ;;  %v1767_v4 = vld [vmem:[%s4991_s0 + $0xc8] sm:$0xff]  ;;  %v1769_v6 = vld [vmem:[%s4991_s0 + $0xd8] sm:$0xff] }
 0x2e8   : > { %v1344_v42 = vmul.f32 %v5049_v17, %v1311_v54  ;;  %v1408_v30 = vmul.f32 %v5057_v23, %v1375_v31  ;;  %v1410_v33 = vmul.f32 %v5057_v23, %v1377_v15  ;;  %v1506_v44 = vmul.f32 %v5066_v29, %v1473_v18  ;;  %v2439_v7 = vld [vmem:[%s5031_s6 + $0x58] sm:$0xff]  ;;  %v1963_v3 = vld [vmem:[%s5002_s18 + $0xc8] sm:$0xff] }
 0x2e9   : > { %v2535_v48 = vpack.c.bf16 %v2515_v26, %v2513_v20  ;;  %v2012_v40 = vadd.f32 %v1980_v10, %v1914_v27  ;;  %v2014_v47 = vadd.f32 %v1982_v8, %v1916_v35  ;;  %v1508_v49 = vmul.f32 %v5066_v29, %v1475_v14  ;;  %v1865_v8 = vld [vmem:[%s4998_s24 + $0xc8] sm:$0xff]  ;;  %v1867_v12 = vld [vmem:[%s4998_s24 + $0xd8] sm:$0xff] }
 0x2ea   : > { %v1440_v28 = vadd.f32 %v1408_v30, %v1342_v36  ;;  %v1442_v57 = vadd.f32 %v1410_v33, %v1344_v42  ;;  %v1604_v60 = vmul.f32 %v5073_v32, %v1571_v39  ;;  %v1606_v53 = vmul.f32 %v5073_v32, %v1573_v22  ;;  %v1965_v20 = vld [vmem:[%s5002_s18 + $0xd8] sm:$0xff]  ;;  %v2061_v14 = vld [vmem:[%s5009_s2 + $0xc8] sm:$0xff] }
 0x2eb   : > { %2749 = vmatmul.mubr.bf16.gmra.mxu1 %v2535_v48  ;;  %v2110_v51 = vadd.f32 %v2078_v63, %v2012_v40  ;;  %v2112_v37 = vadd.f32 %v2080_v13, %v2014_v47  ;;  %v2276_v58 = vmul.f32 %v5134_v16, %v2243_v41  ;;  %v2372_v1 = vmul.f32 %v5138_v19, %v2339_v25  ;;  %v2063_v35 = vld [vmem:[%s5009_s2 + $0xd8] sm:$0xff]  ;;  %v2159_v36 = vld [vmem:[%s5013_s3 + $0xc8] sm:$0xff]  ;;  %v1292_v40 = vld [vmem:[%s4958_s30 + $0x40] sm:$0xff] }
 0x2ec   : > { %v1538_v59 = vadd.f32 %v1506_v44, %v1440_v28  ;;  %v1540_v61 = vadd.f32 %v1508_v49, %v1442_v57  ;;  %v1702_v0 = vmul.f32 %v5087_v43, %v1669_v55  ;;  %v1704_v10 = vmul.f32 %v5087_v43, %v1671_v56  ;;  %v2161_v42 = vld [vmem:[%s5013_s3 + $0xd8] sm:$0xff]  ;;  %v1294_v47 = vld [vmem:[%s4958_s30 + $0x50] sm:$0xff]  ;;  %v1456_v57 = vld [vmem:[%s4976_s19 + $0x40] sm:$0xff] }
 0x2ed   : > { %v2208_v63 = vadd.f32 %v2176_v21, %v2110_v51  ;;  %v2210_v11 = vadd.f32 %v2178_v34, %v2112_v37  ;;  %v2374_v54 = vmul.f32 %v5138_v19, %v2341_v46  ;;  %v2470_v9 = vmul.f32 %v5152_v38, %v2437_v52  ;;  %v1358_v52 = vld [vmem:[%s4969_s13 + $0x40] sm:$0xff]  ;;  %v1360_v28 = vld [vmem:[%s4969_s13 + $0x50] sm:$0xff]  ;;  %v2259_v37 = vld [vmem:[%s5020_s4 + $0xd8] sm:$0xff] }
 0x2ee   : > { %v1636_v13 = vadd.f32 %v1604_v60, %v1538_v59  ;;  %v1638_v31 = vadd.f32 %v1606_v53, %v1540_v61  ;;  %v1800_v15 = vmul.f32 %v5091_v45, %v1767_v4  ;;  %v1802_v18 = vmul.f32 %v5091_v45, %v1769_v6  ;;  %v1554_v61 = vld [vmem:[%s4980_s1 + $0x40] sm:$0xff] }
 0x2ef   : > { %v2306_v21 = vadd.f32 %v2274_v24, %v2208_v63  ;;  %v2308_v34 = vadd.f32 %v2276_v58, %v2210_v11  ;;  %v2472_v26 = vmul.f32 %v5152_v38, %v2439_v7  ;;  %v1898_v27 = vmul.f32 %v5098_v50, %v1865_v8  ;;  %v2257_v24 = vld [vmem:[%s5020_s4 + $0xc8] sm:$0xff]  ;;  %v2357_v63 = vld [vmem:[%s5024_s5 + $0xd8] sm:$0xff] }
 0x2f0   : > { %v1734_v39 = vadd.f32 %v1702_v0, %v1636_v13  ;;  %v1736_v22 = vadd.f32 %v1704_v10, %v1638_v31  ;;  %v1900_v41 = vmul.f32 %v5098_v50, %v1867_v12  ;;  %v1996_v25 = vmul.f32 %v5112_v62, %v1963_v3  ;;  %v1556_v0 = vld [vmem:[%s4980_s1 + $0x50] sm:$0xff]  ;;  %v2355_v8 = vld [vmem:[%s5024_s5 + $0xc8] sm:$0xff] }
 0x2f1   : > { %v2404_v30 = vadd.f32 %v2372_v1, %v2306_v21  ;;  %v2406_v33 = vadd.f32 %v2374_v54, %v2308_v34  ;;  %v1998_v44 = vmul.f32 %v5112_v62, %v1965_v20  ;;  %v2094_v48 = vmul.f32 %v5118_v2, %v2061_v14  ;;  %v1458_v1 = vld [vmem:[%s4976_s19 + $0x50] sm:$0xff]  ;;  %v2453_v20 = vld [vmem:[%s5031_s6 + $0xc8] sm:$0xff]  ;;  %v2455_v14 = vld [vmem:[%s5031_s6 + $0xd8] sm:$0xff] }
 0x2f2   : > { %v1832_v49 = vadd.f32 %v1800_v15, %v1734_v39  ;;  %v1834_v55 = vadd.f32 %v1802_v18, %v1736_v22  ;;  %v2096_v56 = vmul.f32 %v5118_v2, %v2063_v35  ;;  %v2192_v46 = vmul.f32 %v5123_v5, %v2159_v36  ;;  %v1652_v15 = vld [vmem:[%s4987_s14 + $0x40] sm:$0xff]  ;;  %v1654_v18 = vld [vmem:[%s4987_s14 + $0x50] sm:$0xff] }
 0x2f3   : > { %v2502_v60 = vadd.f32 %v2470_v9, %v2404_v30  ;;  %v2504_v53 = vadd.f32 %v2472_v26, %v2406_v33  ;;  %v2194_v51 = vmul.f32 %v5123_v5, %v2161_v42  ;;  %v2290_v58 = vmul.f32 %v5134_v16, %v2257_v24 }
 0x2f4   : > { %v1930_v4 = vadd.f32 %v1898_v27, %v1832_v49  ;;  %v1932_v6 = vadd.f32 %v1900_v41, %v1834_v55  ;;  %v1325_v7 = vmul.f32 %v5049_v17, %v1292_v40  ;;  %v1327_v59 = vmul.f32 %v5049_v17, %v1294_v47  ;;  %v1750_v41 = vld [vmem:[%s4991_s0 + $0x40] sm:$0xff]  ;;  %v1850_v40 = vld [vmem:[%s4998_s24 + $0x50] sm:$0xff] }
 0x2f5   : > { %v2530_v10 = vpack.c.bf16 %v2504_v53, %v2502_v60  ;;  %v1391_v11 = vmul.f32 %v5057_v23, %v1358_v52  ;;  %v1393_v54 = vmul.f32 %v5057_v23, %v1360_v28  ;;  %v1489_v9 = vmul.f32 %v5066_v29, %v1456_v57  ;;  %v1948_v52 = vld [vmem:[%s5002_s18 + $0x50] sm:$0xff] }
 0x2f6   : > { %v2028_v12 = vadd.f32 %v1996_v25, %v1930_v4  ;;  %v2030_v3 = vadd.f32 %v1998_v44, %v1932_v6  ;;  %v2292_v13 = vmul.f32 %v5134_v16, %v2259_v37  ;;  %v1491_v31 = vmul.f32 %v5066_v29, %v1458_v1  ;;  %v1752_v25 = vld [vmem:[%s4991_s0 + $0x50] sm:$0xff]  ;;  %v1848_v44 = vld [vmem:[%s4998_s24 + $0x40] sm:$0xff] }
 0x2f7   : > { %2724 = vmatprep.mubr.bf16.mxu0 %v2530_v10  ;;  %v1423_v21 = vadd.f32 %v1391_v11, %v1325_v7  ;;  %v1425_v34 = vadd.f32 %v1393_v54, %v1327_v59  ;;  %v1587_v26 = vmul.f32 %v5073_v32, %v1554_v61  ;;  %v1589_v27 = vmul.f32 %v5073_v32, %v1556_v0  ;;  %v2044_v37 = vld [vmem:[%s5009_s2 + $0x40] sm:$0xff]  ;;  %v2046_v1 = vld [vmem:[%s5009_s2 + $0x50] sm:$0xff] }
 0x2f8   : > { %v2126_v35 = vadd.f32 %v2094_v48, %v2028_v12  ;;  %v2128_v36 = vadd.f32 %v2096_v56, %v2030_v3  ;;  %v2388_v39 = vmul.f32 %v5138_v19, %v2355_v8  ;;  %v2390_v22 = vmul.f32 %v5138_v19, %v2357_v63  ;;  %v1946_v56 = vld [vmem:[%s5002_s18 + $0x40] sm:$0xff]  ;;  %v2144_v59 = vld [vmem:[%s5013_s3 + $0x50] sm:$0xff] }
 0x2f9   : > { %v1521_v42 = vadd.f32 %v1489_v9, %v1423_v21  ;;  %v1523_v24 = vadd.f32 %v1491_v31, %v1425_v34  ;;  %v1685_v30 = vmul.f32 %v5087_v43, %v1652_v15  ;;  %v1687_v33 = vmul.f32 %v5087_v43, %v1654_v18  ;;  %v2142_v7 = vld [vmem:[%s5013_s3 + $0x40] sm:$0xff]  ;;  %v1310_v3 = vld [vmem:[%s4958_s30 + $0xd0] sm:$0xff] }
 0x2fa   : > { %v2224_v48 = vadd.f32 %v2192_v46, %v2126_v35  ;;  %v2226_v47 = vadd.f32 %v2194_v51, %v2128_v36  ;;  %v2486_v49 = vmul.f32 %v5152_v38, %v2453_v20  ;;  %v2488_v55 = vmul.f32 %v5152_v38, %v2455_v14  ;;  %v2240_v63 = vld [vmem:[%s5020_s4 + $0x40] sm:$0xff]  ;;  %v1376_v14 = vld [vmem:[%s4969_s13 + $0xd0] sm:$0xff] }
 0x2fb   : > { %v1619_v28 = vadd.f32 %v1587_v26, %v1521_v42  ;;  %v1621_v57 = vadd.f32 %v1589_v27, %v1523_v24  ;;  %v1783_v60 = vmul.f32 %v5091_v45, %v1750_v41  ;;  %v1785_v53 = vmul.f32 %v5091_v45, %v1752_v25  ;;  %v1472_v21 = vld [vmem:[%s4976_s19 + $0xc0] sm:$0xff]  ;;  %v1474_v34 = vld [vmem:[%s4976_s19 + $0xd0] sm:$0xff] }
 0x2fc   : > { %v2322_v46 = vadd.f32 %v2290_v58, %v2224_v48  ;;  %v2324_v51 = vadd.f32 %v2292_v13, %v2226_v47  ;;  %v1881_v4 = vmul.f32 %v5098_v50, %v1848_v44  ;;  %v1883_v6 = vmul.f32 %v5098_v50, %v1850_v40  ;;  %v1308_v58 = vld [vmem:[%s4958_s30 + $0xc0] sm:$0xff]  ;;  %v2242_v25 = vld [vmem:[%s5020_s4 + $0x50] sm:$0xff] }
 0x2fd   : > { %v1717_v61 = vadd.f32 %v1685_v30, %v1619_v28  ;;  %v1719_v0 = vadd.f32 %v1687_v33, %v1621_v57  ;;  %v1979_v10 = vmul.f32 %v5112_v62, %v1946_v56  ;;  %v1981_v8 = vmul.f32 %v5112_v62, %v1948_v52  ;;  %v1374_v13 = vld [vmem:[%s4969_s13 + $0xc0] sm:$0xff]  ;;  %v1572_v33 = vld [vmem:[%s4980_s1 + $0xd0] sm:$0xff] }
 0x2fe   : > { %v2420_v11 = vadd.f32 %v2388_v39, %v2322_v46  ;;  %v2422_v54 = vadd.f32 %v2390_v22, %v2324_v51  ;;  %v2077_v9 = vmul.f32 %v5118_v2, %v2044_v37  ;;  %v2079_v12 = vmul.f32 %v5118_v2, %v2046_v1  ;;  %v1570_v39 = vld [vmem:[%s4980_s1 + $0xc0] sm:$0xff]  ;;  %v2340_v52 = vld [vmem:[%s5024_s5 + $0x50] sm:$0xff] }
 0x2ff   : > { %v1815_v31 = vadd.f32 %v1783_v60, %v1717_v61  ;;  %v1817_v15 = vadd.f32 %v1785_v53, %v1719_v0  ;;  %v2175_v18 = vmul.f32 %v5123_v5, %v2142_v7  ;;  %v2177_v20 = vmul.f32 %v5123_v5, %v2144_v59  ;;  %v2338_v42 = vld [vmem:[%s5024_s5 + $0x40] sm:$0xff]  ;;  %v1670_v53 = vld [vmem:[%s4987_s14 + $0xd0] sm:$0xff] }
 0x300   : > { %v2518_v26 = vadd.f32 %v2486_v49, %v2420_v11  ;;  %v2520_v27 = vadd.f32 %v2488_v55, %v2422_v54  ;;  %v2273_v35 = vmul.f32 %v5134_v16, %v2240_v63  ;;  %v1341_v36 = vmul.f32 %v5049_v17, %v1308_v58  ;;  %v1668_v49 = vld [vmem:[%s4987_s14 + $0xc0] sm:$0xff]  ;;  %v2438_v59 = vld [vmem:[%s5031_s6 + $0x50] sm:$0xff] }
 0x301   : > { %v1913_v22 = vadd.f32 %v1881_v4, %v1815_v31  ;;  %v1915_v41 = vadd.f32 %v1883_v6, %v1817_v15  ;;  %v1343_v24 = vmul.f32 %v5049_v17, %v1310_v3  ;;  %v1407_v30 = vmul.f32 %v5057_v23, %v1374_v13  ;;  %v2436_v28 = vld [vmem:[%s5031_s6 + $0x40] sm:$0xff]  ;;  %v1866_v3 = vld [vmem:[%s4998_s24 + $0xd0] sm:$0xff] }
 0x302   : > { %v2538_v44 = vpack.c.bf16 %v2520_v27, %v2518_v26  ;;  %v1409_v40 = vmul.f32 %v5057_v23, %v1376_v14  ;;  %v1505_v48 = vmul.f32 %v5066_v29, %v1472_v21  ;;  %v1507_v47 = vmul.f32 %v5066_v29, %v1474_v34  ;;  %v1766_v4 = vld [vmem:[%s4991_s0 + $0xc0] sm:$0xff]  ;;  %v1964_v14 = vld [vmem:[%s5002_s18 + $0xd0] sm:$0xff] }
 0x303   : > { %v2011_v55 = vadd.f32 %v1979_v10, %v1913_v22  ;;  %v2013_v56 = vadd.f32 %v1981_v8, %v1915_v41  ;;  %v1439_v57 = vadd.f32 %v1407_v30, %v1341_v36  ;;  %v1603_v60 = vmul.f32 %v5073_v32, %v1570_v39  ;;  %v1768_v10 = vld [vmem:[%s4991_s0 + $0xd0] sm:$0xff]  ;;  %v1864_v8 = vld [vmem:[%s4998_s24 + $0xc0] sm:$0xff] }
 0x304   : > { %2756 = vmatprep.mubr.bf16.mxu1 %v2538_v44  ;;  %v2275_v37 = vmul.f32 %v5134_v16, %v2242_v25  ;;  %v2371_v1 = vmul.f32 %v5138_v19, %v2338_v42  ;;  %v1441_v46 = vadd.f32 %v1409_v40, %v1343_v24  ;;  %v1605_v51 = vmul.f32 %v5073_v32, %v1572_v33  ;;  %v1962_v15 = vld [vmem:[%s5002_s18 + $0xc0] sm:$0xff]  ;;  %v2062_v39 = vld [vmem:[%s5009_s2 + $0xd0] sm:$0xff] }
 0x305   : > { %v2109_v6 = vadd.f32 %v2077_v9, %v2011_v55  ;;  %v2111_v7 = vadd.f32 %v2079_v12, %v2013_v56  ;;  %v1537_v61 = vadd.f32 %v1505_v48, %v1439_v57  ;;  %v1701_v0 = vmul.f32 %v5087_v43, %v1668_v49  ;;  %v2060_v21 = vld [vmem:[%s5009_s2 + $0xc0] sm:$0xff]  ;;  %v2160_v42 = vld [vmem:[%s5013_s3 + $0xd0] sm:$0xff]  ;;  %v1299_v56 = vld [vmem:[%s4958_s30 + $0x78] sm:$0xff] }
 0x306   : > { %v2373_v63 = vmul.f32 %v5138_v19, %v2340_v52  ;;  %v2469_v58 = vmul.f32 %v5152_v38, %v2436_v28  ;;  %v1539_v11 = vadd.f32 %v1507_v47, %v1441_v46  ;;  %v1703_v54 = vmul.f32 %v5087_v43, %v1670_v53  ;;  %v2158_v25 = vld [vmem:[%s5013_s3 + $0xc0] sm:$0xff]  ;;  %v1363_v52 = vld [vmem:[%s4969_s13 + $0x68] sm:$0xff]  ;;  %v1365_v28 = vld [vmem:[%s4969_s13 + $0x78] sm:$0xff] }
 0x307   : > { %v2207_v9 = vadd.f32 %v2175_v18, %v2109_v6  ;;  %v2209_v12 = vadd.f32 %v2177_v20, %v2111_v7  ;;  %v1635_v13 = vadd.f32 %v1603_v60, %v1537_v61  ;;  %v1799_v31 = vmul.f32 %v5091_v45, %v1766_v4  ;;  %v2256_v24 = vld [vmem:[%s5020_s4 + $0xc0] sm:$0xff]  ;;  %v1461_v46 = vld [vmem:[%s4976_s19 + $0x68] sm:$0xff] }
 0x308   : > { %v2471_v34 = vmul.f32 %v5152_v38, %v2438_v59  ;;  %v1637_v26 = vadd.f32 %v1605_v51, %v1539_v11  ;;  %v1801_v27 = vmul.f32 %v5091_v45, %v1768_v10  ;;  %v1897_v36 = vmul.f32 %v5098_v50, %v1864_v8  ;;  %v1559_v59 = vld [vmem:[%s4980_s1 + $0x68] sm:$0xff]  ;;  %v1561_v11 = vld [vmem:[%s4980_s1 + $0x78] sm:$0xff] }
 0x309   : > { %v2305_v18 = vadd.f32 %v2273_v35, %v2207_v9  ;;  %v2307_v20 = vadd.f32 %v2275_v37, %v2209_v12  ;;  %v1733_v22 = vadd.f32 %v1701_v0, %v1635_v13  ;;  %v1899_v41 = vmul.f32 %v5098_v50, %v1866_v3  ;;  %v1297_v35 = vld [vmem:[%s4958_s30 + $0x68] sm:$0xff]  ;;  %v2258_v0 = vld [vmem:[%s5020_s4 + $0xd0] sm:$0xff]  ;;  %v1659_v13 = vld [vmem:[%s4987_s14 + $0x78] sm:$0xff] }
 0x30a   : > { %v1735_v30 = vadd.f32 %v1703_v54, %v1637_v26  ;;  %v1995_v33 = vmul.f32 %v5112_v62, %v1962_v15  ;;  %v1997_v44 = vmul.f32 %v5112_v62, %v1964_v14  ;;  %v2093_v40 = vmul.f32 %v5118_v2, %v2060_v21  ;;  %v1657_v54 = vld [vmem:[%s4987_s14 + $0x68] sm:$0xff]  ;;  %v2354_v15 = vld [vmem:[%s5024_s5 + $0xc0] sm:$0xff]  ;;  %v2356_v14 = vld [vmem:[%s5024_s5 + $0xd0] sm:$0xff] }
 0x30b   : > { %v2403_v48 = vadd.f32 %v2371_v1, %v2305_v18  ;;  %v2405_v47 = vadd.f32 %v2373_v63, %v2307_v20  ;;  %v1831_v49 = vadd.f32 %v1799_v31, %v1733_v22  ;;  %v2095_v55 = vmul.f32 %v5118_v2, %v2062_v39  ;;  %v1463_v1 = vld [vmem:[%s4976_s19 + $0x78] sm:$0xff] }
 0x30c   : > { %v1833_v57 = vadd.f32 %v1801_v27, %v1735_v30  ;;  %v2191_v60 = vmul.f32 %v5123_v5, %v2158_v25  ;;  %v2193_v53 = vmul.f32 %v5123_v5, %v2160_v42  ;;  %v2289_v37 = vmul.f32 %v5134_v16, %v2256_v24  ;;  %v1755_v27 = vld [vmem:[%s4991_s0 + $0x68] sm:$0xff]  ;;  %v1757_v22 = vld [vmem:[%s4991_s0 + $0x78] sm:$0xff]  ;;  %v2452_v25 = vld [vmem:[%s5031_s6 + $0xc0] sm:$0xff] }
 0x30d   : > { %v2501_v51 = vadd.f32 %v2469_v58, %v2403_v48  ;;  %v2503_v4 = vadd.f32 %v2471_v34, %v2405_v47  ;;  %v1929_v6 = vadd.f32 %v1897_v36, %v1831_v49  ;;  %v1330_v7 = vmul.f32 %v5049_v17, %v1297_v35  ;;  %v2454_v42 = vld [vmem:[%s5031_s6 + $0xd0] sm:$0xff]  ;;  %v1855_v49 = vld [vmem:[%s4998_s24 + $0x78] sm:$0xff] }
 0x30e   : > { %v1931_v61 = vadd.f32 %v1899_v41, %v1833_v57  ;;  %v1332_v10 = vmul.f32 %v5049_v17, %v1299_v56  ;;  %v1396_v8 = vmul.f32 %v5057_v23, %v1363_v52  ;;  %v1398_v63 = vmul.f32 %v5057_v23, %v1365_v28  ;;  %v1951_v57 = vld [vmem:[%s5002_s18 + $0x68] sm:$0xff] }
 0x30f   : > { %v2529_v58 = vpack.c.bf16 %v2503_v4, %v2501_v51  ;;  %v2027_v3 = vadd.f32 %v1995_v33, %v1929_v6  ;;  %v1494_v9 = vmul.f32 %v5066_v29, %v1461_v46  ;;  %v1496_v12 = vmul.f32 %v5066_v29, %v1463_v1  ;;  %v1953_v46 = vld [vmem:[%s5002_s18 + $0x78] sm:$0xff]  ;;  %v2049_v6 = vld [vmem:[%s5009_s2 + $0x68] sm:$0xff] }
 0x310   : > { %v2029_v31 = vadd.f32 %v1997_v44, %v1931_v61  ;;  %v1428_v21 = vadd.f32 %v1396_v8, %v1330_v7  ;;  %v1430_v34 = vadd.f32 %v1398_v63, %v1332_v10  ;;  %v1592_v26 = vmul.f32 %v5073_v32, %v1559_v59  ;;  %v1853_v44 = vld [vmem:[%s4998_s24 + $0x68] sm:$0xff]  ;;  %v2149_v8 = vld [vmem:[%s5013_s3 + $0x78] sm:$0xff] }
 0x311   : > { %2725 = vmatmul.mubr.bf16.gmra.mxu0 %v2529_v58  ;;  %v2125_v36 = vadd.f32 %v2093_v40, %v2027_v3  ;;  %v2291_v39 = vmul.f32 %v5134_v16, %v2258_v0  ;;  %v1594_v18 = vmul.f32 %v5073_v32, %v1561_v11  ;;  %v1690_v20 = vmul.f32 %v5087_v43, %v1657_v54  ;;  %v2051_v0 = vld [vmem:[%s5009_s2 + $0x78] sm:$0xff]  ;;  %v2147_v10 = vld [vmem:[%s5013_s3 + $0x68] sm:$0xff] }
 0x312   : > { %v2127_v41 = vadd.f32 %v2095_v55, %v2029_v31  ;;  %v1526_v24 = vadd.f32 %v1494_v9, %v1428_v21  ;;  %v1528_v30 = vadd.f32 %v1496_v12, %v1430_v34  ;;  %v1692_v33 = vmul.f32 %v5087_v43, %v1659_v13  ;;  %v1313_v54 = vld [vmem:[%s4958_s30 + $0xe8] sm:$0xff]  ;;  %v1315_v58 = vld [vmem:[%s4958_s30 + $0xf8] sm:$0xff] }
 0x313   : > { %v2223_v40 = vadd.f32 %v2191_v60, %v2125_v36  ;;  %v2387_v35 = vmul.f32 %v5138_v19, %v2354_v15  ;;  %v2389_v48 = vmul.f32 %v5138_v19, %v2356_v14  ;;  %v1788_v47 = vmul.f32 %v5091_v45, %v1755_v27  ;;  %v1379_v31 = vld [vmem:[%s4969_s13 + $0xe8] sm:$0xff]  ;;  %v1381_v15 = vld [vmem:[%s4969_s13 + $0xf8] sm:$0xff] }
 0x314   : > { %v2225_v55 = vadd.f32 %v2193_v53, %v2127_v41  ;;  %v1624_v56 = vadd.f32 %v1592_v26, %v1526_v24  ;;  %v1626_v52 = vadd.f32 %v1594_v18, %v1528_v30  ;;  %v1790_v28 = vmul.f32 %v5091_v45, %v1757_v22  ;;  %v1477_v14 = vld [vmem:[%s4976_s19 + $0xe8] sm:$0xff]  ;;  %v1479_v36 = vld [vmem:[%s4976_s19 + $0xf8] sm:$0xff] }
 0x315   : > { %v2321_v1 = vadd.f32 %v2289_v37, %v2223_v40  ;;  %v2485_v60 = vmul.f32 %v5152_v38, %v2452_v25  ;;  %v2487_v51 = vmul.f32 %v5152_v38, %v2454_v42  ;;  %v1886_v4 = vmul.f32 %v5098_v50, %v1853_v44  ;;  %v1575_v41 = vld [vmem:[%s4980_s1 + $0xe8] sm:$0xff]  ;;  %v1577_v25 = vld [vmem:[%s4980_s1 + $0xf8] sm:$0xff] }
 0x316   : > { %v2323_v7 = vadd.f32 %v2291_v39, %v2225_v55  ;;  %v1722_v53 = vadd.f32 %v1690_v20, %v1624_v56  ;;  %v1724_v59 = vadd.f32 %v1692_v33, %v1626_v52  ;;  %v1888_v61 = vmul.f32 %v5098_v50, %v1855_v49  ;;  %v2245_v42 = vld [vmem:[%s5020_s4 + $0x68] sm:$0xff]  ;;  %v2247_v24 = vld [vmem:[%s5020_s4 + $0x78] sm:$0xff] }
 0x317   : > { %v2419_v37 = vadd.f32 %v2387_v35, %v2321_v1  ;;  %v1984_v63 = vmul.f32 %v5112_v62, %v1951_v57  ;;  %v1986_v11 = vmul.f32 %v5112_v62, %v1953_v46  ;;  %v2082_v13 = vmul.f32 %v5118_v2, %v2049_v6  ;;  %v1673_v55 = vld [vmem:[%s4987_s14 + $0xe8] sm:$0xff]  ;;  %v1675_v56 = vld [vmem:[%s4987_s14 + $0xf8] sm:$0xff] }
 0x318   : > { %v2421_v3 = vadd.f32 %v2389_v48, %v2323_v7  ;;  %v1820_v9 = vadd.f32 %v1788_v47, %v1722_v53  ;;  %v1822_v12 = vadd.f32 %v1790_v28, %v1724_v59  ;;  %v2084_v34 = vmul.f32 %v5118_v2, %v2051_v0  ;;  %v2343_v52 = vld [vmem:[%s5024_s5 + $0x68] sm:$0xff]  ;;  %v2345_v28 = vld [vmem:[%s5024_s5 + $0x78] sm:$0xff] }
 0x319   : > { %v2517_v21 = vadd.f32 %v2485_v60, %v2419_v37  ;;  %v2180_v26 = vmul.f32 %v5123_v5, %v2147_v10  ;;  %v2182_v27 = vmul.f32 %v5123_v5, %v2149_v8  ;;  %v1346_v22 = vmul.f32 %v5049_v17, %v1313_v54  ;;  %v1771_v53 = vld [vmem:[%s4991_s0 + $0xe8] sm:$0xff]  ;;  %v1773_v59 = vld [vmem:[%s4991_s0 + $0xf8] sm:$0xff] }
 0x31a   : > { %v2519_v39 = vadd.f32 %v2487_v51, %v2421_v3  ;;  %v1918_v18 = vadd.f32 %v1886_v4, %v1820_v9  ;;  %v1920_v20 = vadd.f32 %v1888_v61, %v1822_v12  ;;  %v1348_v30 = vmul.f32 %v5049_v17, %v1315_v58  ;;  %v2441_v61 = vld [vmem:[%s5031_s6 + $0x68] sm:$0xff]  ;;  %v2443_v0 = vld [vmem:[%s5031_s6 + $0x78] sm:$0xff] }
 0x31b   : > { %v1412_v33 = vmul.f32 %v5057_v23, %v1379_v31  ;;  %v1414_v44 = vmul.f32 %v5057_v23, %v1381_v15  ;;  %v1510_v40 = vmul.f32 %v5066_v29, %v1477_v14  ;;  %v1512_v49 = vmul.f32 %v5066_v29, %v1479_v36  ;;  %v1869_v9 = vld [vmem:[%s4998_s24 + $0xe8] sm:$0xff]  ;;  %v1871_v12 = vld [vmem:[%s4998_s24 + $0xf8] sm:$0xff] }
 0x31c   : > { %v2537_v35 = vpack.c.bf16 %v2519_v39, %v2517_v21  ;;  %v2016_v48 = vadd.f32 %v1984_v63, %v1918_v18  ;;  %v2018_v47 = vadd.f32 %v1986_v11, %v1920_v20  ;;  %v1608_v1 = vmul.f32 %v5073_v32, %v1575_v41  ;;  %v1967_v21 = vld [vmem:[%s5002_s18 + $0xe8] sm:$0xff]  ;;  %v2067_v20 = vld [vmem:[%s5009_s2 + $0xf8] sm:$0xff] }
 0x31d   : > { %v1444_v57 = vadd.f32 %v1412_v33, %v1346_v22  ;;  %v1446_v46 = vadd.f32 %v1414_v44, %v1348_v30  ;;  %v1610_v60 = vmul.f32 %v5073_v32, %v1577_v25  ;;  %v2278_v6 = vmul.f32 %v5134_v16, %v2245_v42  ;;  %v2065_v18 = vld [vmem:[%s5009_s2 + $0xe8] sm:$0xff]  ;;  %v2165_v30 = vld [vmem:[%s5013_s3 + $0xf8] sm:$0xff] }
 0x31e   : > { %2757 = vmatmul.mubr.bf16.gmra.mxu1 %v2537_v35  ;;  %v2114_v51 = vadd.f32 %v2082_v13, %v2016_v48  ;;  %v2116_v4 = vadd.f32 %v2084_v34, %v2018_v47  ;;  %v2280_v7 = vmul.f32 %v5134_v16, %v2247_v24  ;;  %v1706_v37 = vmul.f32 %v5087_v43, %v1673_v55  ;;  %v1969_v34 = vld [vmem:[%s5002_s18 + $0xf8] sm:$0xff]  ;;  %v2163_v24 = vld [vmem:[%s5013_s3 + $0xe8] sm:$0xff]  ;;  %v1296_v48 = vld [vmem:[%s4958_s30 + $0x60] sm:$0xff] }
 0x31f   : > { %v1542_v10 = vadd.f32 %v1510_v40, %v1444_v57  ;;  %v1544_v8 = vadd.f32 %v1512_v49, %v1446_v46  ;;  %v1708_v63 = vmul.f32 %v5087_v43, %v1675_v56  ;;  %v2376_v58 = vmul.f32 %v5138_v19, %v2343_v52  ;;  %v1298_v47 = vld [vmem:[%s4958_s30 + $0x70] sm:$0xff]  ;;  %v1460_v46 = vld [vmem:[%s4976_s19 + $0x60] sm:$0xff] }
 0x320   : > { %v2212_v11 = vadd.f32 %v2180_v26, %v2114_v51  ;;  %v2214_v54 = vadd.f32 %v2182_v27, %v2116_v4  ;;  %v2378_v3 = vmul.f32 %v5138_v19, %v2345_v28  ;;  %v1804_v15 = vmul.f32 %v5091_v45, %v1771_v53  ;;  %v1362_v28 = vld [vmem:[%s4969_s13 + $0x60] sm:$0xff]  ;;  %v1364_v57 = vld [vmem:[%s4969_s13 + $0x70] sm:$0xff] }
 0x321   : > { %v1640_v13 = vadd.f32 %v1608_v1, %v1542_v10  ;;  %v1642_v31 = vadd.f32 %v1610_v60, %v1544_v8  ;;  %v1806_v14 = vmul.f32 %v5091_v45, %v1773_v59  ;;  %v2474_v36 = vmul.f32 %v5152_v38, %v2441_v61  ;;  %v1558_v10 = vld [vmem:[%s4980_s1 + $0x60] sm:$0xff]  ;;  %v1560_v8 = vld [vmem:[%s4980_s1 + $0x70] sm:$0xff] }
 0x322   : > { %v2310_v26 = vadd.f32 %v2278_v6, %v2212_v11  ;;  %v2312_v27 = vadd.f32 %v2280_v7, %v2214_v54  ;;  %v2476_v39 = vmul.f32 %v5152_v38, %v2443_v0  ;;  %v1902_v25 = vmul.f32 %v5098_v50, %v1869_v9  ;;  %v2261_v6 = vld [vmem:[%s5020_s4 + $0xe8] sm:$0xff]  ;;  %v1462_v7 = vld [vmem:[%s4976_s19 + $0x70] sm:$0xff] }
 0x323   : > { %v1738_v22 = vadd.f32 %v1706_v37, %v1640_v13  ;;  %v1740_v41 = vadd.f32 %v1708_v63, %v1642_v31  ;;  %v1904_v42 = vmul.f32 %v5098_v50, %v1871_v12  ;;  %v2000_v40 = vmul.f32 %v5112_v62, %v1967_v21  ;;  %v2263_v63 = vld [vmem:[%s5020_s4 + $0xf8] sm:$0xff]  ;;  %v2359_v11 = vld [vmem:[%s5024_s5 + $0xe8] sm:$0xff] }
 0x324   : > { %v2408_v33 = vadd.f32 %v2376_v58, %v2310_v26  ;;  %v2410_v44 = vadd.f32 %v2378_v3, %v2312_v27  ;;  %v2002_v35 = vmul.f32 %v5112_v62, %v1969_v34  ;;  %v2098_v56 = vmul.f32 %v5118_v2, %v2065_v18  ;;  %v2361_v21 = vld [vmem:[%s5024_s5 + $0xf8] sm:$0xff]  ;;  %v2457_v34 = vld [vmem:[%s5031_s6 + $0xe8] sm:$0xff] }
 0x325   : > { %v1836_v49 = vadd.f32 %v1804_v15, %v1738_v22  ;;  %v1838_v55 = vadd.f32 %v1806_v14, %v1740_v41  ;;  %v2100_v52 = vmul.f32 %v5118_v2, %v2067_v20  ;;  %v2196_v51 = vmul.f32 %v5123_v5, %v2163_v24  ;;  %v1656_v15 = vld [vmem:[%s4987_s14 + $0x60] sm:$0xff]  ;;  %v1658_v14 = vld [vmem:[%s4987_s14 + $0x70] sm:$0xff]  ;;  %v2459_v24 = vld [vmem:[%s5031_s6 + $0xf8] sm:$0xff] }
 0x326   : > { %v2506_v1 = vadd.f32 %v2474_v36, %v2408_v33  ;;  %v2508_v60 = vadd.f32 %v2476_v39, %v2410_v44  ;;  %v2198_v4 = vmul.f32 %v5123_v5, %v2165_v30  ;;  %v1329_v61 = vmul.f32 %v5049_v17, %v1296_v48 }
 0x327   : > { %v1934_v53 = vadd.f32 %v1902_v25, %v1836_v49  ;;  %v1936_v59 = vadd.f32 %v1904_v42, %v1838_v55  ;;  %v1331_v0 = vmul.f32 %v5049_v17, %v1298_v47  ;;  %v1395_v54 = vmul.f32 %v5057_v23, %v1362_v28  ;;  %v1754_v25 = vld [vmem:[%s4991_s0 + $0x60] sm:$0xff]  ;;  %v1756_v42 = vld [vmem:[%s4991_s0 + $0x70] sm:$0xff] }
 0x328   : > { %v2532_v37 = vpack.c.bf16 %v2508_v60, %v2506_v1  ;;  %v1397_v58 = vmul.f32 %v5057_v23, %v1364_v57  ;;  %v1493_v3 = vmul.f32 %v5066_v29, %v1460_v46  ;;  %v2294_v13 = vmul.f32 %v5134_v16, %v2261_v6  ;;  %v1952_v60 = vld [vmem:[%s5002_s18 + $0x70] sm:$0xff]  ;;  %v2048_v6 = vld [vmem:[%s5009_s2 + $0x60] sm:$0xff] }
 0x329   : > { %v2032_v9 = vadd.f32 %v2000_v40, %v1934_v53  ;;  %v2034_v12 = vadd.f32 %v2002_v35, %v1936_v59  ;;  %v1495_v31 = vmul.f32 %v5066_v29, %v1462_v7  ;;  %v1427_v26 = vadd.f32 %v1395_v54, %v1329_v61  ;;  %v1852_v35 = vld [vmem:[%s4998_s24 + $0x60] sm:$0xff]  ;;  %v2050_v59 = vld [vmem:[%s5009_s2 + $0x70] sm:$0xff] }
 0x32a   : > { %2732 = vmatprep.mubr.bf16.mxu0 %v2532_v37  ;;  %v1429_v27 = vadd.f32 %v1397_v58, %v1331_v0  ;;  %v1591_v36 = vmul.f32 %v5073_v32, %v1558_v10  ;;  %v1593_v39 = vmul.f32 %v5073_v32, %v1560_v8  ;;  %v2296_v22 = vmul.f32 %v5134_v16, %v2263_v63  ;;  %v2146_v61 = vld [vmem:[%s5013_s3 + $0x60] sm:$0xff]  ;;  %v2148_v63 = vld [vmem:[%s5013_s3 + $0x70] sm:$0xff] }
 0x32b   : > { %v2130_v18 = vadd.f32 %v2098_v56, %v2032_v9  ;;  %v2132_v20 = vadd.f32 %v2100_v52, %v2034_v12  ;;  %v2392_v41 = vmul.f32 %v5138_v19, %v2359_v11  ;;  %v1525_v30 = vadd.f32 %v1493_v3, %v1427_v26  ;;  %v1854_v56 = vld [vmem:[%s4998_s24 + $0x70] sm:$0xff]  ;;  %v1950_v52 = vld [vmem:[%s5002_s18 + $0x60] sm:$0xff] }
 0x32c   : > { %v1527_v33 = vadd.f32 %v1495_v31, %v1429_v27  ;;  %v1689_v44 = vmul.f32 %v5087_v43, %v1656_v15  ;;  %v1691_v40 = vmul.f32 %v5087_v43, %v1658_v14  ;;  %v2394_v49 = vmul.f32 %v5138_v19, %v2361_v21  ;;  %v1312_v11 = vld [vmem:[%s4958_s30 + $0xe0] sm:$0xff]  ;;  %v1314_v12 = vld [vmem:[%s4958_s30 + $0xf0] sm:$0xff]  ;;  %s6125_s30 = sld [smem:[#allocation40_spill]] (%p6124_p8) }
 0x32d   : > { %v2228_v48 = vadd.f32 %v2196_v51, %v2130_v18  ;;  %v2230_v47 = vadd.f32 %v2198_v4, %v2132_v20  ;;  %v2490_v55 = vmul.f32 %v5152_v38, %v2457_v34  ;;  %v1623_v28 = vadd.f32 %v1591_v36, %v1525_v30  ;;  %v1380_v34 = vld [vmem:[%s4969_s13 + $0xf0] sm:$0xff]  ;;  %v1476_v26 = vld [vmem:[%s4976_s19 + $0xe0] sm:$0xff] }
 0x32e   : > { %v1625_v57 = vadd.f32 %v1593_v39, %v1527_v33  ;;  %v1787_v46 = vmul.f32 %v5091_v45, %v1754_v25  ;;  %v1789_v1 = vmul.f32 %v5091_v45, %v1756_v42  ;;  %v2492_v7 = vmul.f32 %v5152_v38, %v2459_v24  ;;  %v1478_v27 = vld [vmem:[%s4976_s19 + $0xf0] sm:$0xff]  ;;  %v2244_v42 = vld [vmem:[%s5020_s4 + $0x60] sm:$0xff] }
 0x32f   : > { %v2326_v51 = vadd.f32 %v2294_v13, %v2228_v48  ;;  %v2328_v4 = vadd.f32 %v2296_v22, %v2230_v47  ;;  %v1885_v53 = vmul.f32 %v5098_v50, %v1852_v35  ;;  %v1721_v0 = vadd.f32 %v1689_v44, %v1623_v28  ;;  %v1378_v13 = vld [vmem:[%s4969_s13 + $0xe0] sm:$0xff]  ;;  %v2246_v24 = vld [vmem:[%s5020_s4 + $0x70] sm:$0xff] }
 0x330   : > { %v1723_v10 = vadd.f32 %v1691_v40, %v1625_v57  ;;  %v1887_v8 = vmul.f32 %v5098_v50, %v1854_v56  ;;  %v1983_v37 = vmul.f32 %v5112_v62, %v1950_v52  ;;  %v1985_v3 = vmul.f32 %v5112_v62, %v1952_v60  ;;  %v1574_v22 = vld [vmem:[%s4980_s1 + $0xe0] sm:$0xff]  ;;  %v1576_v44 = vld [vmem:[%s4980_s1 + $0xf0] sm:$0xff] }
 0x331   : > { %v2424_v54 = vadd.f32 %v2392_v41, %v2326_v51  ;;  %v2426_v58 = vadd.f32 %v2394_v49, %v2328_v4  ;;  %v2081_v9 = vmul.f32 %v5118_v2, %v2048_v6  ;;  %v1819_v31 = vadd.f32 %v1787_v46, %v1721_v0  ;;  %v1672_v49 = vld [vmem:[%s4987_s14 + $0xe0] sm:$0xff]  ;;  %v2344_v28 = vld [vmem:[%s5024_s5 + $0x70] sm:$0xff] }
 0x332   : > { %v1821_v15 = vadd.f32 %v1789_v1, %v1723_v10  ;;  %v2083_v14 = vmul.f32 %v5118_v2, %v2050_v59  ;;  %v2179_v21 = vmul.f32 %v5123_v5, %v2146_v61  ;;  %v2181_v18 = vmul.f32 %v5123_v5, %v2148_v63  ;;  %v2342_v52 = vld [vmem:[%s5024_s5 + $0x60] sm:$0xff]  ;;  %v1674_v46 = vld [vmem:[%s4987_s14 + $0xf0] sm:$0xff]  ;;  %s3387_s13 = sshll.u32 (%p6124_p8), %s6125_s30, 4 }
 0x333   : > { %v2522_v36 = vadd.f32 %v2490_v55, %v2424_v54  ;;  %v2524_v39 = vadd.f32 %v2492_v7, %v2426_v58  ;;  %v1345_v20 = vmul.f32 %v5049_v17, %v1312_v11  ;;  %v1917_v41 = vadd.f32 %v1885_v53, %v1819_v31  ;;  %v1770_v6 = vld [vmem:[%s4991_s0 + $0xe0] sm:$0xff]  ;;  %v2442_v53 = vld [vmem:[%s5031_s6 + $0x70] sm:$0xff]  ;;  %s2798_s19 = ssub.s32 (%p6124_p8), 25, %s3387_s13 }
 0x334   : > { %v1919_v25 = vadd.f32 %v1887_v8, %v1821_v15  ;;  %v1347_v30 = vmul.f32 %v5049_v17, %v1314_v12  ;;  %v1411_v33 = vmul.f32 %v5057_v23, %v1378_v13  ;;  %v1413_v35 = vmul.f32 %v5057_v23, %v1380_v34  ;;  %v2440_v7 = vld [vmem:[%s5031_s6 + $0x60] sm:$0xff]  ;;  %v1772_v0 = vld [vmem:[%s4991_s0 + $0xf0] sm:$0xff]  ;;  %p2799_p1 = scmp.lt.s32.totalorder (%p6124_p8), %s2798_s19, 16 }
 0x335   : > { %v2540_v40 = vpack.c.bf16 %v2524_v39, %v2522_v36  ;;  %v1509_v48 = vmul.f32 %v5066_v29, %v1476_v26  ;;  %v1511_v47 = vmul.f32 %v5066_v29, %v1478_v27  ;;  %v2015_v55 = vadd.f32 %v1983_v37, %v1917_v41  ;;  %v1968_v27 = vld [vmem:[%s5002_s18 + $0xf0] sm:$0xff] }
 0x336   : > { %v2017_v56 = vadd.f32 %v1985_v3, %v1919_v25  ;;  %v1443_v17 = vadd.f32 %v1411_v33, %v1345_v20  ;;  %v1607_v57 = vmul.f32 %v5073_v32, %v1574_v22  ;;  %v2277_v23 = vmul.f32 %v5134_v16, %v2244_v42 }
 0x337   : > { %2764 = vmatprep.mubr.bf16.mxu1 %v2540_v40  ;;  %v2279_v1 = vmul.f32 %v5134_v16, %v2246_v24  ;;  %v1445_v60 = vadd.f32 %v1413_v35, %v1347_v30  ;;  %v1609_v29 = vmul.f32 %v5073_v32, %v1576_v44  ;;  %v2113_v51 = vadd.f32 %v2081_v9, %v2015_v55  ;;  %v1868_v32 = vld [vmem:[%s4998_s24 + $0xe0] sm:$0xff]  ;;  %v1870_v9 = vld [vmem:[%s4998_s24 + $0xf0] sm:$0xff] }
 0x338   : > { %v2115_v4 = vadd.f32 %v2083_v14, %v2017_v56  ;;  %v1541_v59 = vadd.f32 %v1509_v48, %v1443_v17  ;;  %v1705_v61 = vmul.f32 %v5087_v43, %v1672_v49  ;;  %v2375_v10 = vmul.f32 %v5138_v19, %v2342_v52  ;;  %v1966_v14 = vld [vmem:[%s5002_s18 + $0xe0] sm:$0xff]  ;;  %v2164_v35 = vld [vmem:[%s5013_s3 + $0xf0] sm:$0xff] }
 0x339   : > { %v2377_v8 = vmul.f32 %v5138_v19, %v2344_v28  ;;  %v1543_v37 = vadd.f32 %v1511_v47, %v1445_v60  ;;  %v1707_v63 = vmul.f32 %v5087_v43, %v1674_v46  ;;  %v2211_v11 = vadd.f32 %v2179_v21, %v2113_v51  ;;  %v2162_v30 = vld [vmem:[%s5013_s3 + $0xe0] sm:$0xff] }
 0x33a   : > { %v2213_v54 = vadd.f32 %v2181_v18, %v2115_v4  ;;  %v1639_v58 = vadd.f32 %v1607_v57, %v1541_v59  ;;  %v1803_v3 = vmul.f32 %v5091_v45, %v1770_v6  ;;  %v2473_v12 = vmul.f32 %v5152_v38, %v2440_v7  ;;  %v2064_v18 = vld [vmem:[%s5009_s2 + $0xe0] sm:$0xff]  ;;  %v2458_v4 = vld [vmem:[%s5031_s6 + $0xf0] sm:$0xff] }
 0x33b   : > { %v2475_v13 = vmul.f32 %v5152_v38, %v2442_v53  ;;  %v1641_v31 = vadd.f32 %v1609_v29, %v1543_v37  ;;  %v1805_v15 = vmul.f32 %v5091_v45, %v1772_v0  ;;  %v2309_v43 = vadd.f32 %v2277_v23, %v2211_v11  ;;  %v2066_v45 = vld [vmem:[%s5009_s2 + $0xf0] sm:$0xff]  ;;  %v2260_v49 = vld [vmem:[%s5020_s4 + $0xe0] sm:$0xff]  ;;  %s3356_s2 = sshll.u32 %s4951_s17, 7 }
 0x33c   : > { %v2311_v34 = vadd.f32 %v2279_v1, %v2213_v54  ;;  %v1737_v26 = vadd.f32 %v1705_v61, %v1639_v58  ;;  %v1901_v21 = vmul.f32 %v5098_v50, %v1868_v32  ;;  %v1903_v39 = vmul.f32 %v5098_v50, %v1870_v9  ;;  %v2358_v57 = vld [vmem:[%s5024_s5 + $0xe0] sm:$0xff]  ;;  %v2360_v1 = vld [vmem:[%s5024_s5 + $0xf0] sm:$0xff]  ;;  %s6122_s5 = sld [smem:[#allocation61_spill]] }
 0x33d   : > { %v1739_v36 = vadd.f32 %v1707_v63, %v1641_v31  ;;  %v2407_v20 = vadd.f32 %v2375_v10, %v2309_v43  ;;  %v1999_v25 = vmul.f32 %v5112_v62, %v1966_v14  ;;  %v2001_v24 = vmul.f32 %v5112_v62, %v1968_v27  ;;  %v2262_v62 = vld [vmem:[%s5020_s4 + $0xf0] sm:$0xff] }
 0x33e   : > { %v2409_v22 = vadd.f32 %v2377_v8, %v2311_v34  ;;  %v1835_v41 = vadd.f32 %v1803_v3, %v1737_v26  ;;  %v2097_v50 = vmul.f32 %v5118_v2, %v2064_v18  ;;  %v2099_v47 = vmul.f32 %v5118_v2, %v2066_v45  ;;  %v2456_v2 = vld [vmem:[%s5031_s6 + $0xe0] sm:$0xff]  ;;  %s5935_s6 = scalar_lea.vmem [#allocation27], %s3356_s2 }
 0x33f   : > { %v1837_v42 = vadd.f32 %v1805_v15, %v1739_v36  ;;  %v2505_v33 = vadd.f32 %v2473_v12, %v2407_v20  ;;  %v2195_v52 = vmul.f32 %v5123_v5, %v2162_v30  ;;  %v2197_v17 = vmul.f32 %v5123_v5, %v2164_v35 }
 0x340   : > { %v2507_v44 = vadd.f32 %v2475_v13, %v2409_v22  ;;  %v1933_v40 = vadd.f32 %v1901_v21, %v1835_v41  ;;  %v2293_v23 = vmul.f32 %v5134_v16, %v2260_v49  ;;  %v2295_v29 = vmul.f32 %v5134_v16, %v2262_v62 }
 0x341   : > { %v1935_v48 = vadd.f32 %v1903_v39, %v1837_v42  ;;  %v2391_v51 = vmul.f32 %v5138_v19, %v2358_v57  ;;  %v2393_v53 = vmul.f32 %v5138_v19, %v2360_v1  ;;  %v2489_v5 = vmul.f32 %v5152_v38, %v2456_v2 }
 0x342   : > { %v2531_v55 = vpack.c.bf16 %v2507_v44, %v2505_v33  ;;  %v2031_v56 = vadd.f32 %v1999_v25, %v1933_v40  ;;  %v2491_v0 = vmul.f32 %v5152_v38, %v2458_v4  ;;  %v5932_v11 = vld [vmem:[%s6122_s5] ss:$0 sm:$0xff] }
 0x343   : > { %v2033_v28 = vadd.f32 %v2001_v24, %v1935_v48 }
 0x344   : > { %2733 = vmatmul.mubr.bf16.gmra.mxu0 %v2531_v55  ;;  %v2129_v46 = vadd.f32 %v2097_v50, %v2031_v56 }
 0x345   : > { %v2131_v60 = vadd.f32 %v2099_v47, %v2033_v28 }
 0x346   : > { %v2227_v6 = vadd.f32 %v2195_v52, %v2129_v46 }
 0x347   : > { %v2229_v7 = vadd.f32 %v2197_v17, %v2131_v60 }
 0x348   : > { %v2325_v59 = vadd.f32 %v2293_v23, %v2227_v6 }
 0x349   : > { %v2327_v61 = vadd.f32 %v2295_v29, %v2229_v7 }
 0x34a   : > { %v2423_v10 = vadd.f32 %v2391_v51, %v2325_v59 }
 0x34b   : > { %v2425_v8 = vadd.f32 %v2393_v53, %v2327_v61 }
 0x34c   : > { %v2521_v37 = vadd.f32 %v2489_v5, %v2423_v10 }
 0x34d   : > { %v2523_v63 = vadd.f32 %v2491_v0, %v2425_v8 }
 0x34f   : > { %v2539_v16 = vpack.c.bf16 %v2523_v63, %v2521_v37 }
 0x351   : > { %2765 = vmatmul.mubr.bf16.gmra.mxu1 %v2539_v16 }
 0x36c   : > { %v3437_v32 = vpop.f32.mrf.mxu0 }
 0x36e   : > { %v3438_v19 = vpop.f32.mrf.mxu0 }
 0x36f   : > { %v3439_v54 = vadd.f32 %v3438_v19, %v3437_v32 }
 0x370   : > { %v3440_v58 = vpop.f32.mrf.mxu0 }
 0x371   : > { %v2711_v3 = vadd.f32 %v3439_v54, %v5932_v11 }
 0x372   : > { %v3441_v9 = vpop.f32.mrf.mxu0 }
 0x373   : > { %2773 = vst [vmem:[%s5935_s6] sm:$0xff] %v2711_v3  ;;  %v3442_v38 = vadd.f32 %v3441_v9, %v3440_v58 }
 0x375   : > { %v2714_v12 = vadd.f32 %v3442_v38, %v5932_v11 }
 0x377   : > { %2774 = vst [vmem:[%s5935_s6 + $0x8] sm:$0xff] %v2714_v12 }
 0x378   : > { %v3461_v13 = vpop.f32.mrf.mxu1 }
 0x37a   : > { %v3462_v31 = vpop.f32.mrf.mxu1 }
 0x37b   : > { %v3463_v15 = vadd.f32 %v3462_v31, %v3461_v13 }
 0x37c   : > { %v3464_v14 = vpop.f32.mrf.mxu1 }
 0x37d   : > { %v2743_v43 = vadd.f32 %v3463_v15, %v5932_v11 }
 0x37e   : > { %v3465_v34 = vpop.f32.mrf.mxu1 }
 0x37f   : > { %2781 = vst [vmem:[%s5935_s6 + $0x40] sm:$0xff] %v2743_v43  ;;  %v3466_v26 = vadd.f32 %v3465_v34, %v3464_v14 }
 0x381   : > { %v2746_v21 = vadd.f32 %v3466_v26, %v5932_v11 }
 0x383   : > { %2782 = vst [vmem:[%s5935_s6 + $0x48] sm:$0xff] %v2746_v21 }
 0x39e   : > { %v3443_v27 = vpop.f32.mrf.mxu0 }
 0x3a0   : > { %v3444_v36 = vpop.f32.mrf.mxu0 }
 0x3a1   : > { %v3445_v39 = vadd.f32 %v3444_v36, %v3443_v27 }
 0x3a2   : > { %v3446_v18 = vpop.f32.mrf.mxu0 }
 0x3a3   : > { %v2719_v20 = vadd.f32 %v3445_v39, %v5932_v11 }
 0x3a4   : > { %v3447_v22 = vpop.f32.mrf.mxu0 }
 0x3a5   : > { %2775 = vst [vmem:[%s5935_s6 + $0x10] sm:$0xff] %v2719_v20  ;;  %v3448_v41 = vadd.f32 %v3447_v22, %v3446_v18 }
 0x3a7   : > { %v2722_v25 = vadd.f32 %v3448_v41, %v5932_v11 }
 0x3a9   : > { %2776 = vst [vmem:[%s5935_s6 + $0x18] sm:$0xff] %v2722_v25 }
 0x3ab   : > { %v3467_v45 = vpop.f32.mrf.mxu1 }
 0x3ad   : > { %v3468_v42 = vpop.f32.mrf.mxu1 }
 0x3ae   : > { %v3469_v24 = vadd.f32 %v3468_v42, %v3467_v45 }
 0x3af   : > { %v3470_v30 = vpop.f32.mrf.mxu1 }
 0x3b0   : > { %v2751_v33 = vadd.f32 %v3469_v24, %v5932_v11 }
 0x3b1   : > { %v3471_v44 = vpop.f32.mrf.mxu1 }
 0x3b2   : > { %2783 = vst [vmem:[%s5935_s6 + $0x50] sm:$0xff] %v2751_v33  ;;  %v3472_v40 = vadd.f32 %v3471_v44, %v3470_v30 }
 0x3b4   : > { %v2754_v50 = vadd.f32 %v3472_v40, %v5932_v11 }
 0x3b6   : > { %2784 = vst [vmem:[%s5935_s6 + $0x58] sm:$0xff] %v2754_v50 }
 0x3d1   : > { %v3449_v35 = vpop.f32.mrf.mxu0 }
 0x3d3   : > { %v3450_v48 = vpop.f32.mrf.mxu0 }
 0x3d4   : > { %v3451_v47 = vadd.f32 %v3450_v48, %v3449_v35 }
 0x3d5   : > { %v3452_v49 = vpop.f32.mrf.mxu0 }
 0x3d6   : > { %v2727_v55 = vadd.f32 %v3451_v47, %v5932_v11 }
 0x3d7   : > { %v3453_v56 = vpop.f32.mrf.mxu0 }
 0x3d8   : > { %2777 = vst [vmem:[%s5935_s6 + $0x20] sm:$0xff] %v2727_v55  ;;  %v3454_v52 = vadd.f32 %v3453_v56, %v3452_v49 }
 0x3da   : > { %v2730_v62 = vadd.f32 %v3454_v52, %v5932_v11 }
 0x3dc   : > { %2778 = vst [vmem:[%s5935_s6 + $0x28] sm:$0xff] %v2730_v62 }
 0x3de   : > { %v3473_v28 = vpop.f32.mrf.mxu1 }
 0x3e0   : > { %v3474_v17 = vpop.f32.mrf.mxu1 }
 0x3e1   : > { %v3475_v57 = vadd.f32 %v3474_v17, %v3473_v28 }
 0x3e2   : > { %v3476_v46 = vpop.f32.mrf.mxu1 }
 0x3e3   : > { %v2759_v23 = vadd.f32 %v3475_v57, %v5932_v11 }
 0x3e4   : > { %v3477_v1 = vpop.f32.mrf.mxu1 }
 0x3e5   : > { %2785 = vst [vmem:[%s5935_s6 + $0x60] sm:$0xff] %v2759_v23  ;;  %v3478_v60 = vadd.f32 %v3477_v1, %v3476_v46 }
 0x3e7   : > { %v2762_v29 = vadd.f32 %v3478_v60, %v5932_v11 }
 0x3e9   : > { %2786 = vst [vmem:[%s5935_s6 + $0x68] sm:$0xff] %v2762_v29 }
 0x404   : > { %v3455_v2 = vpop.f32.mrf.mxu0 }
 0x406   : > { %v3456_v6 = vpop.f32.mrf.mxu0 }
 0x407   : > { %v3457_v51 = vadd.f32 %v3456_v6, %v3455_v2 }
 0x408   : > { %v3458_v4 = vpop.f32.mrf.mxu0 }
 0x409   : > { %v2735_v7 = vadd.f32 %v3457_v51, %v5932_v11 }
 0x40a   : > { %v3459_v53 = vpop.f32.mrf.mxu0 }
 0x40b   : > { %2779 = vst [vmem:[%s5935_s6 + $0x30] sm:$0xff] %v2735_v7  ;;  %v3460_v59 = vadd.f32 %v3459_v53, %v3458_v4 }
 0x40d   : > { %v2738_v5 = vadd.f32 %v3460_v59, %v5932_v11 }
 0x40f   : > { %2780 = vst [vmem:[%s5935_s6 + $0x38] sm:$0xff] %v2738_v5 }
 0x411   : > { %v3479_v61 = vpop.f32.mrf.mxu1 }
 0x413   : > { %v3480_v0 = vpop.f32.mrf.mxu1 }
 0x414   : > { %v3481_v10 = vadd.f32 %v3480_v0, %v3479_v61 }
 0x415   : > { %v3482_v8 = vpop.f32.mrf.mxu1 }
 0x416   : > { %v2767_v37 = vadd.f32 %v3481_v10, %v5932_v11 }
 0x417   : > { %v3483_v63 = vpop.f32.mrf.mxu1 }
 0x418   : > { %2787 = vst [vmem:[%s5935_s6 + $0x70] sm:$0xff] %v2767_v37  ;;  %v3484_v16 = vadd.f32 %v3483_v63, %v3482_v8  ;;  %2796 = sbr.rel (!%p6124_p8) target bundleno = 1081 (0x439), region = 148 }
 0x41a   : > { %v2770_v32 = vadd.f32 %v3484_v16, %v5932_v11 }
 0x41c   : > { %2788 = vst [vmem:[%s5935_s6 + $0x78] sm:$0xff] %v2770_v32 }
 0x41d   : > { %s6175_s19 = smov (!%p2799_p1, %s2798_s19), 16 }
 0x41e   : > { %s5972_s1 = sshll.u32 %s6175_s19, 7 }
 0x41f   : > { %s2803_s14 = ssub.s32 2048, %s5972_s1 }
 0x420   : > { %2804 = vsyncadd %s2790_s7, %s2803_s14  ;;  %s6126_s0 = sld [smem:[#allocation41_spill]]  ;;  %p3389_p6 = scmp.ne.s32.totalorder %s5972_s1, 0 }
 0x421   : > { %s2811_s18 = sshll.u32 %s5935_s6, 4  ;;  %s6127_s21 = sld [smem:[#allocation62_spill]]  ;;  %s5980_s18 = int_to_ptr.vmem [resolvable:$true] %s2811_s18 }
 0x422   : > { %s4040_s3 = scalar_lea.vmem %s5980_s18, %s5972_s1  ;;  %s4213_s4 = smov [#allocation27]  }
 0x423   : > { %p4041_p4 = scmp.ne.s32.totalorder %s5980_s18, %s4040_s3  ;;  %s4044_s5 = sshll.u32 %s4213_s4, 4  ;;  %s4045_s5 = int_to_ptr.vmem [resolvable:$false] %s4044_s5 }
 0x424   : > { %s4046_s6 = scalar_lea.vmem %s4045_s5, 4096  ;;  %p4047_p7 = scmp.lt.s32.totalorder %s5980_s18, %s4045_s5 }
 0x425   : > { %p4042_p5 = pnand %p4041_p4, %p3389_p6  ;;  %p4048_p10 = scmp.lt.s32.totalorder %s4046_s6, %s4040_s3 }
 0x426   : > { %s3514_s24 = smul.u32 25, %s6126_s0 }
 0x427   : > { %s6128_s2 = smov %s6127_s21  ;;  %p4043_p9 = pneg %p4042_p5 }
 0x428   : > { %s2807_s29 = sadd.s32 %s3514_s24, %s3387_s13  ;;  %p4049_p11 = por %p4048_p10, %p4047_p7 }
 0x429   : > { %s3390_s22 = sshll.u32 %s2807_s29, 7 }
 0x42a   : > { %s5985_s25 = scalar_lea.hbm %s6127_s21, %s3390_s22  ;;  %p4050_p13 = pnand %p4049_p11, %p4043_p9 }
 0x42c   : > { %4053 = shalt.err (!%p4050_p13)
}
 0x42d   : > { %s4054_s8 = scalar_lea.hbm %s5985_s25, %s5972_s1  ;;  %s4058_s19 = scalar_lea.hbm %s6128_s2, 6400 }
 0x42e   : > { %p4055_p12 = scmp.ne.s32.totalorder %s5985_s25, %s4054_s8  ;;  %p4059_p3 = scmp.lt.s32.totalorder %s5985_s25, %s6128_s2 }
 0x42f   : > { %p4060_p8 = scmp.lt.s32.totalorder %s4058_s19, %s4054_s8 }
 0x430   : > { %p4056_p0 = pnand %p4055_p12, %p3389_p6 }
 0x431   : > { %p4061_p1 = por %p4060_p8, %p4059_p3 }
 0x432   : > { %p4057_p2 = pneg %p4056_p0 }
 0x434   : > { %p4062_p4 = pnand %p4061_p1, %p4057_p2 }
 0x436   : > { %4065 = shalt.err (!%p4062_p4)
}
 0x437   : > { %s4214_s24 = smov 128   ;;  %s4215_s29 = smov 8  }
 0x438   : > { %2817 = dma.vmem_to_hbm [thread:$0]  (%p3389_p6), %s5980_s18, %s5972_s1, %s5985_s25, %s2790_s7, %s4214_s24, %s4214_s24, %s4215_s29  }
 0x439 PF: > { %s6129_s22 = sld [smem:[#allocation38_spill]]  ;;  %p3552_p5 = scmp.ge.s32.totalorder %s4168_s28, 2 }
 0x43a   : > { %s6130_s15 = sld [smem:[#allocation47_spill]] }
 0x43f   : > { %s2826_s20 = sand.u32 1, %s6129_s22  }
 0x440   : > { %p6131_p9 = scmp.ne.s32.totalorder %s6130_s15, 0  ;;  %s2827_s21 = scalar_lea.sflag [#allocation4], %s2826_s20 }
 0x442   : > { %p3545_p7 = pnand %p3552_p5, %p6131_p9 }
 0x444   : > { %p3546_p10 = pneg %p3545_p7 }
 0x446   : > { %4135 = dma.done.wait (%p3546_p10), %s2827_s21, 2048  }
 0x447   : > { %4137 = vsyncadd (%p3546_p10), %s2827_s21, 4294965248  ;;  %s52_s28 = sadd.s32 1, %s4168_s28   ;;  %s6132_s21 = sld [smem:[#allocation39_spill]] }
 0x448   : > { %p49_p11 = scmp.ge.s32.totalorder %s52_s28, 6   ;;  %s6133_s17 = sld [smem:[#allocation48_spill]] }
 0x449   : > { %s6134_s7 = sld [smem:[#allocation43_spill]]  ;;  %s6136_s22 = smov %s4148_s23 }
 0x44a   : > { %s6135_s1 = sld [smem:[#allocation44_spill]]  ;;  %s6138_s24 = smov %s4160_s26 }
 0x44b   : > { %s6139_s25 = smov %s4164_s27 }
 0x44c   :  { %51 = sbr.rel (!%p49_p11) target bundleno = 35 (0x23), region = 282 }
 0x44e   : > { %s6137_s23 = smov %s6133_s17 }
 0x44f   : > { %s6140_s26 = smov %s6134_s7 }
 0x450   : > { %s6141_s27 = smov %s6135_s1 }
 0x451   :  { %2832 = vsyncpa [#allocation3], 1 }
 0x452   :  { %2834 = vsyncpa [#allocation3 + $0x1], 1 }
 0x453   :  { %2835 = vsyncpa [#allocation8], 1 }
 0x454   :  { %2837 = vsyncpa [#allocation8 + $0x1], 1 }
 0x455   :  { %2838 = vsyncpa [#allocation11], 1 }
 0x456   :  { %2840 = vsyncpa [#allocation11 + $0x1], 1 }
 0x457   :  { %2841 = vsyncpa [#allocation14], 1 }
 0x458   :  { %2843 = vsyncpa [#allocation14 + $0x1], 1 }
 0x459   :  { %2844 = vsyncpa [#allocation17], 1 }
 0x45a   :  { %2846 = vsyncpa [#allocation17 + $0x1], 1 }
 0x45b   :  { %2847 = vsyncpa [#allocation20], 1 }
 0x45c   :  { %2849 = vsyncpa [#allocation20 + $0x1], 1 }
 0x45d   :  { %2850 = vsyncpa [#allocation23], 1 }
 0x45e   :  { %2852 = vsyncpa [#allocation23 + $0x1], 1 }
 0x45f   :  { %2853 = vsyncpa [#allocation26], 1 }
 0x460   :  { %2854 = vsyncpa [#allocation4], 1 }
 0x461   :  { %2856 = vsyncpa [#allocation4 + $0x1], 1 }
 0x462   :  { %2857 = vsyncpa [#allocation5], 1 }
 0x463   :  { %2859 = vsyncpa [#allocation5 + $0x1], 1 }

</bundles_post_ra>
